<compile_context>
chip_gen: v7x
topology: tpu7x:2x2x1
jax: 0.10.0
libtpu: 0.0.40
codegen_flags: <defaults>
</compile_context>

<pallas_src>
import functools

import jax
import jax.numpy as jnp
import numpy as np
from jax.experimental import pallas as pl
from jax.experimental.pallas import tpu as pltpu

_LANE = 128


def _round_up(x, m):
    return ((x + m - 1) // m) * m


def _padded_bytes(shape, dtype):
    """Approximate Mosaic VMEM footprint: last dim padded to 128 lanes,
    second-to-last to the dtype's sublane pack."""
    itemsize = np.dtype(dtype).itemsize
    dims = list(shape)
    if not dims:
        return itemsize
    dims[-1] = _round_up(dims[-1], _LANE)
    if len(dims) >= 2:
        dims[-2] = _round_up(dims[-2], 8 * max(1, 4 // itemsize))
    n = 1
    for d in dims:
        n *= d
    return n * itemsize


def _vmem_cap_bytes():
    try:
        cap = int(getattr(pltpu.get_tpu_info(), "vmem_capacity_bytes", 0))
        if cap > 0:
            return cap
    except Exception:
        pass
    return 64 << 20          # conservative default (v7x has the smallest VMEM)


def _prefers_wide_mxu():
    # v6e / v7x have 256-wide MXUs; v2-v5e are 128-wide.
    try:
        kind = jax.devices()[0].device_kind.lower()
    except Exception:
        return True
    return not any(tag in kind for tag in ("v2", "v3", "v4", "v5"))


def _pick_tn(npad):
    if npad % 256 == 0 and _prefers_wide_mxu():
        return 256
    return 128


def _pick_m_tile(mimg, cap=4096):
    if mimg <= cap:
        return mimg
    for t in range(cap, 7, -8):
        if mimg % t == 0:
            return t
    return mimg


def _mosaic_params(dimension_semantics, vmem_bytes_estimate):
    cap = _vmem_cap_bytes()
    # ~48 MiB clamp on v7x (64 MiB physical), ~96 MiB on v5e/v6e (128 MiB).
    clamp = min(int(cap * 3 // 4), 100 << 20)
    limit = int(min(max(vmem_bytes_estimate + (4 << 20), 24 << 20), clamp))
    return pltpu.CompilerParams(dimension_semantics=dimension_semantics,
                                vmem_limit_bytes=limit)


# ------------------------- Pallas kernels -----------------------------------

def _conv_kernel(*refs, tap_table, ho, wo, out_padded, in_affine, stat_rows):
    """One (image, out-channel tile) step of a KxK conv: optional fused input
    BN-affine+ReLU, im2col patch staged in VMEM, a single MXU dot, output
    store (flat or zero-padded-slab layout) and per-image BN partial sums."""
    if in_affine:
        (x_ref, w_ref, sc_ref, bi_ref, y_ref, sum_ref, sq_ref,
         acc_ref, patch_ref, act_ref) = refs
    else:
        (x_ref, w_ref, y_ref, sum_ref, sq_ref, acc_ref, patch_ref) = refs

    mimg = ho * wo
    cin = x_ref.shape[-1]
    tn = acc_ref.shape[-1]

    if in_affine:
        hp, wp = act_ref.shape[0], act_ref.shape[1]
        # h1 = relu(BN1(conv1_out)) applied to the slab right after the DMA.
        sc = sc_ref[...].reshape(1, 1, cin)
        bi = bi_ref[...].reshape(1, 1, cin)
        act_ref[...] = jnp.maximum(
            x_ref[0, 0].astype(jnp.float32) * sc + bi, 0.0
        ).astype(jnp.bfloat16)
        # The affine turned the conv1-written zero halo into relu(bias);
        # re-zero the 1-wide ring so the spatial padding stays exact.
        zrow = jnp.zeros((1, wp, cin), jnp.bfloat16)
        zcol = jnp.zeros((hp, 1, cin), jnp.bfloat16)
        act_ref[pl.ds(0, 1), :, :] = zrow
        act_ref[pl.ds(hp - 1, 1), :, :] = zrow
        act_ref[:, pl.ds(0, 1), :] = zcol
        act_ref[:, pl.ds(wp - 1, 1), :] = zcol

        def load_tap(ph, ro, co):
            return act_ref[pl.ds(ro, ho), pl.ds(co, wo), :]
    else:
        def load_tap(ph, ro, co):
            return x_ref[0, ph, pl.ds(ro, ho), pl.ds(co, wo), :]

    # Stage the im2col patch for this image in VMEM (K = ntaps*cin on lanes)
    # and run ONE MXU dot instead of ntaps tiny-K dots.
    for t, (ph, ro, co) in enumerate(tap_table):
        patch_ref[:, pl.ds(t * cin, cin)] = (
            load_tap(ph, ro, co).reshape(mimg, cin))

    acc_ref[...] = jnp.dot(patch_ref[...], w_ref[...],
                           preferred_element_type=jnp.float32)

    if out_padded:
        # Raw conv output written directly into the consumer's zero-padded
        # slab layout (no XLA-side pad round trip for h1).
        hp_o, wp_o = y_ref.shape[1], y_ref.shape[2]
        y_ref[0] = jnp.zeros((hp_o, wp_o, tn), y_ref.dtype)
        y_ref[0, pl.ds(1, ho), pl.ds(1, wo), :] = (
            acc_ref[...].reshape(ho, wo, tn).astype(y_ref.dtype))
    else:
        y_ref[0] = acc_ref[...].astype(y_ref.dtype)

    # Per-image BatchNorm partial sums from the f32 accumulator, reduced in
    # 8-sublane chunks (leading-axis VPU adds; no full-tile acc*acc temp).
    if stat_rows == 8:
        s = jnp.zeros((8, tn), jnp.float32)
        q = jnp.zeros((8, tn), jnp.float32)
        for r in range(mimg // 8):
            c = acc_ref[pl.ds(r * 8, 8), :]
            s = s + c
            q = q + c * c
        sum_ref[0] = s
        sq_ref[0] = q
    else:
        a = acc_ref[...]
        sum_ref[0] = jnp.sum(a, axis=0, keepdims=True)
        sq_ref[0] = jnp.sum(a * a, axis=0, keepdims=True)


def _epilogue_kernel(y_ref, s2_ref, b2_ref, r_ref, sr_ref, br_ref, o_ref):
    """Fused BN2 affine + shortcut affine (or identity) + add + ReLU."""
    h = y_ref[0].astype(jnp.float32) * s2_ref[...] + b2_ref[...]
    r = r_ref[0].astype(jnp.float32) * sr_ref[...] + br_ref[...]
    o_ref[0] = jnp.maximum(h + r, 0.0).astype(o_ref.dtype)


# ------------------------- pallas_call wrappers ------------------------------

def _conv_pallas(phases, w_mat, tap_table, ho, wo, *, out_padded, tn,
                 scale_in=None, bias_in=None):
    b, nph, ph_r, ph_c, cin = phases.shape
    K, npad = w_mat.shape
    ntaps = len(tap_table)
    assert K == ntaps * cin and npad % tn == 0
    mimg = ho * wo
    stat_rows = 8 if mimg % 8 == 0 else 1
    in_affine = scale_in is not None

    kernel = functools.partial(
        _conv_kernel, tap_table=tuple(tap_table), ho=ho, wo=wo,
        out_padded=out_padded, in_affine=in_affine, stat_rows=stat_rows)

    if out_padded:
        y_shape = (b, ho + 2, wo + 2, npad)
        y_block = (1, ho + 2, wo + 2, tn)
        y_spec = pl.BlockSpec(y_block, lambda j, i: (i, 0, 0, j))
    else:
        y_shape = (b, mimg, npad)
        y_block = (1, mimg, tn)
        y_spec = pl.BlockSpec(y_block, lambda j, i: (i, 0, j))

    in_specs = [
        pl.BlockSpec((1, nph, ph_r, ph_c, cin), lambda j, i: (i, 0, 0, 0, 0)),
        # weight tile depends only on the channel tile -> stays resident.
        pl.BlockSpec((K, tn), lambda j, i: (0, j)),
    ]
    args = [phases, w_mat]
    if in_affine:
        in_specs += [pl.BlockSpec((1, cin), lambda j, i: (0, 0)),
                     pl.BlockSpec((1, cin), lambda j, i: (0, 0))]
        args += [scale_in.astype(jnp.float32).reshape(1, cin),
                 bias_in.astype(jnp.float32).reshape(1, cin)]

    scratch = [pltpu.VMEM((mimg, tn), jnp.float32),       # f32 conv accumulator
               pltpu.VMEM((mimg, K), jnp.bfloat16)]       # staged im2col patch
    if in_affine:
        scratch.append(pltpu.VMEM((ph_r, ph_c, cin), jnp.bfloat16))  # h1 slab

    vmem_est = (2 * _padded_bytes((nph, ph_r, ph_c, cin), jnp.bfloat16)
                + 2 * _padded_bytes((K, tn), jnp.bfloat16)
                + 2 * _padded_bytes(y_block[1:], jnp.bfloat16)
                + 4 * _padded_bytes((stat_rows, tn), jnp.float32)
                + _padded_bytes((mimg, tn), jnp.float32)
                + _padded_bytes((mimg, K), jnp.bfloat16)
                + 2 * _padded_bytes((mimg, tn), jnp.float32))   # temp headroom
    if in_affine:
        vmem_est += (_padded_bytes((ph_r, ph_c, cin), jnp.bfloat16)
                     + 4 * _padded_bytes((1, cin), jnp.float32)
                     + 2 * _padded_bytes((ph_r, ph_c, cin), jnp.float32))

    return pl.pallas_call(
        kernel,
        out_shape=(
            jax.ShapeDtypeStruct(y_shape, jnp.bfloat16),
            jax.ShapeDtypeStruct((b, stat_rows, npad), jnp.float32),
            jax.ShapeDtypeStruct((b, stat_rows, npad), jnp.float32),
        ),
        grid_spec=pltpu.PrefetchScalarGridSpec(
            num_scalar_prefetch=0,
            grid=(npad // tn, b),
            in_specs=in_specs,
            out_specs=[
                y_spec,
                pl.BlockSpec((1, stat_rows, tn), lambda j, i: (i, 0, j)),
                pl.BlockSpec((1, stat_rows, tn), lambda j, i: (i, 0, j)),
            ],
            scratch_shapes=scratch),
        # per-image stats -> no cross-step accumulation -> both axes parallel
        compiler_params=_mosaic_params(("parallel", "parallel"), vmem_est),
    )(*args)


def _fused_epilogue(y2, scale2, bias2, res, scale_r, bias_r):
    b, mimg, npad = y2.shape
    tm = _pick_m_tile(mimg)
    spec_big = pl.BlockSpec((1, tm, npad), lambda i, m: (i, m, 0))
    spec_vec = pl.BlockSpec((1, npad), lambda i, m: (0, 0))
    vmem_est = (6 * _padded_bytes((tm, npad), jnp.bfloat16)
                + 8 * _padded_bytes((1, npad), jnp.float32)
                + 3 * _padded_bytes((tm, npad), jnp.float32))
    return pl.pallas_call(
        _epilogue_kernel,
        out_shape=jax.ShapeDtypeStruct((b, mimg, npad), jnp.bfloat16),
        grid_spec=pltpu.PrefetchScalarGridSpec(
            num_scalar_prefetch=0,
            grid=(b, mimg // tm),
            in_specs=[spec_big, spec_vec, spec_vec,
                      spec_big, spec_vec, spec_vec],
            out_specs=spec_big),
        compiler_params=_mosaic_params(("parallel", "parallel"), vmem_est),
    )(y2, scale2, bias2, res, scale_r, bias_r)


# ------------------------- JAX glue ------------------------------------------

def _phase_decompose(x_nhwc, ksize, stride, pad):
    """Zero-pad spatially and split the input into per-(row,col)-parity phase
    slabs so every conv tap becomes a unit-stride, statically-offset window of
    one slab (~1x input bytes, vs 9x for HBM im2col)."""
    b, h, w, c = x_nhwc.shape
    ho = (h + 2 * pad - ksize) // stride + 1
    wo = (w + 2 * pad - ksize) // stride + 1
    xp = jnp.pad(x_nhwc, ((0, 0), (pad, pad), (pad, pad), (0, 0)))
    hp, wp = h + 2 * pad, w + 2 * pad
    ph_r = (ksize - 1) // stride + ho
    ph_c = (ksize - 1) // stride + wo
    hp2 = max(_round_up(hp, stride), stride * ph_r)
    wp2 = max(_round_up(wp, stride), stride * ph_c)
    xp = jnp.pad(xp, ((0, 0), (0, hp2 - hp), (0, wp2 - wp), (0, 0)))

    phase_ids = sorted({(di % stride, dj % stride)
                        for di in range(ksize) for dj in range(ksize)})
    phases = jnp.stack(
        [xp[:, a::stride, bb::stride, :][:, :ph_r, :ph_c, :]
         for (a, bb) in phase_ids], axis=1)    # (B, nphase, ph_r, ph_c, C)
    tap_table = tuple(
        (phase_ids.index((di % stride, dj % stride)), di // stride, dj // stride)
        for di in range(ksize) for dj in range(ksize))
    return phases, tap_table, ho, wo


def _weight_matrix(w_oihw, ksize, cin_eff, npad):
    """(O, I, kh, kw) -> (ksize*ksize*cin_eff, npad) bf16, K order matching the
    in-kernel patch construction (tap-major, then input channel)."""
    out_ch, w_in = w_oihw.shape[0], w_oihw.shape[1]
    wt = jnp.transpose(w_oihw, (2, 3, 1, 0))                 # (kh, kw, in, out)
    wt = jnp.pad(wt, ((0, 0), (0, 0), (0, cin_eff - w_in), (0, npad - out_ch)))
    return wt.reshape(ksize * ksize * cin_eff, npad).astype(jnp.bfloat16)


def _bn_affine(sums, sqs, gamma, beta, count, npad, out_ch, eps):
    """Training-mode BatchNorm2d scale/bias from per-image partial sums."""
    s = jnp.sum(sums, axis=(0, 1))
    q = jnp.sum(sqs, axis=(0, 1))
    mean = s / count
    # E[x^2]-E[x]^2 in f32; clamp tiny negative residue.
    var = jnp.maximum(q / count - mean * mean, 0.0)
    g = jnp.pad(gamma.astype(jnp.float32), (0, npad - out_ch))
    be = jnp.pad(beta.astype(jnp.float32), (0, npad - out_ch))
    scale = g * jax.lax.rsqrt(var + eps)
    bias = be - mean * scale
    return scale, bias


def init_residual_block_params(key, in_ch, out_ch, downsample_rate):
    ks = jax.random.split(key, 9)
    params = {
        "w1": 0.1 * jax.random.normal(ks[0], (out_ch, in_ch, 3, 3), jnp.float32),
        "g1": 1.0 + 0.1 * jax.random.normal(ks[1], (out_ch,), jnp.float32),
        "b1": 0.1 * jax.random.normal(ks[2], (out_ch,), jnp.float32),
        "w2": 0.1 * jax.random.normal(ks[3], (out_ch, out_ch, 3, 3), jnp.float32),
        "g2": 1.0 + 0.1 * jax.random.normal(ks[4], (out_ch,), jnp.float32),
        "b2": 0.1 * jax.random.normal(ks[5], (out_ch,), jnp.float32),
    }
    if downsample_rate != 1:
        params.update({
            "wt": 0.1 * jax.random.normal(ks[6], (out_ch, in_ch, 1, 1), jnp.float32),
            "gt": 1.0 + 0.1 * jax.random.normal(ks[7], (out_ch,), jnp.float32),
            "bt": 0.1 * jax.random.normal(ks[8], (out_ch,), jnp.float32),
        })
    return params


def residual_block_forward(x_nchw, params, downsample_rate, eps=1e-5):
    x = jnp.transpose(x_nchw, (0, 2, 3, 1))                   # NCHW -> NHWC
    b, _, _, in_ch = x.shape
    out_ch = params["w1"].shape[0]
    npad = _round_up(out_ch, _LANE)                           # lane-dense out
    tn = _pick_tn(npad)
    xb = x.astype(jnp.bfloat16)

    # ---- layer1 conv (3x3, stride = downsample_rate); raw output written in
    # conv2's zero-padded slab layout; BN1 stats from the f32 accumulator. ----
    ph1, taps1, ho, wo = _phase_decompose(xb, 3, downsample_rate, 1)
    w1m = _weight_matrix(params["w1"], 3, in_ch, npad)
    y1, s1, q1 = _conv_pallas(ph1, w1m, taps1, ho, wo, out_padded=True, tn=tn)
    m = b * ho * wo
    scale1, bias1 = _bn_affine(s1, q1, params["g1"], params["b1"], m, npad,
                               out_ch, eps)

    # ---- layer2 conv (3x3 s1 p1) with BN1 affine + ReLU fused into the slab
    # consumption: h1 never makes an extra HBM round trip. ----
    slab2 = y1[:, None]                                       # (B,1,ho+2,wo+2,npad)
    taps2 = tuple((0, di, dj) for di in range(3) for dj in range(3))
    w2m = _weight_matrix(params["w2"], 3, npad, npad)
    y2, s2, q2 = _conv_pallas(slab2, w2m, taps2, ho, wo, out_padded=False,
                              tn=tn, scale_in=scale1, bias_in=bias1)
    scale2, bias2 = _bn_affine(s2, q2, params["g2"], params["b2"], m, npad,
                               out_ch, eps)

    # ---- shortcut ----
    if downsample_rate != 1:
        pht, tapst, ho_t, wo_t = _phase_decompose(xb, 1, downsample_rate, 0)
        wtm = _weight_matrix(params["wt"], 1, in_ch, npad)
        yt, st, qt = _conv_pallas(pht, wtm, tapst, ho_t, wo_t,
                                  out_padded=False, tn=tn)
        scale_r, bias_r = _bn_affine(st, qt, params["gt"], params["bt"],
                                     b * ho_t * wo_t, npad, out_ch, eps)
        res = yt
    else:
        if in_ch != out_ch:
            raise ValueError("identity shortcut requires in_ch == out_ch when "
                             "downsample_rate == 1")
        res = jnp.pad(xb, ((0, 0), (0, 0), (0, 0), (0, npad - in_ch)))
        res = res.reshape(b, ho * wo, npad)
        scale_r = jnp.ones((npad,), jnp.float32)
        bias_r = jnp.zeros((npad,), jnp.float32)

    # ---- single fused epilogue: BN2 + shortcut-BN (or identity) + add + ReLU
    out = _fused_epilogue(
        y2, scale2.reshape(1, npad), bias2.reshape(1, npad),
        res, scale_r.reshape(1, npad), bias_r.reshape(1, npad))
    out = out.reshape(b, ho, wo, npad)[..., :out_ch].astype(jnp.float32)
    return jnp.transpose(out, (0, 3, 1, 2))                   # NHWC -> NCHW


# ------------------------- pure-JAX reference (sanity check) -----------------

def _reference_forward(x, params, downsample_rate, eps=1e-5):
    def conv(x, w, stride, pad):
        return jax.lax.conv_general_dilated(
            x, w, window_strides=(stride, stride),
            padding=((pad, pad), (pad, pad)),
            dimension_numbers=("NCHW", "OIHW", "NCHW"))

    def bn(x, g, b):
        mean = x.mean(axis=(0, 2, 3), keepdims=True)
        var = x.var(axis=(0, 2, 3), keepdims=True)
        return ((x - mean) * jax.lax.rsqrt(var + eps) * g.reshape(1, -1, 1, 1)
                + b.reshape(1, -1, 1, 1))

    h = jax.nn.relu(bn(conv(x, params["w1"], downsample_rate, 1),
                       params["g1"], params["b1"]))
    h = bn(conv(h, params["w2"], 1, 1), params["g2"], params["b2"])
    if downsample_rate != 1:
        x = bn(conv(x, params["wt"], downsample_rate, 0),
               params["gt"], params["bt"])
    return jax.nn.relu(h + x)


if __name__ == "__main__":
    key = jax.random.PRNGKey(0)
    kx, kx2, kp1, kp2 = jax.random.split(key, 4)
    fwd = jax.jit(residual_block_forward, static_argnums=(2,))

    # Case 1: downsample_rate=2, in_ch != out_ch -> exercises the transition layer.
    x = jax.random.normal(kx, (2, 4, 16, 16), jnp.float32)
    params1 = init_residual_block_params(kp1, 4, 8, 2)
    out1 = jax.block_until_ready(fwd(x, params1, 2))
    assert out1.shape == (2, 8, 8, 8)
    ref1 = _reference_forward(x, params1, 2)
    np.testing.assert_allclose(np.asarray(out1), np.asarray(ref1),
                               rtol=5e-2, atol=5e-2)

    # Case 2: downsample_rate=1, identity shortcut.
    x2 = jax.random.normal(kx2, (2, 8, 16, 16), jnp.float32)
    params2 = init_residual_block_params(kp2, 8, 8, 1)
    out2 = jax.block_until_ready(fwd(x2, params2, 1))
    assert out2.shape == (2, 8, 16, 16)
    ref2 = _reference_forward(x2, params2, 1)
    np.testing.assert_allclose(np.asarray(out2), np.asarray(ref2),
                               rtol=5e-2, atol=5e-2)

    print("KERNEL_OK")
</pallas_src>

<mosaic_0001>
module attributes {stable_mosaic.version = 11 : i64} {
  func.func @_conv_kernel(%arg0: i32, %arg1: i32, %arg2: memref<1x1x8x8x4xbf16, #tpu.memory_space<vmem>>, %arg3: memref<4x128xbf16, #tpu.memory_space<vmem>>, %arg4: memref<1x64x128xbf16, #tpu.memory_space<vmem>>, %arg5: memref<1x8x128xf32, #tpu.memory_space<vmem>>, %arg6: memref<1x8x128xf32, #tpu.memory_space<vmem>>, %arg7: memref<64x128xf32, #tpu.memory_space<vmem>>, %arg8: memref<64x4xbf16, #tpu.memory_space<vmem>>) attributes {dimension_semantics = [#tpu.dimension_semantics<parallel>, #tpu.dimension_semantics<parallel>], iteration_bounds = array<i64: 1, 2>, scalar_prefetch = 0 : i64, scratch_operands = 2 : i64, tpu.core_type = #tpu.core_type<tc>, window_params = [{transform_indices = @transform_0, window_bounds = array<i64: 1, 1, 8, 8, 4>}, {transform_indices = @transform_1, window_bounds = array<i64: 4, 128>}, {transform_indices = @transform_2, window_bounds = array<i64: 1, 64, 128>}, {transform_indices = @transform_3, window_bounds = array<i64: 1, 8, 128>}, {transform_indices = @transform_4, window_bounds = array<i64: 1, 8, 128>}]} {
    %c0 = arith.constant 0 : index
    %c0_0 = arith.constant 0 : index
    %c0_1 = arith.constant 0 : index
    %c0_2 = arith.constant 0 : index
    %c0_3 = arith.constant 0 : index
    %0 = vector.load %arg2[%c0, %c0_0, %c0_1, %c0_2, %c0_3] : memref<1x1x8x8x4xbf16, #tpu.memory_space<vmem>>, vector<1x1x8x8x4xbf16>
    %1 = vector.shape_cast %0 : vector<1x1x8x8x4xbf16> to vector<8x8x4xbf16>
    %2 = vector.shape_cast %1 : vector<8x8x4xbf16> to vector<64x4xbf16>
    %c0_4 = arith.constant 0 : index
    %c0_5 = arith.constant 0 : index
    %3 = vector.load %arg8[%c0_4, %c0_5] : memref<64x4xbf16, #tpu.memory_space<vmem>>, vector<64x4xbf16>
    tpu.vector_store %arg8[%c0_4, %c0_5], %2 {strides = array<i32>} : memref<64x4xbf16, #tpu.memory_space<vmem>>, vector<64x4xbf16>,
    %c0_6 = arith.constant 0 : index
    %c0_7 = arith.constant 0 : index
    %4 = vector.load %arg8[%c0_6, %c0_7] : memref<64x4xbf16, #tpu.memory_space<vmem>>, vector<64x4xbf16>
    %c0_8 = arith.constant 0 : index
    %c0_9 = arith.constant 0 : index
    %5 = vector.load %arg3[%c0_8, %c0_9] : memref<4x128xbf16, #tpu.memory_space<vmem>>, vector<4x128xbf16>
    %cst = arith.constant dense<0.000000e+00> : vector<64x128xf32>
    %6 = tpu.matmul %4, %5, %cst {dimension_numbers = #tpu.dot_dimension_numbers<[1], [0], [0], [1], [0, 0, 1, 1], [], []>} : vector<64x4xbf16>, vector<4x128xbf16>, vector<64x128xf32> -> vector<64x128xf32>
    %c0_10 = arith.constant 0 : index
    %c0_11 = arith.constant 0 : index
    %7 = vector.load %arg7[%c0_10, %c0_11] : memref<64x128xf32, #tpu.memory_space<vmem>>, vector<64x128xf32>
    tpu.vector_store %arg7[%c0_10, %c0_11], %6 {strides = array<i32>} : memref<64x128xf32, #tpu.memory_space<vmem>>, vector<64x128xf32>,
    %c0_12 = arith.constant 0 : index
    %c0_13 = arith.constant 0 : index
    %8 = vector.load %arg7[%c0_12, %c0_13] : memref<64x128xf32, #tpu.memory_space<vmem>>, vector<64x128xf32>
    %9 = arith.truncf %8 : vector<64x128xf32> to vector<64x128xbf16>
    %c0_14 = arith.constant 0 : index
    %c0_15 = arith.constant 0 : index
    %c0_16 = arith.constant 0 : index
    %10 = vector.load %arg4[%c0_14, %c0_15, %c0_16] : memref<1x64x128xbf16, #tpu.memory_space<vmem>>, vector<1x64x128xbf16>
    %11 = vector.shape_cast %10 : vector<1x64x128xbf16> to vector<64x128xbf16>
    %12 = vector.shape_cast %9 : vector<64x128xbf16> to vector<1x64x128xbf16>
    tpu.vector_store %arg4[%c0_14, %c0_15, %c0_16], %12 {strides = array<i32>} : memref<1x64x128xbf16, #tpu.memory_space<vmem>>, vector<1x64x128xbf16>,
    %cst_17 = arith.constant 0.000000e+00 : f32
    %13 = vector.broadcast %cst_17 : f32 to vector<8x128xf32>
    %cst_18 = arith.constant 0.000000e+00 : f32
    %14 = vector.broadcast %cst_18 : f32 to vector<8x128xf32>
    %c0_19 = arith.constant 0 : index
    %c0_20 = arith.constant 0 : index
    %15 = vector.load %arg7[%c0_19, %c0_20] : memref<64x128xf32, #tpu.memory_space<vmem>>, vector<8x128xf32>
    %16 = arith.addf %13, %15 : vector<8x128xf32>
    %17 = arith.mulf %15, %15 : vector<8x128xf32>
    %18 = arith.addf %14, %17 : vector<8x128xf32>
    %c8 = arith.constant 8 : index
    %c0_21 = arith.constant 0 : index
    %19 = vector.load %arg7[%c8, %c0_21] : memref<64x128xf32, #tpu.memory_space<vmem>>, vector<8x128xf32>
    %20 = arith.addf %16, %19 : vector<8x128xf32>
    %21 = arith.mulf %19, %19 : vector<8x128xf32>
    %22 = arith.addf %18, %21 : vector<8x128xf32>
    %c16 = arith.constant 16 : index
    %c0_22 = arith.constant 0 : index
    %23 = vector.load %arg7[%c16, %c0_22] : memref<64x128xf32, #tpu.memory_space<vmem>>, vector<8x128xf32>
    %24 = arith.addf %20, %23 : vector<8x128xf32>
    %25 = arith.mulf %23, %23 : vector<8x128xf32>
    %26 = arith.addf %22, %25 : vector<8x128xf32>
    %c24 = arith.constant 24 : index
    %c0_23 = arith.constant 0 : index
    %27 = vector.load %arg7[%c24, %c0_23] : memref<64x128xf32, #tpu.memory_space<vmem>>, vector<8x128xf32>
    %28 = arith.addf %24, %27 : vector<8x128xf32>
    %29 = arith.mulf %27, %27 : vector<8x128xf32>
    %30 = arith.addf %26, %29 : vector<8x128xf32>
    %c32 = arith.constant 32 : index
    %c0_24 = arith.constant 0 : index
    %31 = vector.load %arg7[%c32, %c0_24] : memref<64x128xf32, #tpu.memory_space<vmem>>, vector<8x128xf32>
    %32 = arith.addf %28, %31 : vector<8x128xf32>
    %33 = arith.mulf %31, %31 : vector<8x128xf32>
    %34 = arith.addf %30, %33 : vector<8x128xf32>
    %c40 = arith.constant 40 : index
    %c0_25 = arith.constant 0 : index
    %35 = vector.load %arg7[%c40, %c0_25] : memref<64x128xf32, #tpu.memory_space<vmem>>, vector<8x128xf32>
    %36 = arith.addf %32, %35 : vector<8x128xf32>
    %37 = arith.mulf %35, %35 : vector<8x128xf32>
    %38 = arith.addf %34, %37 : vector<8x128xf32>
    %c48 = arith.constant 48 : index
    %c0_26 = arith.constant 0 : index
    %39 = vector.load %arg7[%c48, %c0_26] : memref<64x128xf32, #tpu.memory_space<vmem>>, vector<8x128xf32>
    %40 = arith.addf %36, %39 : vector<8x128xf32>
    %41 = arith.mulf %39, %39 : vector<8x128xf32>
    %42 = arith.addf %38, %41 : vector<8x128xf32>
    %c56 = arith.constant 56 : index
    %c0_27 = arith.constant 0 : index
    %43 = vector.load %arg7[%c56, %c0_27] : memref<64x128xf32, #tpu.memory_space<vmem>>, vector<8x128xf32>
    %44 = arith.addf %40, %43 : vector<8x128xf32>
    %45 = arith.mulf %43, %43 : vector<8x128xf32>
    %46 = arith.addf %42, %45 : vector<8x128xf32>
    %c0_28 = arith.constant 0 : index
    %c0_29 = arith.constant 0 : index
    %c0_30 = arith.constant 0 : index
    %47 = vector.load %arg5[%c0_28, %c0_29, %c0_30] : memref<1x8x128xf32, #tpu.memory_space<vmem>>, vector<1x8x128xf32>
    %48 = vector.shape_cast %47 : vector<1x8x128xf32> to vector<8x128xf32>
    %49 = vector.shape_cast %44 : vector<8x128xf32> to vector<1x8x128xf32>
    tpu.vector_store %arg5[%c0_28, %c0_29, %c0_30], %49 {strides = array<i32>} : memref<1x8x128xf32, #tpu.memory_space<vmem>>, vector<1x8x128xf32>,
    %c0_31 = arith.constant 0 : index
    %c0_32 = arith.constant 0 : index
    %c0_33 = arith.constant 0 : index
    %50 = vector.load %arg6[%c0_31, %c0_32, %c0_33] : memref<1x8x128xf32, #tpu.memory_space<vmem>>, vector<1x8x128xf32>
    %51 = vector.shape_cast %50 : vector<1x8x128xf32> to vector<8x128xf32>
    %52 = vector.shape_cast %46 : vector<8x128xf32> to vector<1x8x128xf32>
    tpu.vector_store %arg6[%c0_31, %c0_32, %c0_33], %52 {strides = array<i32>} : memref<1x8x128xf32, #tpu.memory_space<vmem>>, vector<1x8x128xf32>,
    return
  }
  func.func @transform_0(%arg0: i32, %arg1: i32) -> (i32, i32, i32, i32, i32) {
    %c0_i32 = arith.constant 0 : i32
    %c0_i32_0 = arith.constant 0 : i32
    %c0_i32_1 = arith.constant 0 : i32
    %c0_i32_2 = arith.constant 0 : i32
    %c0_i32_3 = arith.constant 0 : i32
    return %arg1, %c0_i32, %c0_i32_0, %c0_i32_1, %c0_i32_2 : i32, i32, i32, i32, i32
  }
  func.func @transform_1(%arg0: i32, %arg1: i32) -> (i32, i32) {
    %c0_i32 = arith.constant 0 : i32
    %c0_i32_0 = arith.constant 0 : i32
    return %c0_i32, %arg0 : i32, i32
  }
  func.func @transform_2(%arg0: i32, %arg1: i32) -> (i32, i32, i32) {
    %c0_i32 = arith.constant 0 : i32
    %c0_i32_0 = arith.constant 0 : i32
    return %arg1, %c0_i32, %arg0 : i32, i32, i32
  }
  func.func @transform_3(%arg0: i32, %arg1: i32) -> (i32, i32, i32) {
    %c0_i32 = arith.constant 0 : i32
    %c0_i32_0 = arith.constant 0 : i32
    return %arg1, %c0_i32, %arg0 : i32, i32, i32
  }
  func.func @transform_4(%arg0: i32, %arg1: i32) -> (i32, i32, i32) {
    %c0_i32 = arith.constant 0 : i32
    %c0_i32_0 = arith.constant 0 : i32
    return %arg1, %c0_i32, %arg0 : i32, i32, i32
  }
}

module attributes {stable_mosaic.version = 11 : i64} {
  func.func @_conv_kernel(%arg0: i32, %arg1: i32, %arg2: memref<1x4x9x9x4xbf16, #tpu.memory_space<vmem>>, %arg3: memref<36x128xbf16, #tpu.memory_space<vmem>>, %arg4: memref<1x10x10x128xbf16, #tpu.memory_space<vmem>>, %arg5: memref<1x8x128xf32, #tpu.memory_space<vmem>>, %arg6: memref<1x8x128xf32, #tpu.memory_space<vmem>>, %arg7: memref<64x128xf32, #tpu.memory_space<vmem>>, %arg8: memref<64x36xbf16, #tpu.memory_space<vmem>>) attributes {dimension_semantics = [#tpu.dimension_semantics<parallel>, #tpu.dimension_semantics<parallel>], iteration_bounds = array<i64: 1, 2>, scalar_prefetch = 0 : i64, scratch_operands = 2 : i64, tpu.core_type = #tpu.core_type<tc>, window_params = [{transform_indices = @transform_0, window_bounds = array<i64: 1, 4, 9, 9, 4>}, {transform_indices = @transform_1, window_bounds = array<i64: 36, 128>}, {transform_indices = @transform_2, window_bounds = array<i64: 1, 10, 10, 128>}, {transform_indices = @transform_3, window_bounds = array<i64: 1, 8, 128>}, {transform_indices = @transform_4, window_bounds = array<i64: 1, 8, 128>}]} {
    %c0 = arith.constant 0 : index
    %c0_0 = arith.constant 0 : index
    %c0_1 = arith.constant 0 : index
    %c0_2 = arith.constant 0 : index
    %c0_3 = arith.constant 0 : index
    %0 = vector.load %arg2[%c0, %c0_0, %c0_1, %c0_2, %c0_3] : memref<1x4x9x9x4xbf16, #tpu.memory_space<vmem>>, vector<1x1x8x8x4xbf16>
    %1 = vector.shape_cast %0 : vector<1x1x8x8x4xbf16> to vector<8x8x4xbf16>
    %2 = vector.shape_cast %1 : vector<8x8x4xbf16> to vector<64x4xbf16>
    %c0_4 = arith.constant 0 : index
    %c0_5 = arith.constant 0 : index
    %3 = vector.load %arg8[%c0_4, %c0_5] : memref<64x36xbf16, #tpu.memory_space<vmem>>, vector<64x4xbf16>
    tpu.vector_store %arg8[%c0_4, %c0_5], %2 {strides = array<i32>} : memref<64x36xbf16, #tpu.memory_space<vmem>>, vector<64x4xbf16>,
    %c0_6 = arith.constant 0 : index
    %c1 = arith.constant 1 : index
    %c0_7 = arith.constant 0 : index
    %c0_8 = arith.constant 0 : index
    %c0_9 = arith.constant 0 : index
    %4 = vector.load %arg2[%c0_6, %c1, %c0_7, %c0_8, %c0_9] : memref<1x4x9x9x4xbf16, #tpu.memory_space<vmem>>, vector<1x1x8x8x4xbf16>
    %5 = vector.shape_cast %4 : vector<1x1x8x8x4xbf16> to vector<8x8x4xbf16>
    %6 = vector.shape_cast %5 : vector<8x8x4xbf16> to vector<64x4xbf16>
    %c0_10 = arith.constant 0 : index
    %c4 = arith.constant 4 : index
    %7 = vector.load %arg8[%c0_10, %c4] : memref<64x36xbf16, #tpu.memory_space<vmem>>, vector<64x4xbf16>
    tpu.vector_store %arg8[%c0_10, %c4], %6 {strides = array<i32>} : memref<64x36xbf16, #tpu.memory_space<vmem>>, vector<64x4xbf16>,
    %c0_11 = arith.constant 0 : index
    %c0_12 = arith.constant 0 : index
    %c0_13 = arith.constant 0 : index
    %c1_14 = arith.constant 1 : index
    %c0_15 = arith.constant 0 : index
    %8 = vector.load %arg2[%c0_11, %c0_12, %c0_13, %c1_14, %c0_15] : memref<1x4x9x9x4xbf16, #tpu.memory_space<vmem>>, vector<1x1x8x8x4xbf16>
    %9 = vector.shape_cast %8 : vector<1x1x8x8x4xbf16> to vector<8x8x4xbf16>
    %10 = vector.shape_cast %9 : vector<8x8x4xbf16> to vector<64x4xbf16>
    %c0_16 = arith.constant 0 : index
    %c8 = arith.constant 8 : index
    %11 = vector.load %arg8[%c0_16, %c8] : memref<64x36xbf16, #tpu.memory_space<vmem>>, vector<64x4xbf16>
    tpu.vector_store %arg8[%c0_16, %c8], %10 {strides = array<i32>} : memref<64x36xbf16, #tpu.memory_space<vmem>>, vector<64x4xbf16>,
    %c0_17 = arith.constant 0 : index
    %c2 = arith.constant 2 : index
    %c0_18 = arith.constant 0 : index
    %c0_19 = arith.constant 0 : index
    %c0_20 = arith.constant 0 : index
    %12 = vector.load %arg2[%c0_17, %c2, %c0_18, %c0_19, %c0_20] : memref<1x4x9x9x4xbf16, #tpu.memory_space<vmem>>, vector<1x1x8x8x4xbf16>
    %13 = vector.shape_cast %12 : vector<1x1x8x8x4xbf16> to vector<8x8x4xbf16>
    %14 = vector.shape_cast %13 : vector<8x8x4xbf16> to vector<64x4xbf16>
    %c0_21 = arith.constant 0 : index
    %c12 = arith.constant 12 : index
    %15 = vector.load %arg8[%c0_21, %c12] : memref<64x36xbf16, #tpu.memory_space<vmem>>, vector<64x4xbf16>
    tpu.vector_store %arg8[%c0_21, %c12], %14 {strides = array<i32>} : memref<64x36xbf16, #tpu.memory_space<vmem>>, vector<64x4xbf16>,
    %c0_22 = arith.constant 0 : index
    %c3 = arith.constant 3 : index
    %c0_23 = arith.constant 0 : index
    %c0_24 = arith.constant 0 : index
    %c0_25 = arith.constant 0 : index
    %16 = vector.load %arg2[%c0_22, %c3, %c0_23, %c0_24, %c0_25] : memref<1x4x9x9x4xbf16, #tpu.memory_space<vmem>>, vector<1x1x8x8x4xbf16>
    %17 = vector.shape_cast %16 : vector<1x1x8x8x4xbf16> to vector<8x8x4xbf16>
    %18 = vector.shape_cast %17 : vector<8x8x4xbf16> to vector<64x4xbf16>
    %c0_26 = arith.constant 0 : index
    %c16 = arith.constant 16 : index
    %19 = vector.load %arg8[%c0_26, %c16] : memref<64x36xbf16, #tpu.memory_space<vmem>>, vector<64x4xbf16>
    tpu.vector_store %arg8[%c0_26, %c16], %18 {strides = array<i32>} : memref<64x36xbf16, #tpu.memory_space<vmem>>, vector<64x4xbf16>,
    %c0_27 = arith.constant 0 : index
    %c2_28 = arith.constant 2 : index
    %c0_29 = arith.constant 0 : index
    %c1_30 = arith.constant 1 : index
    %c0_31 = arith.constant 0 : index
    %20 = vector.load %arg2[%c0_27, %c2_28, %c0_29, %c1_30, %c0_31] : memref<1x4x9x9x4xbf16, #tpu.memory_space<vmem>>, vector<1x1x8x8x4xbf16>
    %21 = vector.shape_cast %20 : vector<1x1x8x8x4xbf16> to vector<8x8x4xbf16>
    %22 = vector.shape_cast %21 : vector<8x8x4xbf16> to vector<64x4xbf16>
    %c0_32 = arith.constant 0 : index
    %c20 = arith.constant 20 : index
    %23 = vector.load %arg8[%c0_32, %c20] : memref<64x36xbf16, #tpu.memory_space<vmem>>, vector<64x4xbf16>
    tpu.vector_store %arg8[%c0_32, %c20], %22 {strides = array<i32>} : memref<64x36xbf16, #tpu.memory_space<vmem>>, vector<64x4xbf16>,
    %c0_33 = arith.constant 0 : index
    %c0_34 = arith.constant 0 : index
    %c1_35 = arith.constant 1 : index
    %c0_36 = arith.constant 0 : index
    %c0_37 = arith.constant 0 : index
    %24 = vector.load %arg2[%c0_33, %c0_34, %c1_35, %c0_36, %c0_37] : memref<1x4x9x9x4xbf16, #tpu.memory_space<vmem>>, vector<1x1x8x8x4xbf16>
    %25 = vector.shape_cast %24 : vector<1x1x8x8x4xbf16> to vector<8x8x4xbf16>
    %26 = vector.shape_cast %25 : vector<8x8x4xbf16> to vector<64x4xbf16>
    %c0_38 = arith.constant 0 : index
    %c24 = arith.constant 24 : index
    %27 = vector.load %arg8[%c0_38, %c24] : memref<64x36xbf16, #tpu.memory_space<vmem>>, vector<64x4xbf16>
    tpu.vector_store %arg8[%c0_38, %c24], %26 {strides = array<i32>} : memref<64x36xbf16, #tpu.memory_space<vmem>>, vector<64x4xbf16>,
    %c0_39 = arith.constant 0 : index
    %c1_40 = arith.constant 1 : index
    %c1_41 = arith.constant 1 : index
    %c0_42 = arith.constant 0 : index
    %c0_43 = arith.constant 0 : index
    %28 = vector.load %arg2[%c0_39, %c1_40, %c1_41, %c0_42, %c0_43] : memref<1x4x9x9x4xbf16, #tpu.memory_space<vmem>>, vector<1x1x8x8x4xbf16>
    %29 = vector.shape_cast %28 : vector<1x1x8x8x4xbf16> to vector<8x8x4xbf16>
    %30 = vector.shape_cast %29 : vector<8x8x4xbf16> to vector<64x4xbf16>
    %c0_44 = arith.constant 0 : index
    %c28 = arith.constant 28 : index
    %31 = vector.load %arg8[%c0_44, %c28] : memref<64x36xbf16, #tpu.memory_space<vmem>>, vector<64x4xbf16>
    tpu.vector_store %arg8[%c0_44, %c28], %30 {strides = array<i32>} : memref<64x36xbf16, #tpu.memory_space<vmem>>, vector<64x4xbf16>,
    %c0_45 = arith.constant 0 : index
    %c0_46 = arith.constant 0 : index
    %c1_47 = arith.constant 1 : index
    %c1_48 = arith.constant 1 : index
    %c0_49 = arith.constant 0 : index
    %32 = vector.load %arg2[%c0_45, %c0_46, %c1_47, %c1_48, %c0_49] : memref<1x4x9x9x4xbf16, #tpu.memory_space<vmem>>, vector<1x1x8x8x4xbf16>
    %33 = vector.shape_cast %32 : vector<1x1x8x8x4xbf16> to vector<8x8x4xbf16>
    %34 = vector.shape_cast %33 : vector<8x8x4xbf16> to vector<64x4xbf16>
    %c0_50 = arith.constant 0 : index
    %c32 = arith.constant 32 : index
    %35 = vector.load %arg8[%c0_50, %c32] : memref<64x36xbf16, #tpu.memory_space<vmem>>, vector<64x4xbf16>
    tpu.vector_store %arg8[%c0_50, %c32], %34 {strides = array<i32>} : memref<64x36xbf16, #tpu.memory_space<vmem>>, vector<64x4xbf16>,
    %c0_51 = arith.constant 0 : index
    %c0_52 = arith.constant 0 : index
    %36 = vector.load %arg8[%c0_51, %c0_52] : memref<64x36xbf16, #tpu.memory_space<vmem>>, vector<64x36xbf16>
    %c0_53 = arith.constant 0 : index
    %c0_54 = arith.constant 0 : index
    %37 = vector.load %arg3[%c0_53, %c0_54] : memref<36x128xbf16, #tpu.memory_space<vmem>>, vector<36x128xbf16>
    %cst = arith.constant dense<0.000000e+00> : vector<64x128xf32>
    %38 = tpu.matmul %36, %37, %cst {dimension_numbers = #tpu.dot_dimension_numbers<[1], [0], [0], [1], [0, 0, 1, 1], [], []>} : vector<64x36xbf16>, vector<36x128xbf16>, vector<64x128xf32> -> vector<64x128xf32>
    %c0_55 = arith.constant 0 : index
    %c0_56 = arith.constant 0 : index
    %39 = vector.load %arg7[%c0_55, %c0_56] : memref<64x128xf32, #tpu.memory_space<vmem>>, vector<64x128xf32>
    tpu.vector_store %arg7[%c0_55, %c0_56], %38 {strides = array<i32>} : memref<64x128xf32, #tpu.memory_space<vmem>>, vector<64x128xf32>,
    %cst_57 = arith.constant 0.000000e+00 : bf16
    %40 = vector.broadcast %cst_57 : bf16 to vector<10x10x128xbf16>
    %c0_58 = arith.constant 0 : index
    %c0_59 = arith.constant 0 : index
    %c0_60 = arith.constant 0 : index
    %c0_61 = arith.constant 0 : index
    %41 = vector.load %arg4[%c0_58, %c0_59, %c0_60, %c0_61] : memref<1x10x10x128xbf16, #tpu.memory_space<vmem>>, vector<1x10x10x128xbf16>
    %42 = vector.shape_cast %41 : vector<1x10x10x128xbf16> to vector<10x10x128xbf16>
    %43 = vector.shape_cast %40 : vector<10x10x128xbf16> to vector<1x10x10x128xbf16>
    tpu.vector_store %arg4[%c0_58, %c0_59, %c0_60, %c0_61], %43 {strides = array<i32>} : memref<1x10x10x128xbf16, #tpu.memory_space<vmem>>, vector<1x10x10x128xbf16>,
    %c0_62 = arith.constant 0 : index
    %c0_63 = arith.constant 0 : index
    %44 = vector.load %arg7[%c0_62, %c0_63] : memref<64x128xf32, #tpu.memory_space<vmem>>, vector<64x128xf32>
    %45 = vector.shape_cast %44 : vector<64x128xf32> to vector<8x8x128xf32>
    %46 = arith.truncf %45 : vector<8x8x128xf32> to vector<8x8x128xbf16>
    %c0_64 = arith.constant 0 : index
    %c1_65 = arith.constant 1 : index
    %c1_66 = arith.constant 1 : index
    %c0_67 = arith.constant 0 : index
    %47 = vector.load %arg4[%c0_64, %c1_65, %c1_66, %c0_67] : memref<1x10x10x128xbf16, #tpu.memory_space<vmem>>, vector<1x8x8x128xbf16>
    %48 = vector.shape_cast %47 : vector<1x8x8x128xbf16> to vector<8x8x128xbf16>
    %49 = vector.shape_cast %46 : vector<8x8x128xbf16> to vector<1x8x8x128xbf16>
    tpu.vector_store %arg4[%c0_64, %c1_65, %c1_66, %c0_67], %49 {strides = array<i32>} : memref<1x10x10x128xbf16, #tpu.memory_space<vmem>>, vector<1x8x8x128xbf16>,
    %cst_68 = arith.constant 0.000000e+00 : f32
    %50 = vector.broadcast %cst_68 : f32 to vector<8x128xf32>
    %cst_69 = arith.constant 0.000000e+00 : f32
    %51 = vector.broadcast %cst_69 : f32 to vector<8x128xf32>
    %c0_70 = arith.constant 0 : index
    %c0_71 = arith.constant 0 : index
    %52 = vector.load %arg7[%c0_70, %c0_71] : memref<64x128xf32, #tpu.memory_space<vmem>>, vector<8x128xf32>
    %53 = arith.addf %50, %52 : vector<8x128xf32>
    %54 = arith.mulf %52, %52 : vector<8x128xf32>
    %55 = arith.addf %51, %54 : vector<8x128xf32>
    %c8_72 = arith.constant 8 : index
    %c0_73 = arith.constant 0 : index
    %56 = vector.load %arg7[%c8_72, %c0_73] : memref<64x128xf32, #tpu.memory_space<vmem>>, vector<8x128xf32>
    %57 = arith.addf %53, %56 : vector<8x128xf32>
    %58 = arith.mulf %56, %56 : vector<8x128xf32>
    %59 = arith.addf %55, %58 : vector<8x128xf32>
    %c16_74 = arith.constant 16 : index
    %c0_75 = arith.constant 0 : index
    %60 = vector.load %arg7[%c16_74, %c0_75] : memref<64x128xf32, #tpu.memory_space<vmem>>, vector<8x128xf32>
    %61 = arith.addf %57, %60 : vector<8x128xf32>
    %62 = arith.mulf %60, %60 : vector<8x128xf32>
    %63 = arith.addf %59, %62 : vector<8x128xf32>
    %c24_76 = arith.constant 24 : index
    %c0_77 = arith.constant 0 : index
    %64 = vector.load %arg7[%c24_76, %c0_77] : memref<64x128xf32, #tpu.memory_space<vmem>>, vector<8x128xf32>
    %65 = arith.addf %61, %64 : vector<8x128xf32>
    %66 = arith.mulf %64, %64 : vector<8x128xf32>
    %67 = arith.addf %63, %66 : vector<8x128xf32>
    %c32_78 = arith.constant 32 : index
    %c0_79 = arith.constant 0 : index
    %68 = vector.load %arg7[%c32_78, %c0_79] : memref<64x128xf32, #tpu.memory_space<vmem>>, vector<8x128xf32>
    %69 = arith.addf %65, %68 : vector<8x128xf32>
    %70 = arith.mulf %68, %68 : vector<8x128xf32>
    %71 = arith.addf %67, %70 : vector<8x128xf32>
    %c40 = arith.constant 40 : index
    %c0_80 = arith.constant 0 : index
    %72 = vector.load %arg7[%c40, %c0_80] : memref<64x128xf32, #tpu.memory_space<vmem>>, vector<8x128xf32>
    %73 = arith.addf %69, %72 : vector<8x128xf32>
    %74 = arith.mulf %72, %72 : vector<8x128xf32>
    %75 = arith.addf %71, %74 : vector<8x128xf32>
    %c48 = arith.constant 48 : index
    %c0_81 = arith.constant 0 : index
    %76 = vector.load %arg7[%c48, %c0_81] : memref<64x128xf32, #tpu.memory_space<vmem>>, vector<8x128xf32>
    %77 = arith.addf %73, %76 : vector<8x128xf32>
    %78 = arith.mulf %76, %76 : vector<8x128xf32>
    %79 = arith.addf %75, %78 : vector<8x128xf32>
    %c56 = arith.constant 56 : index
    %c0_82 = arith.constant 0 : index
    %80 = vector.load %arg7[%c56, %c0_82] : memref<64x128xf32, #tpu.memory_space<vmem>>, vector<8x128xf32>
    %81 = arith.addf %77, %80 : vector<8x128xf32>
    %82 = arith.mulf %80, %80 : vector<8x128xf32>
    %83 = arith.addf %79, %82 : vector<8x128xf32>
    %c0_83 = arith.constant 0 : index
    %c0_84 = arith.constant 0 : index
    %c0_85 = arith.constant 0 : index
    %84 = vector.load %arg5[%c0_83, %c0_84, %c0_85] : memref<1x8x128xf32, #tpu.memory_space<vmem>>, vector<1x8x128xf32>
    %85 = vector.shape_cast %84 : vector<1x8x128xf32> to vector<8x128xf32>
    %86 = vector.shape_cast %81 : vector<8x128xf32> to vector<1x8x128xf32>
    tpu.vector_store %arg5[%c0_83, %c0_84, %c0_85], %86 {strides = array<i32>} : memref<1x8x128xf32, #tpu.memory_space<vmem>>, vector<1x8x128xf32>,
    %c0_86 = arith.constant 0 : index
    %c0_87 = arith.constant 0 : index
    %c0_88 = arith.constant 0 : index
    %87 = vector.load %arg6[%c0_86, %c0_87, %c0_88] : memref<1x8x128xf32, #tpu.memory_space<vmem>>, vector<1x8x128xf32>
    %88 = vector.shape_cast %87 : vector<1x8x128xf32> to vector<8x128xf32>
    %89 = vector.shape_cast %83 : vector<8x128xf32> to vector<1x8x128xf32>
    tpu.vector_store %arg6[%c0_86, %c0_87, %c0_88], %89 {strides = array<i32>} : memref<1x8x128xf32, #tpu.memory_space<vmem>>, vector<1x8x128xf32>,
    return
  }
  func.func @transform_0(%arg0: i32, %arg1: i32) -> (i32, i32, i32, i32, i32) {
    %c0_i32 = arith.constant 0 : i32
    %c0_i32_0 = arith.constant 0 : i32
    %c0_i32_1 = arith.constant 0 : i32
    %c0_i32_2 = arith.constant 0 : i32
    %c0_i32_3 = arith.constant 0 : i32
    return %arg1, %c0_i32, %c0_i32_0, %c0_i32_1, %c0_i32_2 : i32, i32, i32, i32, i32
  }
  func.func @transform_1(%arg0: i32, %arg1: i32) -> (i32, i32) {
    %c0_i32 = arith.constant 0 : i32
    %c0_i32_0 = arith.constant 0 : i32
    return %c0_i32, %arg0 : i32, i32
  }
  func.func @transform_2(%arg0: i32, %arg1: i32) -> (i32, i32, i32, i32) {
    %c0_i32 = arith.constant 0 : i32
    %c0_i32_0 = arith.constant 0 : i32
    %c0_i32_1 = arith.constant 0 : i32
    return %arg1, %c0_i32, %c0_i32_0, %arg0 : i32, i32, i32, i32
  }
  func.func @transform_3(%arg0: i32, %arg1: i32) -> (i32, i32, i32) {
    %c0_i32 = arith.constant 0 : i32
    %c0_i32_0 = arith.constant 0 : i32
    return %arg1, %c0_i32, %arg0 : i32, i32, i32
  }
  func.func @transform_4(%arg0: i32, %arg1: i32) -> (i32, i32, i32) {
    %c0_i32 = arith.constant 0 : i32
    %c0_i32_0 = arith.constant 0 : i32
    return %arg1, %c0_i32, %arg0 : i32, i32, i32
  }
}

module attributes {stable_mosaic.version = 11 : i64} {
  func.func @_conv_kernel(%arg0: i32, %arg1: i32, %arg2: memref<1x1x10x10x128xbf16, #tpu.memory_space<vmem>>, %arg3: memref<1152x128xbf16, #tpu.memory_space<vmem>>, %arg4: memref<1x128xf32, #tpu.memory_space<vmem>>, %arg5: memref<1x128xf32, #tpu.memory_space<vmem>>, %arg6: memref<1x64x128xbf16, #tpu.memory_space<vmem>>, %arg7: memref<1x8x128xf32, #tpu.memory_space<vmem>>, %arg8: memref<1x8x128xf32, #tpu.memory_space<vmem>>, %arg9: memref<64x128xf32, #tpu.memory_space<vmem>>, %arg10: memref<64x1152xbf16, #tpu.memory_space<vmem>>, %arg11: memref<10x10x128xbf16, #tpu.memory_space<vmem>>) attributes {dimension_semantics = [#tpu.dimension_semantics<parallel>, #tpu.dimension_semantics<parallel>], iteration_bounds = array<i64: 1, 2>, scalar_prefetch = 0 : i64, scratch_operands = 3 : i64, tpu.core_type = #tpu.core_type<tc>, window_params = [{transform_indices = @transform_0, window_bounds = array<i64: 1, 1, 10, 10, 128>}, {transform_indices = @transform_1, window_bounds = array<i64: 1152, 128>}, {pipeline_mode = #tpu.pipeline_mode<synchronous>, transform_indices = @transform_2, window_bounds = array<i64: 1, 128>}, {pipeline_mode = #tpu.pipeline_mode<synchronous>, transform_indices = @transform_3, window_bounds = array<i64: 1, 128>}, {transform_indices = @transform_4, window_bounds = array<i64: 1, 64, 128>}, {transform_indices = @transform_5, window_bounds = array<i64: 1, 8, 128>}, {transform_indices = @transform_6, window_bounds = array<i64: 1, 8, 128>}]} {
    %c0 = arith.constant 0 : index
    %c0_0 = arith.constant 0 : index
    %0 = vector.load %arg4[%c0, %c0_0] : memref<1x128xf32, #tpu.memory_space<vmem>>, vector<1x128xf32>
    %1 = vector.shape_cast %0 : vector<1x128xf32> to vector<1x1x128xf32>
    %c0_1 = arith.constant 0 : index
    %c0_2 = arith.constant 0 : index
    %2 = vector.load %arg5[%c0_1, %c0_2] : memref<1x128xf32, #tpu.memory_space<vmem>>, vector<1x128xf32>
    %3 = vector.shape_cast %2 : vector<1x128xf32> to vector<1x1x128xf32>
    %c0_3 = arith.constant 0 : index
    %c0_4 = arith.constant 0 : index
    %c0_5 = arith.constant 0 : index
    %c0_6 = arith.constant 0 : index
    %c0_7 = arith.constant 0 : index
    %4 = vector.load %arg2[%c0_3, %c0_4, %c0_5, %c0_6, %c0_7] : memref<1x1x10x10x128xbf16, #tpu.memory_space<vmem>>, vector<1x1x10x10x128xbf16>
    %5 = vector.shape_cast %4 : vector<1x1x10x10x128xbf16> to vector<10x10x128xbf16>
    %6 = arith.extf %5 : vector<10x10x128xbf16> to vector<10x10x128xf32>
    %7 = vector.broadcast %1 : vector<1x1x128xf32> to vector<10x10x128xf32>
    %8 = arith.mulf %6, %7 : vector<10x10x128xf32>
    %9 = vector.broadcast %3 : vector<1x1x128xf32> to vector<10x10x128xf32>
    %10 = arith.addf %8, %9 : vector<10x10x128xf32>
    %cst = arith.constant 0.000000e+00 : f32
    %11 = vector.broadcast %cst : f32 to vector<10x10x128xf32>
    %12 = arith.maximumf %10, %11 : vector<10x10x128xf32>
    %13 = arith.truncf %12 : vector<10x10x128xf32> to vector<10x10x128xbf16>
    %c0_8 = arith.constant 0 : index
    %c0_9 = arith.constant 0 : index
    %c0_10 = arith.constant 0 : index
    %14 = vector.load %arg11[%c0_8, %c0_9, %c0_10] : memref<10x10x128xbf16, #tpu.memory_space<vmem>>, vector<10x10x128xbf16>
    tpu.vector_store %arg11[%c0_8, %c0_9, %c0_10], %13 {strides = array<i32>} : memref<10x10x128xbf16, #tpu.memory_space<vmem>>, vector<10x10x128xbf16>,
    %cst_11 = arith.constant 0.000000e+00 : bf16
    %15 = vector.broadcast %cst_11 : bf16 to vector<1x10x128xbf16>
    %cst_12 = arith.constant 0.000000e+00 : bf16
    %16 = vector.broadcast %cst_12 : bf16 to vector<10x1x128xbf16>
    %c0_13 = arith.constant 0 : index
    %c0_14 = arith.constant 0 : index
    %c0_15 = arith.constant 0 : index
    %17 = vector.load %arg11[%c0_13, %c0_14, %c0_15] : memref<10x10x128xbf16, #tpu.memory_space<vmem>>, vector<1x10x128xbf16>
    tpu.vector_store %arg11[%c0_13, %c0_14, %c0_15], %15 {strides = array<i32>} : memref<10x10x128xbf16, #tpu.memory_space<vmem>>, vector<1x10x128xbf16>,
    %c9 = arith.constant 9 : index
    %c0_16 = arith.constant 0 : index
    %c0_17 = arith.constant 0 : index
    %18 = vector.load %arg11[%c9, %c0_16, %c0_17] : memref<10x10x128xbf16, #tpu.memory_space<vmem>>, vector<1x10x128xbf16>
    tpu.vector_store %arg11[%c9, %c0_16, %c0_17], %15 {strides = array<i32>} : memref<10x10x128xbf16, #tpu.memory_space<vmem>>, vector<1x10x128xbf16>,
    %c0_18 = arith.constant 0 : index
    %c0_19 = arith.constant 0 : index
    %c0_20 = arith.constant 0 : index
    %19 = vector.load %arg11[%c0_18, %c0_19, %c0_20] : memref<10x10x128xbf16, #tpu.memory_space<vmem>>, vector<10x1x128xbf16>
    tpu.vector_store %arg11[%c0_18, %c0_19, %c0_20], %16 {strides = array<i32>} : memref<10x10x128xbf16, #tpu.memory_space<vmem>>, vector<10x1x128xbf16>,
    %c0_21 = arith.constant 0 : index
    %c9_22 = arith.constant 9 : index
    %c0_23 = arith.constant 0 : index
    %20 = vector.load %arg11[%c0_21, %c9_22, %c0_23] : memref<10x10x128xbf16, #tpu.memory_space<vmem>>, vector<10x1x128xbf16>
    tpu.vector_store %arg11[%c0_21, %c9_22, %c0_23], %16 {strides = array<i32>} : memref<10x10x128xbf16, #tpu.memory_space<vmem>>, vector<10x1x128xbf16>,
    %c0_24 = arith.constant 0 : index
    %c0_25 = arith.constant 0 : index
    %c0_26 = arith.constant 0 : index
    %21 = vector.load %arg11[%c0_24, %c0_25, %c0_26] : memref<10x10x128xbf16, #tpu.memory_space<vmem>>, vector<8x8x128xbf16>
    %22 = vector.shape_cast %21 : vector<8x8x128xbf16> to vector<64x128xbf16>
    %c0_27 = arith.constant 0 : index
    %c0_28 = arith.constant 0 : index
    %23 = vector.load %arg10[%c0_27, %c0_28] : memref<64x1152xbf16, #tpu.memory_space<vmem>>, vector<64x128xbf16>
    tpu.vector_store %arg10[%c0_27, %c0_28], %22 {strides = array<i32>} : memref<64x1152xbf16, #tpu.memory_space<vmem>>, vector<64x128xbf16>,
    %c0_29 = arith.constant 0 : index
    %c1 = arith.constant 1 : index
    %c0_30 = arith.constant 0 : index
    %24 = vector.load %arg11[%c0_29, %c1, %c0_30] : memref<10x10x128xbf16, #tpu.memory_space<vmem>>, vector<8x8x128xbf16>
    %25 = vector.shape_cast %24 : vector<8x8x128xbf16> to vector<64x128xbf16>
    %c0_31 = arith.constant 0 : index
    %c128 = arith.constant 128 : index
    %26 = vector.load %arg10[%c0_31, %c128] : memref<64x1152xbf16, #tpu.memory_space<vmem>>, vector<64x128xbf16>
    tpu.vector_store %arg10[%c0_31, %c128], %25 {strides = array<i32>} : memref<64x1152xbf16, #tpu.memory_space<vmem>>, vector<64x128xbf16>,
    %c0_32 = arith.constant 0 : index
    %c2 = arith.constant 2 : index
    %c0_33 = arith.constant 0 : index
    %27 = vector.load %arg11[%c0_32, %c2, %c0_33] : memref<10x10x128xbf16, #tpu.memory_space<vmem>>, vector<8x8x128xbf16>
    %28 = vector.shape_cast %27 : vector<8x8x128xbf16> to vector<64x128xbf16>
    %c0_34 = arith.constant 0 : index
    %c256 = arith.constant 256 : index
    %29 = vector.load %arg10[%c0_34, %c256] : memref<64x1152xbf16, #tpu.memory_space<vmem>>, vector<64x128xbf16>
    tpu.vector_store %arg10[%c0_34, %c256], %28 {strides = array<i32>} : memref<64x1152xbf16, #tpu.memory_space<vmem>>, vector<64x128xbf16>,
    %c1_35 = arith.constant 1 : index
    %c0_36 = arith.constant 0 : index
    %c0_37 = arith.constant 0 : index
    %30 = vector.load %arg11[%c1_35, %c0_36, %c0_37] : memref<10x10x128xbf16, #tpu.memory_space<vmem>>, vector<8x8x128xbf16>
    %31 = vector.shape_cast %30 : vector<8x8x128xbf16> to vector<64x128xbf16>
    %c0_38 = arith.constant 0 : index
    %c384 = arith.constant 384 : index
    %32 = vector.load %arg10[%c0_38, %c384] : memref<64x1152xbf16, #tpu.memory_space<vmem>>, vector<64x128xbf16>
    tpu.vector_store %arg10[%c0_38, %c384], %31 {strides = array<i32>} : memref<64x1152xbf16, #tpu.memory_space<vmem>>, vector<64x128xbf16>,
    %c1_39 = arith.constant 1 : index
    %c1_40 = arith.constant 1 : index
    %c0_41 = arith.constant 0 : index
    %33 = vector.load %arg11[%c1_39, %c1_40, %c0_41] : memref<10x10x128xbf16, #tpu.memory_space<vmem>>, vector<8x8x128xbf16>
    %34 = vector.shape_cast %33 : vector<8x8x128xbf16> to vector<64x128xbf16>
    %c0_42 = arith.constant 0 : index
    %c512 = arith.constant 512 : index
    %35 = vector.load %arg10[%c0_42, %c512] : memref<64x1152xbf16, #tpu.memory_space<vmem>>, vector<64x128xbf16>
    tpu.vector_store %arg10[%c0_42, %c512], %34 {strides = array<i32>} : memref<64x1152xbf16, #tpu.memory_space<vmem>>, vector<64x128xbf16>,
    %c1_43 = arith.constant 1 : index
    %c2_44 = arith.constant 2 : index
    %c0_45 = arith.constant 0 : index
    %36 = vector.load %arg11[%c1_43, %c2_44, %c0_45] : memref<10x10x128xbf16, #tpu.memory_space<vmem>>, vector<8x8x128xbf16>
    %37 = vector.shape_cast %36 : vector<8x8x128xbf16> to vector<64x128xbf16>
    %c0_46 = arith.constant 0 : index
    %c640 = arith.constant 640 : index
    %38 = vector.load %arg10[%c0_46, %c640] : memref<64x1152xbf16, #tpu.memory_space<vmem>>, vector<64x128xbf16>
    tpu.vector_store %arg10[%c0_46, %c640], %37 {strides = array<i32>} : memref<64x1152xbf16, #tpu.memory_space<vmem>>, vector<64x128xbf16>,
    %c2_47 = arith.constant 2 : index
    %c0_48 = arith.constant 0 : index
    %c0_49 = arith.constant 0 : index
    %39 = vector.load %arg11[%c2_47, %c0_48, %c0_49] : memref<10x10x128xbf16, #tpu.memory_space<vmem>>, vector<8x8x128xbf16>
    %40 = vector.shape_cast %39 : vector<8x8x128xbf16> to vector<64x128xbf16>
    %c0_50 = arith.constant 0 : index
    %c768 = arith.constant 768 : index
    %41 = vector.load %arg10[%c0_50, %c768] : memref<64x1152xbf16, #tpu.memory_space<vmem>>, vector<64x128xbf16>
    tpu.vector_store %arg10[%c0_50, %c768], %40 {strides = array<i32>} : memref<64x1152xbf16, #tpu.memory_space<vmem>>, vector<64x128xbf16>,
    %c2_51 = arith.constant 2 : index
    %c1_52 = arith.constant 1 : index
    %c0_53 = arith.constant 0 : index
    %42 = vector.load %arg11[%c2_51, %c1_52, %c0_53] : memref<10x10x128xbf16, #tpu.memory_space<vmem>>, vector<8x8x128xbf16>
    %43 = vector.shape_cast %42 : vector<8x8x128xbf16> to vector<64x128xbf16>
    %c0_54 = arith.constant 0 : index
    %c896 = arith.constant 896 : index
    %44 = vector.load %arg10[%c0_54, %c896] : memref<64x1152xbf16, #tpu.memory_space<vmem>>, vector<64x128xbf16>
    tpu.vector_store %arg10[%c0_54, %c896], %43 {strides = array<i32>} : memref<64x1152xbf16, #tpu.memory_space<vmem>>, vector<64x128xbf16>,
    %c2_55 = arith.constant 2 : index
    %c2_56 = arith.constant 2 : index
    %c0_57 = arith.constant 0 : index
    %45 = vector.load %arg11[%c2_55, %c2_56, %c0_57] : memref<10x10x128xbf16, #tpu.memory_space<vmem>>, vector<8x8x128xbf16>
    %46 = vector.shape_cast %45 : vector<8x8x128xbf16> to vector<64x128xbf16>
    %c0_58 = arith.constant 0 : index
    %c1024 = arith.constant 1024 : index
    %47 = vector.load %arg10[%c0_58, %c1024] : memref<64x1152xbf16, #tpu.memory_space<vmem>>, vector<64x128xbf16>
    tpu.vector_store %arg10[%c0_58, %c1024], %46 {strides = array<i32>} : memref<64x1152xbf16, #tpu.memory_space<vmem>>, vector<64x128xbf16>,
    %c0_59 = arith.constant 0 : index
    %c0_60 = arith.constant 0 : index
    %48 = vector.load %arg10[%c0_59, %c0_60] : memref<64x1152xbf16, #tpu.memory_space<vmem>>, vector<64x1152xbf16>
    %c0_61 = arith.constant 0 : index
    %c0_62 = arith.constant 0 : index
    %49 = vector.load %arg3[%c0_61, %c0_62] : memref<1152x128xbf16, #tpu.memory_space<vmem>>, vector<1152x128xbf16>
    %cst_63 = arith.constant dense<0.000000e+00> : vector<64x128xf32>
    %50 = tpu.matmul %48, %49, %cst_63 {dimension_numbers = #tpu.dot_dimension_numbers<[1], [0], [0], [1], [0, 0, 1, 1], [], []>} : vector<64x1152xbf16>, vector<1152x128xbf16>, vector<64x128xf32> -> vector<64x128xf32>
    %c0_64 = arith.constant 0 : index
    %c0_65 = arith.constant 0 : index
    %51 = vector.load %arg9[%c0_64, %c0_65] : memref<64x128xf32, #tpu.memory_space<vmem>>, vector<64x128xf32>
    tpu.vector_store %arg9[%c0_64, %c0_65], %50 {strides = array<i32>} : memref<64x128xf32, #tpu.memory_space<vmem>>, vector<64x128xf32>,
    %c0_66 = arith.constant 0 : index
    %c0_67 = arith.constant 0 : index
    %52 = vector.load %arg9[%c0_66, %c0_67] : memref<64x128xf32, #tpu.memory_space<vmem>>, vector<64x128xf32>
    %53 = arith.truncf %52 : vector<64x128xf32> to vector<64x128xbf16>
    %c0_68 = arith.constant 0 : index
    %c0_69 = arith.constant 0 : index
    %c0_70 = arith.constant 0 : index
    %54 = vector.load %arg6[%c0_68, %c0_69, %c0_70] : memref<1x64x128xbf16, #tpu.memory_space<vmem>>, vector<1x64x128xbf16>
    %55 = vector.shape_cast %54 : vector<1x64x128xbf16> to vector<64x128xbf16>
    %56 = vector.shape_cast %53 : vector<64x128xbf16> to vector<1x64x128xbf16>
    tpu.vector_store %arg6[%c0_68, %c0_69, %c0_70], %56 {strides = array<i32>} : memref<1x64x128xbf16, #tpu.memory_space<vmem>>, vector<1x64x128xbf16>,
    %cst_71 = arith.constant 0.000000e+00 : f32
    %57 = vector.broadcast %cst_71 : f32 to vector<8x128xf32>
    %cst_72 = arith.constant 0.000000e+00 : f32
    %58 = vector.broadcast %cst_72 : f32 to vector<8x128xf32>
    %c0_73 = arith.constant 0 : index
    %c0_74 = arith.constant 0 : index
    %59 = vector.load %arg9[%c0_73, %c0_74] : memref<64x128xf32, #tpu.memory_space<vmem>>, vector<8x128xf32>
    %60 = arith.addf %57, %59 : vector<8x128xf32>
    %61 = arith.mulf %59, %59 : vector<8x128xf32>
    %62 = arith.addf %58, %61 : vector<8x128xf32>
    %c8 = arith.constant 8 : index
    %c0_75 = arith.constant 0 : index
    %63 = vector.load %arg9[%c8, %c0_75] : memref<64x128xf32, #tpu.memory_space<vmem>>, vector<8x128xf32>
    %64 = arith.addf %60, %63 : vector<8x128xf32>
    %65 = arith.mulf %63, %63 : vector<8x128xf32>
    %66 = arith.addf %62, %65 : vector<8x128xf32>
    %c16 = arith.constant 16 : index
    %c0_76 = arith.constant 0 : index
    %67 = vector.load %arg9[%c16, %c0_76] : memref<64x128xf32, #tpu.memory_space<vmem>>, vector<8x128xf32>
    %68 = arith.addf %64, %67 : vector<8x128xf32>
    %69 = arith.mulf %67, %67 : vector<8x128xf32>
    %70 = arith.addf %66, %69 : vector<8x128xf32>
    %c24 = arith.constant 24 : index
    %c0_77 = arith.constant 0 : index
    %71 = vector.load %arg9[%c24, %c0_77] : memref<64x128xf32, #tpu.memory_space<vmem>>, vector<8x128xf32>
    %72 = arith.addf %68, %71 : vector<8x128xf32>
    %73 = arith.mulf %71, %71 : vector<8x128xf32>
    %74 = arith.addf %70, %73 : vector<8x128xf32>
    %c32 = arith.constant 32 : index
    %c0_78 = arith.constant 0 : index
    %75 = vector.load %arg9[%c32, %c0_78] : memref<64x128xf32, #tpu.memory_space<vmem>>, vector<8x128xf32>
    %76 = arith.addf %72, %75 : vector<8x128xf32>
    %77 = arith.mulf %75, %75 : vector<8x128xf32>
    %78 = arith.addf %74, %77 : vector<8x128xf32>
    %c40 = arith.constant 40 : index
    %c0_79 = arith.constant 0 : index
    %79 = vector.load %arg9[%c40, %c0_79] : memref<64x128xf32, #tpu.memory_space<vmem>>, vector<8x128xf32>
    %80 = arith.addf %76, %79 : vector<8x128xf32>
    %81 = arith.mulf %79, %79 : vector<8x128xf32>
    %82 = arith.addf %78, %81 : vector<8x128xf32>
    %c48 = arith.constant 48 : index
    %c0_80 = arith.constant 0 : index
    %83 = vector.load %arg9[%c48, %c0_80] : memref<64x128xf32, #tpu.memory_space<vmem>>, vector<8x128xf32>
    %84 = arith.addf %80, %83 : vector<8x128xf32>
    %85 = arith.mulf %83, %83 : vector<8x128xf32>
    %86 = arith.addf %82, %85 : vector<8x128xf32>
    %c56 = arith.constant 56 : index
    %c0_81 = arith.constant 0 : index
    %87 = vector.load %arg9[%c56, %c0_81] : memref<64x128xf32, #tpu.memory_space<vmem>>, vector<8x128xf32>
    %88 = arith.addf %84, %87 : vector<8x128xf32>
    %89 = arith.mulf %87, %87 : vector<8x128xf32>
    %90 = arith.addf %86, %89 : vector<8x128xf32>
    %c0_82 = arith.constant 0 : index
    %c0_83 = arith.constant 0 : index
    %c0_84 = arith.constant 0 : index
    %91 = vector.load %arg7[%c0_82, %c0_83, %c0_84] : memref<1x8x128xf32, #tpu.memory_space<vmem>>, vector<1x8x128xf32>
    %92 = vector.shape_cast %91 : vector<1x8x128xf32> to vector<8x128xf32>
    %93 = vector.shape_cast %88 : vector<8x128xf32> to vector<1x8x128xf32>
    tpu.vector_store %arg7[%c0_82, %c0_83, %c0_84], %93 {strides = array<i32>} : memref<1x8x128xf32, #tpu.memory_space<vmem>>, vector<1x8x128xf32>,
    %c0_85 = arith.constant 0 : index
    %c0_86 = arith.constant 0 : index
    %c0_87 = arith.constant 0 : index
    %94 = vector.load %arg8[%c0_85, %c0_86, %c0_87] : memref<1x8x128xf32, #tpu.memory_space<vmem>>, vector<1x8x128xf32>
    %95 = vector.shape_cast %94 : vector<1x8x128xf32> to vector<8x128xf32>
    %96 = vector.shape_cast %90 : vector<8x128xf32> to vector<1x8x128xf32>
    tpu.vector_store %arg8[%c0_85, %c0_86, %c0_87], %96 {strides = array<i32>} : memref<1x8x128xf32, #tpu.memory_space<vmem>>, vector<1x8x128xf32>,
    return
  }
  func.func @transform_0(%arg0: i32, %arg1: i32) -> (i32, i32, i32, i32, i32) {
    %c0_i32 = arith.constant 0 : i32
    %c0_i32_0 = arith.constant 0 : i32
    %c0_i32_1 = arith.constant 0 : i32
    %c0_i32_2 = arith.constant 0 : i32
    %c0_i32_3 = arith.constant 0 : i32
    return %arg1, %c0_i32, %c0_i32_0, %c0_i32_1, %c0_i32_2 : i32, i32, i32, i32, i32
  }
  func.func @transform_1(%arg0: i32, %arg1: i32) -> (i32, i32) {
    %c0_i32 = arith.constant 0 : i32
    %c0_i32_0 = arith.constant 0 : i32
    return %c0_i32, %arg0 : i32, i32
  }
  func.func @transform_2(%arg0: i32, %arg1: i32) -> (i32, i32) {
    %c0_i32 = arith.constant 0 : i32
    %c0_i32_0 = arith.constant 0 : i32
    %c0_i32_1 = arith.constant 0 : i32
    return %c0_i32, %c0_i32_0 : i32, i32
  }
  func.func @transform_3(%arg0: i32, %arg1: i32) -> (i32, i32) {
    %c0_i32 = arith.constant 0 : i32
    %c0_i32_0 = arith.constant 0 : i32
    %c0_i32_1 = arith.constant 0 : i32
    return %c0_i32, %c0_i32_0 : i32, i32
  }
  func.func @transform_4(%arg0: i32, %arg1: i32) -> (i32, i32, i32) {
    %c0_i32 = arith.constant 0 : i32
    %c0_i32_0 = arith.constant 0 : i32
    return %arg1, %c0_i32, %arg0 : i32, i32, i32
  }
  func.func @transform_5(%arg0: i32, %arg1: i32) -> (i32, i32, i32) {
    %c0_i32 = arith.constant 0 : i32
    %c0_i32_0 = arith.constant 0 : i32
    return %arg1, %c0_i32, %arg0 : i32, i32, i32
  }
  func.func @transform_6(%arg0: i32, %arg1: i32) -> (i32, i32, i32) {
    %c0_i32 = arith.constant 0 : i32
    %c0_i32_0 = arith.constant 0 : i32
    return %arg1, %c0_i32, %arg0 : i32, i32, i32
  }
}

module attributes {stable_mosaic.version = 11 : i64} {
  func.func @_epilogue_kernel(%arg0: i32, %arg1: i32, %arg2: memref<1x64x128xbf16, #tpu.memory_space<vmem>>, %arg3: memref<1x128xf32, #tpu.memory_space<vmem>>, %arg4: memref<1x128xf32, #tpu.memory_space<vmem>>, %arg5: memref<1x64x128xbf16, #tpu.memory_space<vmem>>, %arg6: memref<1x128xf32, #tpu.memory_space<vmem>>, %arg7: memref<1x128xf32, #tpu.memory_space<vmem>>, %arg8: memref<1x64x128xbf16, #tpu.memory_space<vmem>>) attributes {dimension_semantics = [#tpu.dimension_semantics<parallel>, #tpu.dimension_semantics<parallel>], iteration_bounds = array<i64: 2, 1>, scalar_prefetch = 0 : i64, scratch_operands = 0 : i64, tpu.core_type = #tpu.core_type<tc>, window_params = [{transform_indices = @transform_0, window_bounds = array<i64: 1, 64, 128>}, {pipeline_mode = #tpu.pipeline_mode<synchronous>, transform_indices = @transform_1, window_bounds = array<i64: 1, 128>}, {pipeline_mode = #tpu.pipeline_mode<synchronous>, transform_indices = @transform_2, window_bounds = array<i64: 1, 128>}, {transform_indices = @transform_3, window_bounds = array<i64: 1, 64, 128>}, {pipeline_mode = #tpu.pipeline_mode<synchronous>, transform_indices = @transform_4, window_bounds = array<i64: 1, 128>}, {pipeline_mode = #tpu.pipeline_mode<synchronous>, transform_indices = @transform_5, window_bounds = array<i64: 1, 128>}, {transform_indices = @transform_6, window_bounds = array<i64: 1, 64, 128>}]} {
    %c0 = arith.constant 0 : index
    %c0_0 = arith.constant 0 : index
    %c0_1 = arith.constant 0 : index
    %0 = vector.load %arg2[%c0, %c0_0, %c0_1] : memref<1x64x128xbf16, #tpu.memory_space<vmem>>, vector<1x64x128xbf16>
    %1 = vector.shape_cast %0 : vector<1x64x128xbf16> to vector<64x128xbf16>
    %2 = arith.extf %1 : vector<64x128xbf16> to vector<64x128xf32>
    %c0_2 = arith.constant 0 : index
    %c0_3 = arith.constant 0 : index
    %3 = vector.load %arg3[%c0_2, %c0_3] : memref<1x128xf32, #tpu.memory_space<vmem>>, vector<1x128xf32>
    %4 = vector.broadcast %3 : vector<1x128xf32> to vector<64x128xf32>
    %5 = arith.mulf %2, %4 : vector<64x128xf32>
    %c0_4 = arith.constant 0 : index
    %c0_5 = arith.constant 0 : index
    %6 = vector.load %arg4[%c0_4, %c0_5] : memref<1x128xf32, #tpu.memory_space<vmem>>, vector<1x128xf32>
    %7 = vector.broadcast %6 : vector<1x128xf32> to vector<64x128xf32>
    %8 = arith.addf %5, %7 : vector<64x128xf32>
    %c0_6 = arith.constant 0 : index
    %c0_7 = arith.constant 0 : index
    %c0_8 = arith.constant 0 : index
    %9 = vector.load %arg5[%c0_6, %c0_7, %c0_8] : memref<1x64x128xbf16, #tpu.memory_space<vmem>>, vector<1x64x128xbf16>
    %10 = vector.shape_cast %9 : vector<1x64x128xbf16> to vector<64x128xbf16>
    %11 = arith.extf %10 : vector<64x128xbf16> to vector<64x128xf32>
    %c0_9 = arith.constant 0 : index
    %c0_10 = arith.constant 0 : index
    %12 = vector.load %arg6[%c0_9, %c0_10] : memref<1x128xf32, #tpu.memory_space<vmem>>, vector<1x128xf32>
    %13 = vector.broadcast %12 : vector<1x128xf32> to vector<64x128xf32>
    %14 = arith.mulf %11, %13 : vector<64x128xf32>
    %c0_11 = arith.constant 0 : index
    %c0_12 = arith.constant 0 : index
    %15 = vector.load %arg7[%c0_11, %c0_12] : memref<1x128xf32, #tpu.memory_space<vmem>>, vector<1x128xf32>
    %16 = vector.broadcast %15 : vector<1x128xf32> to vector<64x128xf32>
    %17 = arith.addf %14, %16 : vector<64x128xf32>
    %18 = arith.addf %8, %17 : vector<64x128xf32>
    %cst = arith.constant 0.000000e+00 : f32
    %19 = vector.broadcast %cst : f32 to vector<64x128xf32>
    %20 = arith.maximumf %18, %19 : vector<64x128xf32>
    %21 = arith.truncf %20 : vector<64x128xf32> to vector<64x128xbf16>
    %c0_13 = arith.constant 0 : index
    %c0_14 = arith.constant 0 : index
    %c0_15 = arith.constant 0 : index
    %22 = vector.load %arg8[%c0_13, %c0_14, %c0_15] : memref<1x64x128xbf16, #tpu.memory_space<vmem>>, vector<1x64x128xbf16>
    %23 = vector.shape_cast %22 : vector<1x64x128xbf16> to vector<64x128xbf16>
    %24 = vector.shape_cast %21 : vector<64x128xbf16> to vector<1x64x128xbf16>
    tpu.vector_store %arg8[%c0_13, %c0_14, %c0_15], %24 {strides = array<i32>} : memref<1x64x128xbf16, #tpu.memory_space<vmem>>, vector<1x64x128xbf16>,
    return
  }
  func.func @transform_0(%arg0: i32, %arg1: i32) -> (i32, i32, i32) {
    %c0_i32 = arith.constant 0 : i32
    %c0_i32_0 = arith.constant 0 : i32
    return %arg0, %arg1, %c0_i32 : i32, i32, i32
  }
  func.func @transform_1(%arg0: i32, %arg1: i32) -> (i32, i32) {
    %c0_i32 = arith.constant 0 : i32
    %c0_i32_0 = arith.constant 0 : i32
    %c0_i32_1 = arith.constant 0 : i32
    return %c0_i32, %c0_i32_0 : i32, i32
  }
  func.func @transform_2(%arg0: i32, %arg1: i32) -> (i32, i32) {
    %c0_i32 = arith.constant 0 : i32
    %c0_i32_0 = arith.constant 0 : i32
    %c0_i32_1 = arith.constant 0 : i32
    return %c0_i32, %c0_i32_0 : i32, i32
  }
  func.func @transform_3(%arg0: i32, %arg1: i32) -> (i32, i32, i32) {
    %c0_i32 = arith.constant 0 : i32
    %c0_i32_0 = arith.constant 0 : i32
    return %arg0, %arg1, %c0_i32 : i32, i32, i32
  }
  func.func @transform_4(%arg0: i32, %arg1: i32) -> (i32, i32) {
    %c0_i32 = arith.constant 0 : i32
    %c0_i32_0 = arith.constant 0 : i32
    %c0_i32_1 = arith.constant 0 : i32
    return %c0_i32, %c0_i32_0 : i32, i32
  }
  func.func @transform_5(%arg0: i32, %arg1: i32) -> (i32, i32) {
    %c0_i32 = arith.constant 0 : i32
    %c0_i32_0 = arith.constant 0 : i32
    %c0_i32_1 = arith.constant 0 : i32
    return %c0_i32, %c0_i32_0 : i32, i32
  }
  func.func @transform_6(%arg0: i32, %arg1: i32) -> (i32, i32, i32) {
    %c0_i32 = arith.constant 0 : i32
    %c0_i32_0 = arith.constant 0 : i32
    return %arg0, %arg1, %c0_i32 : i32, i32, i32
  }
}

</mosaic_0001>

<bundles_post_ra>
// kernel: residual_block_forward.6
= control target key start
LH: loop header
LB: loop body
LE: loop exit
PB: predicated region body
PF: predicated region fallthrough
CT: control target
= control target key end

     0   :  { %s820_s15 = smov 0   ;;  %s822_s16 = smov 0   ;;  %s874_s0 = inlined_call_operand.vmem [shape: bf16[2,1,8,8,4], index: 0, kind: input, shape index: {}]   ;;  %s875_s1 = inlined_call_operand.vmem [shape: bf16[4,128], index: 1, kind: input, shape index: {}]   ;;  %s876_s2 = inlined_call_operand.vmem [shape: bf16[2,64,128], index: 2, kind: output, shape index: {0}]   ;;  %s877_s3 = inlined_call_operand.vmem [shape: f32[2,8,128], index: 3, kind: output, shape index: {1}]   ;;  %s878_s4 = inlined_call_operand.vmem [shape: f32[2,8,128], index: 4, kind: output, shape index: {2}]  }
   0x1   :  { %s824_s17 = smov 0  }
   0x2 LB: > { %s24_s18 = sadd.s32 1, %s789_s16  ;;  %p666_p0 = scmp.ge.s32.totalorder %s793_s17, 1  ;;  %s793_s17 = sphi %s824_s17, %s15_s17   ;;  %s789_s16 = sphi %s822_s16, %s880_s16   ;;  %s785_s15 = sphi %s820_s15, %s879_s15  }
   0x3   : > { %p25_p1 = scmp.ge.s32.totalorder %s24_s18, 2  ;;  %p194_p2 = scmp.lt.s32.totalorder %s793_s17, 3 }
   0x5   : > { %s882_s18 = smov (%p25_p1, %s24_s18), 0  ;;  %p195_p3 = pnand %p666_p0, %p194_p2 }
   0x6   : > { %v314_v0 = vld [vmem:[%s875_s1] sm:$0x3] (!%p195_p3)  ;;  %vm327_vm0 = vcmask (!%p195_p3), 1041408   ;;  %p241_p4 = scmp.lt.s32.totalorder (!%p195_p3), %s785_s15, 1  ;;  %vm305_vm1 = vcmask (!%p195_p3), 31744  }
   0x7   : > { %198 = sbr.rel (%p195_p3) target bundleno = 259 (0x103), region = 28  ;;  %741 = vmatprep.subr.msk.bf16.mxu0 (!%p195_p3), %vm327_vm0, %v314_v0  ;;  %v329_v1 = vsel (!%p195_p3), %vm327_vm0, %v314_v0, 0  ;;  %742 = vmatprep.subr.msk.bf16.mxu1 (!%p195_p3), %vm327_vm0, %v314_v0 }
   0x8   : > { %730 = vmatpush3.bf16.msra.mxu0 (!%p195_p3), %v329_v1  ;;  %740 = vmatpush3.bf16.msra.mxu1 (!%p195_p3), %v329_v1 }
   0xe   : > { %s884_s15 = smov (!%p241_p4, %s785_s15), 1 }
   0xf   : > { %s691_s21 = sshll.u32 %s884_s15, 5  ;;  %s671_s28 = sshll.u32 %s884_s15, 3 }
  0x10   : > { %s245_s24 = scalar_lea.vmem %s874_s0, %s691_s21  ;;  %s257_s27 = scalar_lea.vmem %s876_s2, %s691_s21 }
  0x11   : > { %v767_v2 = vld [vmem:[%s245_s24] sm:$0xff]   ;;  %v768_v3 = vld [vmem:[%s245_s24 + $0x8] sm:$0xff]   ;;  %v769_v4 = vld [vmem:[%s245_s24 + $0x10] sm:$0xff]   ;;  %s264_s5 = scalar_lea.vmem %s877_s3, %s671_s28  ;;  %s271_s8 = scalar_lea.vmem %s878_s4, %s671_s28 }
  0x12   : > { %v770_v5 = vld [vmem:[%s245_s24 + $0x18] sm:$0xff]   ;;  %306 = vst.msk [vmem:[#allocation3] sm:$0xff] %vm305_vm1, %v767_v2  ;;  %307 = vst.msk [vmem:[#allocation3 + $0x8] sm:$0xff] %vm305_vm1, %v768_v3 }
  0x13   : > { %308 = vst.msk [vmem:[#allocation3 + $0x10] sm:$0xff] %vm305_vm1, %v769_v4  ;;  %309 = vst.msk [vmem:[#allocation3 + $0x18] sm:$0xff] %vm305_vm1, %v770_v5 }
  0x19   : > { %v310_v6 = vld [vmem:[#allocation3] sm:$0xff]  ;;  %v311_v7 = vld [vmem:[#allocation3 + $0x8] sm:$0xff] }
  0x1a   : > { %731 = vmatprep.mubr.msk.bf16.mxu0 %vm305_vm1, %v310_v6  ;;  %v312_v8 = vld [vmem:[#allocation3 + $0x10] sm:$0xff]  ;;  %v313_v9 = vld [vmem:[#allocation3 + $0x18] sm:$0xff] }
  0x1b   : > { %732 = vmatmul.mubr.msk.bf16.vlgmr.msra.gmra.mrb[0].mxu0 %vm305_vm1, %v311_v7  ;;  %735 = vmatprep.mubr.msk.bf16.mxu1 %vm305_vm1, %v312_v8 }
  0x1c   : > { %736 = vmatmul.mubr.msk.bf16.vlgmr.msra.gmra.mrb[0].mxu1 %vm305_vm1, %v313_v9 }
  0xee   : > { %v733_v10 = vpop.f32.mrb[0].mxu0 }
  0xef   : > { %v365_v11 = vpop.f32.mrb[1].mxu0  ;;  %v737_v12 = vpop.f32.mrb[0].mxu1  ;;  %v462_v25 = vmul.f32 %v733_v10, %v733_v10 }
  0xf0   : > { %v734_v13 = vpop.f32.mrb[2].mxu0  ;;  %v381_v14 = vpop.f32.mrb[1].mxu1  ;;  %v454_v15 = vmul.f32 %v365_v11, %v365_v11  ;;  %v478_v37 = vmul.f32 %v737_v12, %v737_v12 }
  0xf1   : > { %v709_v16 = vpack.c.bf16 %v734_v13, %v733_v10  ;;  %v368_v17 = vpop.f32.mrb[3].mxu0  ;;  %v738_v18 = vpop.f32.mrb[2].mxu1  ;;  %v466_v28 = vmul.f32 %v734_v13, %v734_v13  ;;  %v470_v31 = vmul.f32 %v381_v14, %v381_v14 }
  0xf2   : > { %v704_v19 = vpack.c.bf16 %v368_v17, %v365_v11  ;;  %v457_v20 = vadd.f32 %v368_v17, %v365_v11  ;;  %v458_v21 = vmul.f32 %v368_v17, %v368_v17  ;;  %v719_v22 = vpack.c.bf16 %v738_v18, %v737_v12  ;;  %v384_v23 = vpop.f32.mrb[3].mxu1 }
  0xf3   : > { %721 = vst [vmem:[%s257_s27 + $0x8] sm:$0xff] %v709_v16   ;;  %v714_v24 = vpack.c.bf16 %v384_v23, %v381_v14  ;;  %v474_v36 = vmul.f32 %v384_v23, %v384_v23  ;;  %v482_v40 = vmul.f32 %v738_v18, %v738_v18 }
  0xf4   : > { %705 = vst [vmem:[%s257_s27] sm:$0xff] %v704_v19   ;;  %v459_v26 = vadd.f32 %v458_v21, %v454_v15  ;;  %v461_v27 = vadd.f32 %v733_v10, %v457_v20  ;;  %723 = vst [vmem:[%s257_s27 + $0x18] sm:$0xff] %v719_v22  }
  0xf5   : > { %722 = vst [vmem:[%s257_s27 + $0x10] sm:$0xff] %v714_v24  }
  0xf6   : > { %v463_v29 = vadd.f32 %v462_v25, %v459_v26  ;;  %v465_v30 = vadd.f32 %v734_v13, %v461_v27 }
  0xf8   : > { %v467_v32 = vadd.f32 %v466_v28, %v463_v29  ;;  %v469_v33 = vadd.f32 %v465_v30, %v381_v14 }
  0xfa   : > { %v471_v34 = vadd.f32 %v470_v31, %v467_v32  ;;  %v473_v35 = vadd.f32 %v469_v33, %v384_v23 }
  0xfc   : > { %v475_v38 = vadd.f32 %v474_v36, %v471_v34  ;;  %v477_v39 = vadd.f32 %v737_v12, %v473_v35 }
  0xfe   : > { %v479_v41 = vadd.f32 %v478_v37, %v475_v38  ;;  %v481_v42 = vadd.f32 %v738_v18, %v477_v39 }
 0x100   : > { %v483_v43 = vadd.f32 %v482_v40, %v479_v41  ;;  %484 = vst [vmem:[%s264_s5] sm:$0xff] %v481_v42 }
 0x102   : > { %485 = vst [vmem:[%s271_s8] sm:$0xff] %v483_v43 }
 0x103 PF: > { %s15_s17 = sadd.s32 1, %s793_s17   ;;  %s879_s15 = smov %s789_s16 }
 0x104   : > { %p12_p5 = scmp.ge.s32.totalorder %s15_s17, 4   ;;  %s880_s16 = smov %s882_s18 }
 0x106   :  { %14 = sbr.rel (!%p12_p5) target bundleno = 2 (0x2), region = 85 }

// kernel: residual_block_forward.7
= control target key start
LH: loop header
LB: loop body
LE: loop exit
PB: predicated region body
PF: predicated region fallthrough
CT: control target
= control target key end

     0   :  { %s760_s21 = smov 0   ;;  %s762_s22 = smov 0   ;;  %s871_s0 = inlined_call_operand.vmem [shape: bf16[2,64,128], index: 0, kind: input, shape index: {}]   ;;  %s872_s1 = inlined_call_operand.vmem [shape: f32[1,128], index: 1, kind: input, shape index: {}]   ;;  %s873_s2 = inlined_call_operand.vmem [shape: f32[1,128], index: 2, kind: input, shape index: {}]   ;;  %s874_s3 = inlined_call_operand.vmem [shape: bf16[2,64,128], index: 3, kind: input, shape index: {}]   ;;  %s875_s4 = inlined_call_operand.vmem [shape: f32[1,128], index: 4, kind: input, shape index: {}]   ;;  %s876_s5 = inlined_call_operand.vmem [shape: f32[1,128], index: 5, kind: input, shape index: {}]   ;;  %s877_s6 = inlined_call_operand.vmem [shape: bf16[2,64,128], index: 6, kind: output, shape index: {}]  }
   0x1   :  { %s764_s23 = smov 0  }
   0x2 LB: > { %s28_s24 = sadd.s32 1, %s719_s22  ;;  %p584_p0 = scmp.ge.s32.totalorder %s723_s23, 1  ;;  %s723_s23 = sphi %s764_s23, %s16_s23   ;;  %s719_s22 = sphi %s762_s22, %s879_s22   ;;  %s715_s21 = sphi %s760_s21, %s878_s21  }
   0x3   : > { %p30_p1 = scmp.ge.s32.totalorder %s28_s24, 2  ;;  %p250_p2 = scmp.lt.s32.totalorder %s723_s23, 3 }
   0x5   : > { %s881_s24 = smov (%p30_p1, %s28_s24), 0  ;;  %p251_p3 = pnand %p584_p0, %p250_p2 }
   0x6   : > { %p298_p4 = scmp.lt.s32.totalorder (!%p251_p3), %s715_s21, 1  ;;  %v795_v0 = vld [vmem:[%s872_s1] ss:$0 sm:$0xff] (!%p251_p3) }
   0x7   : > { %254 = sbr.rel (%p251_p3) target bundleno = 43 (0x2b), region = 44  ;;  %v800_v1 = vld [vmem:[%s875_s4] ss:$0 sm:$0xff] (!%p251_p3) }
   0x8   : > { %v809_v10 = vld [vmem:[%s873_s2] ss:$0 sm:$0xff] (!%p251_p3) }
   0x9   : > { %v814_v11 = vld [vmem:[%s876_s5] ss:$0 sm:$0xff] (!%p251_p3) }
   0xe   : > { %s883_s21 = smov (!%p298_p4, %s715_s21), 1 }
   0xf   : > { %s778_s25 = sshll.u32 %s883_s21, 5 }
  0x10   : > { %s784_s28 = scalar_lea.vmem %s871_s0, %s778_s25  ;;  %s790_s7 = scalar_lea.vmem %s874_s3, %s778_s25 }
  0x11   : > { %v617_v2 = vld [vmem:[%s784_s28] sm:$0xff]   ;;  %v668_v4 = vld [vmem:[%s784_s28 + $0x8] sm:$0xff]   ;;  %v669_v24 = vld [vmem:[%s784_s28 + $0x10] sm:$0xff]   ;;  %s841_s18 = scalar_lea.vmem %s877_s6, %s778_s25 }
  0x12   : > { %v633_v3 = vld [vmem:[%s790_s7] sm:$0xff]   ;;  %v618_v5 = vunpack.c.l.bf16 %v617_v2  ;;  %v619_v6 = vunpack.c.h.bf16 %v617_v2  ;;  %v671_v9 = vld [vmem:[%s790_s7 + $0x8] sm:$0xff]   ;;  %v622_v12 = vunpack.c.l.bf16 %v668_v4  ;;  %v623_v13 = vunpack.c.h.bf16 %v668_v4  ;;  %v672_v29 = vld [vmem:[%s790_s7 + $0x10] sm:$0xff]  }
  0x13   : > { %v634_v7 = vunpack.c.l.bf16 %v633_v3  ;;  %v635_v8 = vunpack.c.h.bf16 %v633_v3  ;;  %v638_v14 = vunpack.c.l.bf16 %v671_v9  ;;  %v639_v15 = vunpack.c.h.bf16 %v671_v9  ;;  %v670_v42 = vld [vmem:[%s784_s28 + $0x18] sm:$0xff]  }
  0x14   : > { %v350_v16 = vmul.f32 %v618_v5, %v795_v0  ;;  %v351_v17 = vmul.f32 %v619_v6, %v795_v0  ;;  %v352_v20 = vmul.f32 %v622_v12, %v795_v0  ;;  %v353_v21 = vmul.f32 %v623_v13, %v795_v0  ;;  %v673_v51 = vld [vmem:[%s790_s7 + $0x18] sm:$0xff]  }
  0x15   : > { %v396_v18 = vmul.f32 %v634_v7, %v800_v1  ;;  %v397_v19 = vmul.f32 %v635_v8, %v800_v1  ;;  %v398_v22 = vmul.f32 %v638_v14, %v800_v1  ;;  %v399_v23 = vmul.f32 %v639_v15, %v800_v1 }
  0x16   : > { %v365_v25 = vadd.f32 %v809_v10, %v350_v16  ;;  %v366_v26 = vadd.f32 %v809_v10, %v351_v17  ;;  %v367_v30 = vadd.f32 %v809_v10, %v352_v20  ;;  %v368_v31 = vadd.f32 %v809_v10, %v353_v21 }
  0x17   : > { %v411_v27 = vadd.f32 %v814_v11, %v396_v18  ;;  %v412_v28 = vadd.f32 %v814_v11, %v397_v19  ;;  %v413_v32 = vadd.f32 %v814_v11, %v398_v22  ;;  %v414_v33 = vadd.f32 %v814_v11, %v399_v23 }
  0x18   : > { %v626_v36 = vunpack.c.l.bf16 %v669_v24  ;;  %v627_v37 = vunpack.c.h.bf16 %v669_v24  ;;  %v642_v40 = vunpack.c.l.bf16 %v672_v29  ;;  %v643_v41 = vunpack.c.h.bf16 %v672_v29 }
  0x19   : > { %v419_v34 = vadd.f32 %v411_v27, %v365_v25  ;;  %v420_v35 = vadd.f32 %v412_v28, %v366_v26  ;;  %v421_v38 = vadd.f32 %v413_v32, %v367_v30  ;;  %v422_v39 = vadd.f32 %v414_v33, %v368_v31 }
  0x1a   : > { %v354_v45 = vmul.f32 %v626_v36, %v795_v0  ;;  %v355_v46 = vmul.f32 %v627_v37, %v795_v0  ;;  %v400_v49 = vmul.f32 %v642_v40, %v800_v1  ;;  %v401_v50 = vmul.f32 %v643_v41, %v800_v1 }
  0x1b   : > { %v427_v43 = vmax.f32 %v419_v34, 0.0  ;;  %v428_v44 = vmax.f32 %v420_v35, 0.0  ;;  %v429_v47 = vmax.f32 %v421_v38, 0.0  ;;  %v430_v48 = vmax.f32 %v422_v39, 0.0 }
  0x1c   : > { %v369_v53 = vadd.f32 %v809_v10, %v354_v45  ;;  %v370_v54 = vadd.f32 %v809_v10, %v355_v46  ;;  %v630_v55 = vunpack.c.l.bf16 %v670_v42  ;;  %v415_v57 = vadd.f32 %v814_v11, %v400_v49 }
  0x1d   : > { %v651_v52 = vpack.c.bf16 %v428_v44, %v427_v43  ;;  %v656_v56 = vpack.c.bf16 %v430_v48, %v429_v47  ;;  %v416_v58 = vadd.f32 %v814_v11, %v401_v50  ;;  %v631_v59 = vunpack.c.h.bf16 %v670_v42 }
  0x1e   : > { %v356_v60 = vmul.f32 %v630_v55, %v795_v0  ;;  %v646_v61 = vunpack.c.l.bf16 %v673_v51  ;;  %v647_v62 = vunpack.c.h.bf16 %v673_v51  ;;  %v423_v63 = vadd.f32 %v415_v57, %v369_v53 }
  0x1f   : > { %652 = vst [vmem:[%s841_s18] sm:$0xff] %v651_v52   ;;  %674 = vst [vmem:[%s841_s18 + $0x8] sm:$0xff] %v656_v56   ;;  %v424_v2 = vadd.f32 %v416_v58, %v370_v54  ;;  %v357_v3 = vmul.f32 %v631_v59, %v795_v0 }
  0x20   : > { %v371_v4 = vadd.f32 %v809_v10, %v356_v60  ;;  %v402_v5 = vmul.f32 %v646_v61, %v800_v1  ;;  %v403_v6 = vmul.f32 %v647_v62, %v800_v1  ;;  %v431_v7 = vmax.f32 %v423_v63, 0.0 }
  0x21   : > { %v432_v8 = vmax.f32 %v424_v2, 0.0  ;;  %v372_v9 = vadd.f32 %v809_v10, %v357_v3 }
  0x22   : > { %v417_v12 = vadd.f32 %v814_v11, %v402_v5  ;;  %v418_v13 = vadd.f32 %v814_v11, %v403_v6 }
  0x23   : > { %v661_v14 = vpack.c.bf16 %v432_v8, %v431_v7 }
  0x24   : > { %v425_v15 = vadd.f32 %v417_v12, %v371_v4  ;;  %v426_v16 = vadd.f32 %v418_v13, %v372_v9 }
  0x25   : > { %675 = vst [vmem:[%s841_s18 + $0x10] sm:$0xff] %v661_v14  }
  0x26   : > { %v433_v0 = vmax.f32 %v425_v15, 0.0  ;;  %v434_v17 = vmax.f32 %v426_v16, 0.0 }
  0x28   : > { %v666_v18 = vpack.c.bf16 %v434_v17, %v433_v0 }
  0x2a   : > { %676 = vst [vmem:[%s841_s18 + $0x18] sm:$0xff] %v666_v18  }
  0x2b PF: > { %s16_s23 = sadd.s32 1, %s723_s23   ;;  %s878_s21 = smov %s719_s22 }
  0x2c   : > { %p13_p5 = scmp.ge.s32.totalorder %s16_s23, 4   ;;  %s879_s22 = smov %s881_s24 }
  0x2e   :  { %15 = sbr.rel (!%p13_p5) target bundleno = 2 (0x2), region = 77 }

// kernel: residual_block_forward.4
= control target key start
LH: loop header
LB: loop body
LE: loop exit
PB: predicated region body
PF: predicated region fallthrough
CT: control target
= control target key end

     0   :  { %s1856_s15 = smov 0   ;;  %s1858_s16 = smov 0   ;;  %s2211_s0 = inlined_call_operand.vmem [shape: bf16[2,4,9,9,4], index: 0, kind: input, shape index: {}]   ;;  %s2212_s1 = inlined_call_operand.vmem [shape: bf16[36,128], index: 1, kind: input, shape index: {}]   ;;  %s2213_s2 = inlined_call_operand.vmem [shape: bf16[2,10,10,128], index: 2, kind: output, shape index: {0}]   ;;  %s2214_s3 = inlined_call_operand.vmem [shape: f32[2,8,128], index: 3, kind: output, shape index: {1}]   ;;  %s2215_s4 = inlined_call_operand.vmem [shape: f32[2,8,128], index: 4, kind: output, shape index: {2}]  }
   0x1   :  { %s1860_s17 = smov 0  }
   0x2 LB: > { %s24_s18 = sadd.s32 1, %s1816_s16  ;;  %p1537_p0 = scmp.ge.s32.totalorder %s1820_s17, 1  ;;  %s1820_s17 = sphi %s1860_s17, %s15_s17   ;;  %s1816_s16 = sphi %s1858_s16, %s2223_s16   ;;  %s1812_s15 = sphi %s1856_s15, %s2222_s15  }
   0x3   : > { %p25_p1 = scmp.ge.s32.totalorder %s24_s18, 2  ;;  %p194_p2 = scmp.lt.s32.totalorder %s1820_s17, 3 }
   0x5   : > { %s2225_s18 = smov (%p25_p1, %s24_s18), 0  ;;  %p195_p3 = pnand %p1537_p0, %p194_p2 }
   0x6   : > { %p241_p4 = scmp.lt.s32.totalorder (!%p195_p3), %s1812_s15, 1  ;;  %vm372_vm0 = vsmask.f32 (!%p195_p3), 3328  ;;  %vm373_vm1 = vsmask.f32 (!%p195_p3), 7440  ;;  %s1822_s23 = smov (!%p195_p3), 4  }
   0x7   : > { %198 = sbr.rel (%p195_p3) target bundleno = 441 (0x1b9), region = 28  ;;  %s1823_s24 = smov (!%p195_p3), 12   ;;  %vm1903_vm2 = vmor (!%p195_p3), %vm372_vm0, %vm373_vm1  ;;  %vm305_vm3 = vcmask (!%p195_p3), 31744   ;;  %vm1051_vm4 = vcmask (!%p195_p3), 1041408   ;;  %vm351_vm5 = vcmask (!%p195_p3), 64544   ;;  %vm511_vm6 = vcmask (!%p195_p3), 97344  }
   0x8   : > { %s1824_s25 = smov (!%p195_p3), 16   ;;  %s1825_s26 = smov (!%p195_p3), 8   ;;  %vm557_vm7 = vcmask (!%p195_p3), 130144   ;;  %vm603_vm8 = vcmask (!%p195_p3), 162944   ;;  %vm760_vm9 = vcmask (!%p195_p3), 195744   ;;  %vm806_vm10 = vcmask (!%p195_p3), 228544  }
   0x9   : > { %s1826_s27 = smov (!%p195_p3), 20   ;;  %s1827_s28 = smov (!%p195_p3), 24   ;;  %vm852_vm11 = vcmask (!%p195_p3), 261344   ;;  %vm1009_vm12 = vcmask (!%p195_p3), 294144   ;;  %vm1038_vm13 = vcmask (!%p195_p3), 293888   ;;  %vm1269_vm14 = vcmask (!%p195_p3), 1043456  }
   0xa   : > { %s1828_s5 = smov (!%p195_p3), 28   ;;  %s1829_s8 = smov (!%p195_p3), 32   ;;  %vm1270_vm15 = vsmask.f32 (!%p195_p3), 7938  ;;  %vm1275_vm0 = vcmask (!%p195_p3), 1040384  }
   0xb   : > { %vm1276_vm1 = vsmask.f32 (!%p195_p3), 256 }
   0xe   : > { %s2227_s15 = smov (!%p241_p4, %s1812_s15), 1 }
   0xf   : > { %s1736_s19 = smul.u32 288, %s2227_s15 }
  0x10   : > { %s1737_s11 = smul.u32 80, %s2227_s15 }
  0x11   : > { %s1880_s22 = scalar_lea.vmem %s2211_s0, %s1736_s19  ;;  %s1540_s19 = sshll.u32 %s2227_s15, 3 }
  0x12   : > { %v1771_v0 = vld [vmem:[%s1880_s22 + $0x48] ss:$8 sps:$4 sm:$0xff]   ;;  %v1773_v2 = vld [vmem:[%s1880_s22 + $0x58] ss:$8 sps:$4 sm:$0xff]   ;;  %v357_v6 = vld [vmem:[%s1880_s22 + $0x4] sm:$0x1]  ;;  %s2093_s14 = scalar_lea.vmem %s2213_s2, %s1737_s11 }
  0x13   : > { %v1772_v1 = vld [vmem:[%s1880_s22 + $0xa0] ss:$8 sps:$4 sm:$0xff]   ;;  %339 = vrot.lane.b32.xlu0 %v1771_v0, %s1822_s23  ;;  %v1775_v4 = vld [vmem:[%s1880_s22 + $0x90] ss:$8 sps:$4 sm:$0xff]   ;;  %v359_v8 = vld [vmem:[%s1880_s22 + $0xc] sm:$0x1] }
  0x14   : > { %547 = vrot.lane.b32.xlu1 %v1772_v1, %s1823_s24  ;;  %v1774_v3 = vld [vmem:[%s1880_s22 + $0xe8] ss:$8 sps:$4 sm:$0xff]   ;;  %v356_v5 = vld [vmem:[%s1880_s22] sm:$0xf]  ;;  %v385_v11 = vshll.u32 %v357_v6, 16  ;;  %v399_v14 = vshll.u32 %v359_v8, 16 }
  0x15   : > { %v358_v7 = vld [vmem:[%s1880_s22 + $0x8] sm:$0xf]  ;;  %v376_v9 = vshrl.u32 %v356_v5, 16  ;;  %v379_v10 = vshll.u32 %v356_v5, 16  ;;  %v1776_v19 = vld [vmem:[%s1880_s22 + $0xd8] ss:$8 sps:$4 sm:$0xff]  }
  0x16   : > { %v390_v12 = vshrl.u32 %v358_v7, 16  ;;  %v393_v13 = vshll.u32 %v358_v7, 16  ;;  %v387_v17 = vrot.slane %v385_v11, 5  ;;  %v401_v21 = vrot.slane %v399_v14, 5  ;;  %v360_v22 = vld [vmem:[%s1880_s22 + $0x10] sm:$0xf] }
  0x17   : > { %341 = vrot.lane.b32.xlu0 %v1773_v2, %s1822_s23  ;;  %v378_v15 = vrot.slane %v376_v9, 4  ;;  %v381_v16 = vrot.slane %v379_v10, 5  ;;  %v361_v23 = vld [vmem:[%s1880_s22 + $0x14] sm:$0x1]  ;;  %v362_v25 = vld [vmem:[%s1880_s22 + $0x18] sm:$0xf] }
  0x18   : > { %593 = vrot.lane.b32.xlu1 %v1774_v3, %s1824_s25  ;;  %v392_v18 = vrot.slane %v390_v12, 4  ;;  %v395_v20 = vrot.slane %v393_v13, 5  ;;  %v363_v26 = vld [vmem:[%s1880_s22 + $0x1c] sm:$0x1]  ;;  %v404_v27 = vshrl.u32 %v360_v22, 16  ;;  %v407_v28 = vshll.u32 %v360_v22, 16 }
  0x19   : > { %v382_v24 = vor.u32 %v381_v16, %v378_v15  ;;  %v413_v31 = vshll.u32 %v361_v23, 16  ;;  %v418_v32 = vshrl.u32 %v362_v25, 16  ;;  %v421_v33 = vshll.u32 %v362_v25, 16  ;;  %v1586_v34 = vld [vmem:[%s1880_s22 + $0x90] sm:$0xf] }
  0x1a   : > { %v396_v30 = vor.u32 %v395_v20, %v392_v18  ;;  %v406_v36 = vrot.slane %v404_v27, 4  ;;  %v409_v37 = vrot.slane %v407_v28, 5  ;;  %v427_v38 = vshll.u32 %v363_v26, 16  ;;  %v1587_v39 = vld [vmem:[%s1880_s22 + $0x94] sm:$0x1] }
  0x1b   : > { %545 = vrot.lane.b32.xlu0 %v1775_v4, %s1823_s24  ;;  %v383_v35 = vrot.slane %v382_v24, 4  ;;  %v415_v41 = vrot.slane %v413_v31, 5  ;;  %v420_v42 = vrot.slane %v418_v32, 4  ;;  %v423_v43 = vrot.slane %v421_v33, 5  ;;  %v1588_v44 = vld [vmem:[%s1880_s22 + $0x98] sm:$0xf] }
  0x1c   : > { %v397_v40 = vrot.slane %v396_v30, 4  ;;  %v410_v46 = vor.u32 %v409_v37, %v406_v36  ;;  %v429_v47 = vrot.slane %v427_v38, 5  ;;  %v1589_v48 = vld [vmem:[%s1880_s22 + $0x9c] sm:$0x1]  ;;  %v625_v49 = vshrl.u32 %v1586_v34, 16 }
  0x1d   : > { %v388_v45 = vsel %vm1903_vm2, %v383_v35, %v387_v17  ;;  %v424_v51 = vor.u32 %v423_v43, %v420_v42  ;;  %v628_v52 = vshll.u32 %v1586_v34, 16  ;;  %v634_v53 = vshll.u32 %v1587_v39, 16  ;;  %v1590_v54 = vld [vmem:[%s1880_s22 + $0xa0] sm:$0xf]  ;;  %v1591_v55 = vld [vmem:[%s1880_s22 + $0xa4] sm:$0x1] }
  0x1e   : > { %v402_v50 = vsel %vm1903_vm2, %v397_v40, %v401_v21  ;;  %v411_v57 = vrot.slane %v410_v46, 4  ;;  %v627_v58 = vrot.slane %v625_v49, 4  ;;  %v639_v59 = vshrl.u32 %v1588_v44, 16  ;;  %v1592_v60 = vld [vmem:[%s1880_s22 + $0xa8] sm:$0xf] }
  0x1f   : > { %591 = vrot.lane.b32.xlu0 %v1776_v19, %s1824_s25  ;;  %v1558_v56 = vcombine.low %v388_v45, %v402_v50  ;;  %v425_v61 = vrot.slane %v424_v51, 4  ;;  %v630_v62 = vrot.slane %v628_v52, 5  ;;  %v636_v63 = vrot.slane %v634_v53, 5  ;;  %v1593_v8 = vld [vmem:[%s1880_s22 + $0xac] sm:$0x1] }
  0x20   : > { %v642_v0 = vshll.u32 %v1588_v44, 16  ;;  %v416_v1 = vsel %vm1903_vm2, %v411_v57, %v415_v41  ;;  %v641_v2 = vrot.slane %v639_v59, 4  ;;  %v648_v3 = vshll.u32 %v1589_v48, 16  ;;  %v1777_v32 = vld [vmem:[%s1880_s22 + $0x8] ss:$8 sps:$4 sm:$0xff]  }
  0x21   : > { %499 = vrot.lane.b32.xlu1 %v1558_v56, %s1825_s26  ;;  %v653_v4 = vshrl.u32 %v1590_v54, 16  ;;  %v430_v5 = vsel %vm1903_vm2, %v425_v61, %v429_v47  ;;  %v631_v6 = vor.u32 %v630_v62, %v627_v58  ;;  %v656_v9 = vshll.u32 %v1590_v54, 16  ;;  %v1630_v33 = vld [vmem:[%s1880_s22 + $0x8] sm:$0xf]  ;;  %v1631_v35 = vld [vmem:[%s1880_s22 + $0xc] sm:$0x1] }
  0x22   : > { %v644_v7 = vrot.slane %v642_v0, 5  ;;  %v1559_v10 = vcombine.low %v416_v1, %v430_v5  ;;  %v650_v11 = vrot.slane %v648_v3, 5  ;;  %v662_v13 = vshll.u32 %v1591_v55, 16  ;;  %v1632_v36 = vld [vmem:[%s1880_s22 + $0x10] sm:$0xf]  ;;  %v1795_v1 = vld [vmem:[%s2212_s1] sm:$0xff]  }
  0x23   : > { %v655_v12 = vrot.slane %v653_v4, 4  ;;  %v632_v14 = vrot.slane %v631_v6, 4  ;;  %v658_v16 = vrot.slane %v656_v9, 5  ;;  %v667_v17 = vshrl.u32 %v1592_v60, 16  ;;  %v1633_v37 = vld [vmem:[%s1880_s22 + $0x14] sm:$0x1]  ;;  %1714 = vmatprep.subr.bf16.mxu0 %v1795_v1  ;;  %1728 = vmatprep.subr.bf16.mxu1 %v1795_v1 }
  0x24   : > { %v645_v15 = vor.u32 %v644_v7, %v641_v2  ;;  %v664_v18 = vrot.slane %v662_v13, 5  ;;  %v670_v19 = vshll.u32 %v1592_v60, 16  ;;  %v676_v20 = vshll.u32 %v1593_v8, 16  ;;  %v1779_v46 = vld [vmem:[%s1880_s22 + $0x50] ss:$8 sps:$4 sm:$0xff]   ;;  %1715 = vmatpush3.bf16.msra.mxu0 %v1795_v1  ;;  %1731 = vmatpush3.bf16.msra.mxu1 %v1795_v1 }
  0x25   : > { %501 = vrot.lane.b32.xlu1 %v1559_v10, %s1825_s26  ;;  %v637_v21 = vsel %vm1903_vm2, %v632_v14, %v636_v63  ;;  %v659_v23 = vor.u32 %v658_v16, %v655_v12  ;;  %v669_v24 = vrot.slane %v667_v17, 4  ;;  %v874_v39 = vshrl.u32 %v1630_v33, 16  ;;  %v1778_v51 = vld [vmem:[%s1880_s22 + $0x18] ss:$8 sps:$4 sm:$0xff]   ;;  %v365_v57 = vld [vmem:[%s1880_s22 + $0x24] sm:$0x1] }
  0x26   : > { %v646_v22 = vrot.slane %v645_v15, 4  ;;  %v672_v25 = vrot.slane %v670_v19, 5  ;;  %v678_v31 = vrot.slane %v676_v20, 5  ;;  %v877_v40 = vshll.u32 %v1630_v33, 16  ;;  %v364_v55 = vld [vmem:[%s1880_s22 + $0x20] sm:$0xf] }
  0x27   : > { %v660_v27 = vrot.slane %v659_v23, 4  ;;  %v883_v41 = vshll.u32 %v1631_v35, 16  ;;  %v888_v42 = vshrl.u32 %v1632_v36, 16  ;;  %v891_v43 = vshll.u32 %v1632_v36, 16  ;;  %v366_v58 = vld [vmem:[%s1880_s22 + $0x28] sm:$0xf] }
  0x28   : > { %v651_v26 = vsel %vm1903_vm2, %v646_v22, %v650_v11  ;;  %v673_v30 = vor.u32 %v672_v25, %v669_v24  ;;  %v897_v44 = vshll.u32 %v1633_v37, 16  ;;  %v876_v47 = vrot.slane %v874_v39, 4  ;;  %v367_v59 = vld [vmem:[%s1880_s22 + $0x2c] sm:$0x1]  ;;  %v1634_v0 = vld [vmem:[%s1880_s22 + $0x18] sm:$0xf] }
  0x29   : > { %v1602_v28 = vcombine.low %v637_v21, %v651_v26  ;;  %v665_v34 = vsel %vm1903_vm2, %v660_v27, %v664_v18  ;;  %v879_v48 = vrot.slane %v877_v40, 5  ;;  %v885_v49 = vrot.slane %v883_v41, 5  ;;  %v1635_v6 = vld [vmem:[%s1880_s22 + $0x1c] sm:$0x1]  ;;  %v1636_v11 = vld [vmem:[%s1880_s22 + $0x20] sm:$0xf] }
  0x2a   : > { %v674_v38 = vrot.slane %v673_v30, 4  ;;  %v890_v52 = vrot.slane %v888_v42, 4  ;;  %v893_v53 = vrot.slane %v891_v43, 5  ;;  %v899_v54 = vrot.slane %v897_v44, 5  ;;  %v1781_v12 = vld [vmem:[%s1880_s22 + $0x60] ss:$8 sps:$4 sm:$0xff]  }
  0x2b   : > { %748 = vrot.lane.b32.xlu0 %v1602_v28, %s1826_s27  ;;  %v880_v56 = vor.u32 %v879_v48, %v876_v47  ;;  %v432_v61 = vshrl.u32 %v364_v55, 16  ;;  %v435_v62 = vshll.u32 %v364_v55, 16  ;;  %v441_v63 = vshll.u32 %v365_v57, 16  ;;  %v1780_v17 = vld [vmem:[%s1880_s22 + $0x68] ss:$8 sps:$4 sm:$0xff]  }
  0x2c   : > { %v679_v45 = vsel %vm1903_vm2, %v674_v38, %v678_v31  ;;  %v894_v60 = vor.u32 %v893_v53, %v890_v52  ;;  %v446_v3 = vshrl.u32 %v366_v58, 16  ;;  %v449_v4 = vshll.u32 %v366_v58, 16  ;;  %v1637_v20 = vld [vmem:[%s1880_s22 + $0x24] sm:$0x1]  ;;  %v1782_v23 = vld [vmem:[%s1880_s22 + $0x78] ss:$8 sps:$4 sm:$0xff]  }
  0x2d   : > { %v1603_v50 = vcombine.low %v665_v34, %v679_v45  ;;  %v881_v2 = vrot.slane %v880_v56, 4  ;;  %v455_v5 = vshll.u32 %v367_v59, 16  ;;  %v434_v8 = vrot.slane %v432_v61, 4  ;;  %v368_v27 = vld [vmem:[%s1880_s22 + $0x30] sm:$0xf]  ;;  %v1796_v48 = vld [vmem:[%s2212_s1 + $0x8] sm:$0xff]  }
  0x2e   : > { %v895_v7 = vrot.slane %v894_v60, 4  ;;  %v437_v9 = vrot.slane %v435_v62, 5  ;;  %v443_v10 = vrot.slane %v441_v63, 5  ;;  %v448_v14 = vrot.slane %v446_v3, 4  ;;  %v369_v28 = vld [vmem:[%s1880_s22 + $0x34] sm:$0x1]  ;;  %1716 = vmatprep.subr.bf16.mxu0 %v1796_v48  ;;  %1729 = vmatprep.subr.bf16.mxu1 %v1796_v48 }
  0x2f   : > { %794 = vrot.lane.b32.xlu0 %v1777_v32, %s1827_s28  ;;  %750 = vrot.lane.b32.xlu1 %v1603_v50, %s1826_s27  ;;  %v886_v13 = vsel %vm1903_vm2, %v881_v2, %v885_v49  ;;  %v451_v15 = vrot.slane %v449_v4, 5  ;;  %v457_v16 = vrot.slane %v455_v5, 5  ;;  %v902_v21 = vshrl.u32 %v1634_v0, 16  ;;  %v370_v34 = vld [vmem:[%s1880_s22 + $0x38] sm:$0xf] }
  0x30   : > { %v900_v18 = vsel %vm1903_vm2, %v895_v7, %v899_v54  ;;  %v438_v19 = vor.u32 %v437_v9, %v434_v8  ;;  %v905_v22 = vshll.u32 %v1634_v0, 16  ;;  %v911_v25 = vshll.u32 %v1635_v6, 16  ;;  %v371_v39 = vld [vmem:[%s1880_s22 + $0x3c] sm:$0x1]  ;;  %1717 = vmatpush3.bf16.msra.mxu0 %v1796_v48  ;;  %v1594_v2 = vld [vmem:[%s1880_s22 + $0xb0] sm:$0xf]  ;;  %1732 = vmatpush3.bf16.msra.mxu1 %v1796_v48 }
  0x31   : > { %v452_v24 = vor.u32 %v451_v15, %v448_v14  ;;  %v916_v26 = vshrl.u32 %v1636_v11, 16  ;;  %v904_v31 = vrot.slane %v902_v21, 4  ;;  %v919_v33 = vshll.u32 %v1636_v11, 16  ;;  %v1595_v3 = vld [vmem:[%s1880_s22 + $0xb4] sm:$0x1] }
  0x32   : > { %v439_v30 = vrot.slane %v438_v19, 4  ;;  %v907_v32 = vrot.slane %v905_v22, 5  ;;  %v1646_v35 = vcombine.low %v886_v13, %v900_v18  ;;  %v925_v38 = vshll.u32 %v1637_v20, 16  ;;  %v1783_v7 = vld [vmem:[%s1880_s22 + $0xb0] ss:$8 sps:$4 sm:$0xff]  }
  0x33   : > { %840 = vrot.lane.b32.xlu0 %v1779_v46, %s1828_s5  ;;  %796 = vrot.lane.b32.xlu1 %v1778_v51, %s1827_s28  ;;  %v453_v36 = vrot.slane %v452_v24, 4  ;;  %v918_v37 = vrot.slane %v916_v26, 4  ;;  %v913_v41 = vrot.slane %v911_v25, 5  ;;  %v921_v42 = vrot.slane %v919_v33, 5  ;;  %v1596_v8 = vld [vmem:[%s1880_s22 + $0xb8] sm:$0xf] }
  0x34   : > { %v908_v40 = vor.u32 %v907_v32, %v904_v31  ;;  %v460_v43 = vshrl.u32 %v368_v27, 16  ;;  %v444_v44 = vsel %vm1903_vm2, %v439_v30, %v443_v10  ;;  %v463_v46 = vshll.u32 %v368_v27, 16  ;;  %v1597_v9 = vld [vmem:[%s1880_s22 + $0xbc] sm:$0x1]  ;;  %v1598_v15 = vld [vmem:[%s1880_s22 + $0xc0] sm:$0xf] }
  0x35   : > { %v458_v45 = vsel %vm1903_vm2, %v453_v36, %v457_v16  ;;  %v469_v47 = vshll.u32 %v369_v28, 16  ;;  %v922_v50 = vor.u32 %v921_v42, %v918_v37  ;;  %v927_v51 = vrot.slane %v925_v38, 5  ;;  %v1599_v20 = vld [vmem:[%s1880_s22 + $0xc4] sm:$0x1]  ;;  %v1600_v25 = vld [vmem:[%s1880_s22 + $0xc8] sm:$0xf] }
  0x36   : > { %v909_v49 = vrot.slane %v908_v40, 4  ;;  %v462_v52 = vrot.slane %v460_v43, 4  ;;  %v465_v53 = vrot.slane %v463_v46, 5  ;;  %v474_v54 = vshrl.u32 %v370_v34, 16  ;;  %v1601_v28 = vld [vmem:[%s1880_s22 + $0xcc] sm:$0x1] }
  0x37   : > { %842 = vrot.lane.b32.xlu0 %v1781_v12, %s1828_s5  ;;  %343 = vrot.lane.b32.xlu1 %v1780_v17, %s1822_s23  ;;  %v477_v55 = vshll.u32 %v370_v34, 16  ;;  %v1560_v56 = vcombine.low %v444_v44, %v458_v45  ;;  %v923_v58 = vrot.slane %v922_v50, 4  ;;  %v483_v59 = vshll.u32 %v371_v39, 16  ;;  %v1784_v33 = vld [vmem:[%s1880_s22 + $0xc0] ss:$8 sps:$4 sm:$0xff]  }
  0x38   : > { %v914_v57 = vsel %vm1903_vm2, %v909_v49, %v913_v41  ;;  %v466_v60 = vor.u32 %v465_v53, %v462_v52  ;;  %v471_v61 = vrot.slane %v469_v47, 5  ;;  %v476_v62 = vrot.slane %v474_v54, 4  ;;  %v1785_v37 = vld [vmem:[%s1880_s22 + $0xf8] ss:$8 sps:$4 sm:$0xff]  }
  0x39   : > { %v479_v63 = vrot.slane %v477_v55, 5  ;;  %v928_v0 = vsel %vm1903_vm2, %v923_v58, %v927_v51  ;;  %v485_v1 = vrot.slane %v483_v59, 5  ;;  %v681_v10 = vshrl.u32 %v1594_v2, 16  ;;  %v1786_v55 = vld [vmem:[%s1880_s22 + $0x108] ss:$8 sps:$4 sm:$0xff]  }
  0x3a   : > { %v1647_v4 = vcombine.low %v914_v57, %v928_v0  ;;  %v467_v5 = vrot.slane %v466_v60, 4  ;;  %v684_v11 = vshll.u32 %v1594_v2, 16  ;;  %v690_v12 = vshll.u32 %v1595_v3, 16  ;;  %v1787_v59 = vld [vmem:[%s1880_s22 + $0x28] ss:$8 sps:$4 sm:$0xff]  }
  0x3b   : > { %345 = vrot.lane.b32.xlu0 %v1782_v23, %s1822_s23  ;;  %997 = vrot.lane.b32.xlu1 %v1646_v35, %s1829_s8  ;;  %v480_v6 = vor.u32 %v479_v63, %v476_v62  ;;  %v695_v13 = vshrl.u32 %v1596_v8, 16  ;;  %v698_v14 = vshll.u32 %v1596_v8, 16  ;;  %v683_v18 = vrot.slane %v681_v10, 4  ;;  %v1639_v60 = vld [vmem:[%s1880_s22 + $0x2c] sm:$0x1] }
  0x3c   : > { %v472_v16 = vsel %vm1903_vm2, %v467_v5, %v471_v61  ;;  %v704_v19 = vshll.u32 %v1597_v9, 16  ;;  %v686_v21 = vrot.slane %v684_v11, 5  ;;  %v692_v22 = vrot.slane %v690_v12, 5  ;;  %v1640_v61 = vld [vmem:[%s1880_s22 + $0x30] sm:$0xf] }
  0x3d   : > { %v481_v17 = vrot.slane %v480_v6, 4  ;;  %v697_v23 = vrot.slane %v695_v13, 4  ;;  %v700_v24 = vrot.slane %v698_v14, 5  ;;  %v709_v30 = vshrl.u32 %v1598_v15, 16  ;;  %v1641_v63 = vld [vmem:[%s1880_s22 + $0x34] sm:$0x1] }
  0x3e   : > { %v706_v27 = vrot.slane %v704_v19, 5  ;;  %v712_v31 = vshll.u32 %v1598_v15, 16  ;;  %v687_v34 = vor.u32 %v686_v21, %v683_v18  ;;  %v718_v36 = vshll.u32 %v1599_v20, 16  ;;  %v1643_v8 = vld [vmem:[%s1880_s22 + $0x3c] sm:$0x1] }
  0x3f   : > { %503 = vrot.lane.b32.xlu1 %v1560_v56, %s1825_s26  ;;  %999 = vrot.lane.b32.xlu0 %v1647_v4, %s1829_s8  ;;  %v486_v26 = vsel %vm1903_vm2, %v481_v17, %v485_v1  ;;  %v701_v35 = vor.u32 %v700_v24, %v697_v23  ;;  %v711_v38 = vrot.slane %v709_v30, 4  ;;  %v723_v40 = vshrl.u32 %v1600_v25, 16  ;;  %v1638_v56 = vld [vmem:[%s1880_s22 + $0x28] sm:$0xf]  ;;  %v1644_v13 = vld [vmem:[%s1880_s22 + $0x40] sm:$0xf] }
  0x40   : > { %v1561_v32 = vcombine.low %v472_v16, %v486_v26  ;;  %v714_v39 = vrot.slane %v712_v31, 5  ;;  %v726_v41 = vshll.u32 %v1600_v25, 16  ;;  %v688_v42 = vrot.slane %v687_v34, 4  ;;  %v1789_v14 = vld [vmem:[%s1880_s22 + $0x70] ss:$8 sps:$4 sm:$0xff]  }
  0x41   : > { %v702_v43 = vrot.slane %v701_v35, 4  ;;  %v732_v44 = vshll.u32 %v1601_v28, 16  ;;  %v720_v46 = vrot.slane %v718_v36, 5  ;;  %v725_v47 = vrot.slane %v723_v40, 4  ;;  %v1645_v17 = vld [vmem:[%s1880_s22 + $0x44] sm:$0x1] }
  0x42   : > { %v715_v45 = vor.u32 %v714_v39, %v711_v38  ;;  %v728_v48 = vrot.slane %v726_v41, 5  ;;  %v693_v49 = vsel %vm1903_vm2, %v688_v42, %v692_v22  ;;  %v930_v62 = vshrl.u32 %v1638_v56, 16  ;;  %v1788_v20 = vld [vmem:[%s1880_s22 + $0x38] ss:$8 sps:$4 sm:$0xff]  }
  0x43   : > { %549 = vrot.lane.b32.xlu0 %v1783_v7, %s1823_s24  ;;  %505 = vrot.lane.b32.xlu1 %v1561_v32, %s1825_s26  ;;  %v707_v50 = vsel %vm1903_vm2, %v702_v43, %v706_v27  ;;  %v734_v54 = vrot.slane %v732_v44, 5  ;;  %v933_v0 = vshll.u32 %v1638_v56, 16  ;;  %v939_v1 = vshll.u32 %v1639_v60, 16  ;;  %v1642_v7 = vld [vmem:[%s1880_s22 + $0x38] sm:$0xf] }
  0x44   : > { %v1604_v51 = vcombine.low %v693_v49, %v707_v50  ;;  %v716_v52 = vrot.slane %v715_v45, 4  ;;  %v729_v53 = vor.u32 %v728_v48, %v725_v47  ;;  %v944_v2 = vshrl.u32 %v1640_v61, 16  ;;  %v1791_v34 = vld [vmem:[%s1880_s22] ss:$8 sps:$4 sm:$0xff]   ;;  %v1792_v41 = vld [vmem:[%s1880_s22 + $0x10] ss:$8 sps:$4 sm:$0xff]  }
  0x45   : > { %v947_v3 = vshll.u32 %v1640_v61, 16  ;;  %v932_v5 = vrot.slane %v930_v62, 4  ;;  %v953_v6 = vshll.u32 %v1641_v63, 16  ;;  %v935_v10 = vrot.slane %v933_v0, 5  ;;  %v1790_v38 = vld [vmem:[%s1880_s22 + $0x80] ss:$8 sps:$4 sm:$0xff]  }
  0x46   : > { %v721_v57 = vsel %vm1903_vm2, %v716_v52, %v720_v46  ;;  %v730_v58 = vrot.slane %v729_v53, 4  ;;  %v941_v11 = vrot.slane %v939_v1, 5  ;;  %v946_v12 = vrot.slane %v944_v2, 4  ;;  %306 = vst.msk [vmem:[#allocation3] sm:$0xff] %vm305_vm3, %v1791_v34  ;;  %v1793_v44 = vld [vmem:[%s1880_s22 + $0x20] ss:$8 sps:$4 sm:$0xff]  }
  0x47   : > { %595 = vrot.lane.b32.xlu0 %v1785_v37, %s1824_s25  ;;  %551 = vrot.lane.b32.xlu1 %v1784_v33, %s1823_s24  ;;  %v949_v15 = vrot.slane %v947_v3, 5  ;;  %v955_v16 = vrot.slane %v953_v6, 5  ;;  %v958_v18 = vshrl.u32 %v1642_v7, 16  ;;  %v961_v19 = vshll.u32 %v1642_v7, 16  ;;  %307 = vst.msk [vmem:[#allocation3 + $0x8] sm:$0xff] %vm305_vm3, %v1792_v41  ;;  %308 = vst.msk [vmem:[#allocation3 + $0x10] sm:$0xff] %vm305_vm3, %v1793_v44 }
  0x48   : > { %v735_v4 = vsel %vm1903_vm2, %v730_v58, %v734_v54  ;;  %v936_v21 = vor.u32 %v935_v10, %v932_v5  ;;  %v967_v22 = vshll.u32 %v1643_v8, 16  ;;  %v972_v23 = vshrl.u32 %v1644_v13, 16  ;;  %v1794_v47 = vld [vmem:[%s1880_s22 + $0x30] ss:$8 sps:$4 sm:$0xff]   ;;  %s264_s22 = scalar_lea.vmem %s2214_s3, %s1540_s19 }
  0x49   : > { %v1605_v9 = vcombine.low %v721_v57, %v735_v4  ;;  %v975_v24 = vshll.u32 %v1644_v13, 16  ;;  %v950_v25 = vor.u32 %v949_v15, %v946_v12  ;;  %v960_v26 = vrot.slane %v958_v18, 4  ;;  %v1797_v49 = vld [vmem:[%s2212_s1 + $0x10] ss:$0 sps:$4 sm:$0x33]   ;;  %309 = vst.msk [vmem:[#allocation3 + $0x18] sm:$0xff] %vm305_vm3, %v1794_v47  ;;  %vm2124_vm3 = vmand %vm1275_vm0, %vm1276_vm1 }
  0x4a   : > { %v963_v27 = vrot.slane %v961_v19, 5  ;;  %v981_v28 = vshll.u32 %v1645_v17, 16  ;;  %v937_v30 = vrot.slane %v936_v21, 4  ;;  %v969_v31 = vrot.slane %v967_v22, 5  ;;  %1734 = vmatprep.subr.msk.bf16.mxu0 %vm1051_vm4, %v1797_v49  ;;  %1735 = vmatprep.subr.msk.bf16.mxu1 %vm1051_vm4, %v1797_v49 }
  0x4b   : > { %752 = vrot.lane.b32.xlu0 %v1604_v51, %s1826_s27  ;;  %597 = vrot.lane.b32.xlu1 %v1786_v55, %s1824_s25  ;;  %v974_v32 = vrot.slane %v972_v23, 4  ;;  %v977_v33 = vrot.slane %v975_v24, 5  ;;  %v951_v35 = vrot.slane %v950_v25, 4  ;;  %v1053_v51 = vsel %vm1051_vm4, %v1797_v49, 0  ;;  %s271_s25 = scalar_lea.vmem %s2215_s4, %s1540_s19 }
  0x4c   : > { %v964_v36 = vor.u32 %v963_v27, %v960_v26  ;;  %v983_v37 = vrot.slane %v981_v28, 5  ;;  %v942_v39 = vsel %vm1903_vm2, %v937_v30, %v941_v11  ;;  %1719 = vmatpush3.bf16.msra.mxu0 %v1053_v51  ;;  %1733 = vmatpush3.bf16.msra.mxu1 %v1053_v51  ;;  %v1830_v24 = vmov 0  }
  0x4d   : > { %v978_v40 = vor.u32 %v977_v33, %v974_v32  ;;  %v956_v42 = vsel %vm1903_vm2, %v951_v35, %v955_v16  ;;  %1134 = vst [vmem:[%s2093_s14 + $0x18] sm:$0xf] %v1830_v24  ;;  %1135 = vst [vmem:[%s2093_s14 + $0x1c] sm:$0x1] %v1830_v24 }
  0x4e   : > { %v965_v43 = vrot.slane %v964_v36, 4  ;;  %v1648_v45 = vcombine.low %v942_v39, %v956_v42  ;;  %1128 = vst [vmem:[%s2093_s14] sm:$0xf] %v1830_v24  ;;  %1129 = vst [vmem:[%s2093_s14 + $0x4] sm:$0x1] %v1830_v24 }
  0x4f   : > { %798 = vrot.lane.b32.xlu0 %v1787_v59, %s1827_s28  ;;  %754 = vrot.lane.b32.xlu1 %v1605_v9, %s1826_s27  ;;  %v979_v46 = vrot.slane %v978_v40, 4  ;;  %1130 = vst [vmem:[%s2093_s14 + $0x8] sm:$0xf] %v1830_v24  ;;  %1131 = vst [vmem:[%s2093_s14 + $0xc] sm:$0x1] %v1830_v24 }
  0x50   : > { %v970_v48 = vsel %vm1903_vm2, %v965_v43, %v969_v31  ;;  %1132 = vst [vmem:[%s2093_s14 + $0x10] sm:$0xf] %v1830_v24  ;;  %1133 = vst [vmem:[%s2093_s14 + $0x14] sm:$0x1] %v1830_v24 }
  0x51   : > { %v984_v50 = vsel %vm1903_vm2, %v979_v46, %v983_v37  ;;  %1136 = vst [vmem:[%s2093_s14 + $0x20] sm:$0xf] %v1830_v24  ;;  %1137 = vst [vmem:[%s2093_s14 + $0x24] sm:$0x1] %v1830_v24 }
  0x52   : > { %v1649_v52 = vcombine.low %v970_v48, %v984_v50  ;;  %1138 = vst [vmem:[%s2093_s14 + $0x28] sm:$0xf] %v1830_v24  ;;  %1139 = vst [vmem:[%s2093_s14 + $0x2c] sm:$0x1] %v1830_v24 }
  0x53   : > { %844 = vrot.lane.b32.xlu0 %v1789_v14, %s1828_s5  ;;  %800 = vrot.lane.b32.xlu1 %v1788_v20, %s1827_s28  ;;  %1140 = vst [vmem:[%s2093_s14 + $0x30] sm:$0xf] %v1830_v24  ;;  %1141 = vst [vmem:[%s2093_s14 + $0x34] sm:$0x1] %v1830_v24 }
  0x54   : > { %1142 = vst [vmem:[%s2093_s14 + $0x38] sm:$0xf] %v1830_v24  ;;  %1143 = vst [vmem:[%s2093_s14 + $0x3c] sm:$0x1] %v1830_v24  ;;  %v1673_v43 = vld [vmem:[%s2093_s14 + $0x18] sm:$0xf] }
  0x55   : > { %1144 = vst [vmem:[%s2093_s14 + $0x40] sm:$0xf] %v1830_v24  ;;  %1145 = vst [vmem:[%s2093_s14 + $0x44] sm:$0x1] %v1830_v24  ;;  %v1675_v48 = vld [vmem:[%s2093_s14 + $0x1c] sm:$0x1] }
  0x56   : > { %1146 = vst [vmem:[%s2093_s14 + $0x48] sm:$0xf] %v1830_v24  ;;  %1147 = vst [vmem:[%s2093_s14 + $0x4c] sm:$0x1] %v1830_v24 }
  0x57   : > { %1001 = vrot.lane.b32.xlu0 %v1648_v45, %s1829_s8  ;;  %846 = vrot.lane.b32.xlu1 %v1790_v38, %s1828_s5  ;;  %vm2117_vm2 = vmand %vm1269_vm14, %vm1270_vm15 }
  0x5b   : > { %1003 = vrot.lane.b32.xlu1 %v1649_v52, %s1829_s8 }
  0x85   : > { %v340_v53 = vpop.permute.xlu0 %339 }
  0x86   : > { %352 = vst.msk [vmem:[#allocation3] sm:$0xff] %vm351_vm5, %v340_v53  ;;  %v548_v29 = vpop.permute.xlu1 %547 }
  0x89   : > { %v342_v54 = vpop.permute.xlu0 %341 }
  0x8a   : > { %353 = vst.msk [vmem:[#allocation3 + $0x8] sm:$0xff] %vm351_vm5, %v342_v54  ;;  %v594_v55 = vpop.permute.xlu1 %593  ;;  %v1665_v54 = vld [vmem:[%s2093_s14 + $0x8] sm:$0xf] }
  0x8d   : > { %v546_v56 = vpop.permute.xlu0 %545 }
  0x91   : > { %v592_v58 = vpop.permute.xlu0 %591 }
  0x93   : > { %v500_v57 = vpop.permute.xlu1 %499 }
  0x94   : > { %512 = vst.msk [vmem:[#allocation3] sm:$0xff] %vm511_vm6, %v500_v57 }
  0x95   : > { %558 = vst.msk [vmem:[#allocation3] sm:$0xff] %vm557_vm7, %v546_v56 }
  0x96   : > { %604 = vst.msk [vmem:[#allocation3] sm:$0xff] %vm603_vm8, %v592_v58 }
  0x97   : > { %v502_v59 = vpop.permute.xlu1 %501 }
  0x98   : > { %513 = vst.msk [vmem:[#allocation3 + $0x8] sm:$0xff] %vm511_vm6, %v502_v59 }
  0x99   : > { %559 = vst.msk [vmem:[#allocation3 + $0x8] sm:$0xff] %vm557_vm7, %v548_v29 }
  0x9a   : > { %605 = vst.msk [vmem:[#allocation3 + $0x8] sm:$0xff] %vm603_vm8, %v594_v55  ;;  %v1667_v55 = vld [vmem:[%s2093_s14 + $0xc] sm:$0x1] }
  0x9d   : > { %v749_v60 = vpop.permute.xlu0 %748 }
  0x9e   : > { %761 = vst.msk [vmem:[#allocation3] sm:$0xff] %vm760_vm9, %v749_v60  ;;  %v1677_v60 = vld [vmem:[%s2093_s14 + $0x20] sm:$0xf] }
  0xa1   : > { %v795_v61 = vpop.permute.xlu0 %794  ;;  %v751_v62 = vpop.permute.xlu1 %750 }
  0xa2   : > { %807 = vst.msk [vmem:[#allocation3] sm:$0xff] %vm806_vm10, %v795_v61  ;;  %v1679_v61 = vld [vmem:[%s2093_s14 + $0x24] sm:$0x1] }
  0xa3   : > { %762 = vst.msk [vmem:[#allocation3 + $0x8] sm:$0xff] %vm760_vm9, %v751_v62 }
  0xa5   : > { %v841_v63 = vpop.permute.xlu0 %840  ;;  %v797_v0 = vpop.permute.xlu1 %796 }
  0xa6   : > { %853 = vst.msk [vmem:[#allocation3] sm:$0xff] %vm852_vm11, %v841_v63 }
  0xa7   : > { %808 = vst.msk [vmem:[#allocation3 + $0x8] sm:$0xff] %vm806_vm10, %v797_v0 }
  0xa9   : > { %v843_v1 = vpop.permute.xlu0 %842  ;;  %v344_v2 = vpop.permute.xlu1 %343 }
  0xaa   : > { %854 = vst.msk [vmem:[#allocation3 + $0x8] sm:$0xff] %vm852_vm11, %v843_v1 }
  0xab   : > { %354 = vst.msk [vmem:[#allocation3 + $0x10] sm:$0xff] %vm351_vm5, %v344_v2 }
  0xad   : > { %v346_v3 = vpop.permute.xlu0 %345  ;;  %v998_v4 = vpop.permute.xlu1 %997 }
  0xae   : > { %355 = vst.msk [vmem:[#allocation3 + $0x18] sm:$0xff] %vm351_vm5, %v346_v3 }
  0xaf   : > { %1010 = vst.msk [vmem:[#allocation3] sm:$0xff] %vm1009_vm12, %v998_v4  ;;  %v1669_v4 = vld [vmem:[%s2093_s14 + $0x10] sm:$0xf] }
  0xb1   : > { %v504_v5 = vpop.permute.xlu1 %503  ;;  %v1000_v6 = vpop.permute.xlu0 %999 }
  0xb2   : > { %514 = vst.msk [vmem:[#allocation3 + $0x10] sm:$0xff] %vm511_vm6, %v504_v5  ;;  %v1671_v5 = vld [vmem:[%s2093_s14 + $0x14] sm:$0x1] }
  0xb3   : > { %1011 = vst.msk [vmem:[#allocation3 + $0x8] sm:$0xff] %vm1009_vm12, %v1000_v6 }
  0xb5   : > { %v550_v8 = vpop.permute.xlu0 %549  ;;  %v506_v9 = vpop.permute.xlu1 %505 }
  0xb6   : > { %v1014_v7 = vld [vmem:[#allocation3] sm:$0xff]  ;;  %560 = vst.msk [vmem:[#allocation3 + $0x10] sm:$0xff] %vm557_vm7, %v550_v8 }
  0xb7   : > { %1720 = vmatprep.mubr.msk.bf16.mxu0 %vm1038_vm13, %v1014_v7  ;;  %515 = vst.msk [vmem:[#allocation3 + $0x18] sm:$0xff] %vm511_vm6, %v506_v9 }
  0xb9   : > { %v596_v10 = vpop.permute.xlu0 %595  ;;  %v552_v12 = vpop.permute.xlu1 %551 }
  0xba   : > { %v1015_v11 = vld [vmem:[#allocation3 + $0x8] sm:$0xff]  ;;  %606 = vst.msk [vmem:[#allocation3 + $0x10] sm:$0xff] %vm603_vm8, %v596_v10 }
  0xbb   : > { %1721 = vmatmul.mubr.msk.bf16.vlgmr.msra.gmra.mrb[0].mxu0 %vm1038_vm13, %v1015_v11  ;;  %561 = vst.msk [vmem:[#allocation3 + $0x18] sm:$0xff] %vm557_vm7, %v552_v12 }
  0xbd   : > { %v753_v13 = vpop.permute.xlu0 %752  ;;  %v598_v14 = vpop.permute.xlu1 %597 }
  0xbe   : > { %763 = vst.msk [vmem:[#allocation3 + $0x10] sm:$0xff] %vm760_vm9, %v753_v13 }
  0xbf   : > { %607 = vst.msk [vmem:[#allocation3 + $0x18] sm:$0xff] %vm603_vm8, %v598_v14 }
  0xc1   : > { %v799_v15 = vpop.permute.xlu0 %798  ;;  %v755_v16 = vpop.permute.xlu1 %754 }
  0xc2   : > { %809 = vst.msk [vmem:[#allocation3 + $0x10] sm:$0xff] %vm806_vm10, %v799_v15 }
  0xc3   : > { %764 = vst.msk [vmem:[#allocation3 + $0x18] sm:$0xff] %vm760_vm9, %v755_v16 }
  0xc5   : > { %v845_v17 = vpop.permute.xlu0 %844  ;;  %v801_v18 = vpop.permute.xlu1 %800 }
  0xc6   : > { %855 = vst.msk [vmem:[#allocation3 + $0x10] sm:$0xff] %vm852_vm11, %v845_v17 }
  0xc7   : > { %810 = vst.msk [vmem:[#allocation3 + $0x18] sm:$0xff] %vm806_vm10, %v801_v18 }
  0xc9   : > { %v1002_v19 = vpop.permute.xlu0 %1001  ;;  %v847_v20 = vpop.permute.xlu1 %846 }
  0xca   : > { %1012 = vst.msk [vmem:[#allocation3 + $0x10] sm:$0xff] %vm1009_vm12, %v1002_v19 }
  0xcb   : > { %856 = vst.msk [vmem:[#allocation3 + $0x18] sm:$0xff] %vm852_vm11, %v847_v20 }
  0xcd   : > { %v1004_v21 = vpop.permute.xlu1 %1003 }
  0xce   : > { %1013 = vst.msk [vmem:[#allocation3 + $0x18] sm:$0xff] %vm1009_vm12, %v1004_v21 }
  0xd1   : > { %v1016_v22 = vld [vmem:[#allocation3 + $0x10] sm:$0xff] }
  0xd2   : > { %1724 = vmatprep.mubr.msk.bf16.mxu1 %vm1038_vm13, %v1016_v22 }
  0xd5   : > { %v1017_v23 = vld [vmem:[#allocation3 + $0x18] sm:$0xff] }
  0xd6   : > { %1725 = vmatmul.mubr.msk.bf16.vlgmr.msra.gmra.mrb[0].mxu1 %vm1038_vm13, %v1017_v23 }
 0x18e   : > { %v1722_v25 = vpop.f32.mrb[0].mxu0 }
 0x18f   : > { %v1701_v26 = vpack.c.bf16 %v1722_v25, %v1722_v25  ;;  %v1089_v27 = vpop.f32.mrb[1].mxu0  ;;  %v1333_v28 = vmul.f32 %v1722_v25, %v1722_v25 }
 0x190   : > { %v1699_v30 = vpack.c.bf16 %v1089_v27, %v1089_v27  ;;  %v1723_v31 = vpop.f32.mrb[2].mxu0  ;;  %v1325_v34 = vmul.f32 %v1089_v27, %v1089_v27 }
 0x191   : > { %v1205_v32 = vshrl.u32 %v1701_v26, 16  ;;  %v1208_v33 = vshll.u32 %v1701_v26, 16  ;;  %v1702_v35 = vpack.c.bf16 %v1723_v31, %v1723_v31  ;;  %v1092_v36 = vpop.f32.mrb[3].mxu0  ;;  %v1337_v12 = vmul.f32 %v1723_v31, %v1723_v31 }
 0x192   : > { %v1189_v37 = vshrl.u32 %v1699_v30, 16  ;;  %v1192_v38 = vshll.u32 %v1699_v30, 16  ;;  %v1700_v39 = vpack.c.bf16 %v1092_v36, %v1092_v36  ;;  %v1328_v40 = vadd.f32 %v1092_v36, %v1089_v27 }
 0x193   : > { %v1207_v41 = vrot.slane %v1205_v32, 7  ;;  %v1213_v44 = vshrl.u32 %v1702_v35, 16  ;;  %v1216_v45 = vshll.u32 %v1702_v35, 16  ;;  %v1329_v46 = vmul.f32 %v1092_v36, %v1092_v36  ;;  %v1689_v36 = vld [vmem:[%s2093_s14 + $0x38] sm:$0xf] }
 0x194   : > { %v1191_v49 = vrot.slane %v1189_v37, 7  ;;  %v1197_v50 = vshrl.u32 %v1700_v39, 16  ;;  %v1200_v51 = vshll.u32 %v1700_v39, 16  ;;  %v1332_v52 = vadd.f32 %v1722_v25, %v1328_v40  ;;  %v1691_v40 = vld [vmem:[%s2093_s14 + $0x3c] sm:$0x1] }
 0x195   : > { %v1210_v53 = vor.u32 %v1208_v33, %v1207_v41  ;;  %v1211_v29 = vrot.slane %v1207_v41, 4  ;;  %v1215_v56 = vrot.slane %v1213_v44, 7  ;;  %v1330_v57 = vadd.f32 %v1329_v46, %v1325_v34 }
 0x196   : > { %v1194_v58 = vor.u32 %v1192_v38, %v1191_v49  ;;  %v1195_v59 = vrot.slane %v1191_v49, 4  ;;  %v1199_v62 = vrot.slane %v1197_v50, 7  ;;  %v1336_v63 = vadd.f32 %v1723_v31, %v1332_v52  ;;  %v1681_v49 = vld [vmem:[%s2093_s14 + $0x28] sm:$0xf]  ;;  %v1683_v50 = vld [vmem:[%s2093_s14 + $0x2c] sm:$0x1] }
 0x197   : > { %v1288_v0 = vsel %vm2117_vm2, %v1210_v53, %v1673_v43  ;;  %v1291_v1 = vsel %vm2124_vm3, %v1211_v29, %v1675_v48  ;;  %v1218_v2 = vor.u32 %v1216_v45, %v1215_v56  ;;  %v1219_v3 = vrot.slane %v1215_v56, 4 }
 0x198   : > { %1674 = vst [vmem:[%s2093_s14 + $0x18] sm:$0xf] %v1288_v0  ;;  %1676 = vst [vmem:[%s2093_s14 + $0x1c] sm:$0x1] %v1291_v1  ;;  %v1273_v6 = vsel %vm2117_vm2, %v1194_v58, %v1665_v54  ;;  %v1279_v7 = vsel %vm2124_vm3, %v1195_v59, %v1667_v55  ;;  %v1202_v8 = vor.u32 %v1200_v51, %v1199_v62  ;;  %v1203_v9 = vrot.slane %v1199_v62, 4 }
 0x199   : > { %1666 = vst [vmem:[%s2093_s14 + $0x8] sm:$0xf] %v1273_v6  ;;  %1668 = vst [vmem:[%s2093_s14 + $0xc] sm:$0x1] %v1279_v7  ;;  %v1294_v10 = vsel %vm2117_vm2, %v1218_v2, %v1677_v60  ;;  %v1297_v11 = vsel %vm2124_vm3, %v1219_v3, %v1679_v61  ;;  %v1334_v13 = vadd.f32 %v1333_v28, %v1330_v57  ;;  %v1693_v54 = vld [vmem:[%s2093_s14 + $0x40] sm:$0xf] }
 0x19a   : > { %1678 = vst [vmem:[%s2093_s14 + $0x20] sm:$0xf] %v1294_v10  ;;  %1680 = vst [vmem:[%s2093_s14 + $0x24] sm:$0x1] %v1297_v11  ;;  %v1282_v14 = vsel %vm2117_vm2, %v1202_v8, %v1669_v4  ;;  %v1285_v15 = vsel %vm2124_vm3, %v1203_v9, %v1671_v5  ;;  %v1695_v55 = vld [vmem:[%s2093_s14 + $0x44] sm:$0x1] }
 0x19b   : > { %1670 = vst [vmem:[%s2093_s14 + $0x10] sm:$0xf] %v1282_v14  ;;  %1672 = vst [vmem:[%s2093_s14 + $0x14] sm:$0x1] %v1285_v15  ;;  %v1338_v16 = vadd.f32 %v1337_v12, %v1334_v13  ;;  %v1685_v62 = vld [vmem:[%s2093_s14 + $0x30] sm:$0xf] }
 0x1a9   : > { %v1726_v17 = vpop.f32.mrb[0].mxu1 }
 0x1aa   : > { %v1705_v18 = vpack.c.bf16 %v1726_v17, %v1726_v17  ;;  %v1105_v19 = vpop.f32.mrb[1].mxu1  ;;  %v1349_v20 = vmul.f32 %v1726_v17, %v1726_v17 }
 0x1ab   : > { %v1703_v21 = vpack.c.bf16 %v1105_v19, %v1105_v19  ;;  %v1340_v22 = vadd.f32 %v1336_v63, %v1105_v19  ;;  %v1341_v23 = vmul.f32 %v1105_v19, %v1105_v19  ;;  %v1727_v24 = vpop.f32.mrb[2].mxu1  ;;  %v1687_v63 = vld [vmem:[%s2093_s14 + $0x34] sm:$0x1] }
 0x1ac   : > { %v1237_v25 = vshrl.u32 %v1705_v18, 16  ;;  %v1240_v26 = vshll.u32 %v1705_v18, 16  ;;  %v1706_v27 = vpack.c.bf16 %v1727_v24, %v1727_v24  ;;  %v1353_v28 = vmul.f32 %v1727_v24, %v1727_v24  ;;  %v1108_v30 = vpop.f32.mrb[3].mxu1 }
 0x1ad   : > { %v1221_v31 = vshrl.u32 %v1703_v21, 16  ;;  %v1224_v32 = vshll.u32 %v1703_v21, 16  ;;  %v1342_v33 = vadd.f32 %v1341_v23, %v1338_v16  ;;  %v1704_v34 = vpack.c.bf16 %v1108_v30, %v1108_v30 }
 0x1ae   : > { %v1239_v35 = vrot.slane %v1237_v25, 7  ;;  %v1245_v37 = vshrl.u32 %v1706_v27, 16  ;;  %v1248_v38 = vshll.u32 %v1706_v27, 16  ;;  %v1344_v39 = vadd.f32 %v1340_v22, %v1108_v30 }
 0x1af   : > { %v1223_v41 = vrot.slane %v1221_v31, 7  ;;  %v1229_v43 = vshrl.u32 %v1704_v34, 16  ;;  %v1232_v44 = vshll.u32 %v1704_v34, 16  ;;  %v1345_v45 = vmul.f32 %v1108_v30, %v1108_v30 }
 0x1b0   : > { %v1242_v46 = vor.u32 %v1240_v26, %v1239_v35  ;;  %v1243_v48 = vrot.slane %v1239_v35, 4  ;;  %v1247_v51 = vrot.slane %v1245_v37, 7  ;;  %v1348_v52 = vadd.f32 %v1726_v17, %v1344_v39 }
 0x1b1   : > { %v1226_v53 = vor.u32 %v1224_v32, %v1223_v41  ;;  %v1227_v29 = vrot.slane %v1223_v41, 4  ;;  %v1231_v56 = vrot.slane %v1229_v43, 7  ;;  %v1346_v57 = vadd.f32 %v1345_v45, %v1342_v33 }
 0x1b2   : > { %v1312_v58 = vsel %vm2117_vm2, %v1242_v46, %v1689_v36  ;;  %v1315_v59 = vsel %vm2124_vm3, %v1243_v48, %v1691_v40  ;;  %v1250_v60 = vor.u32 %v1248_v38, %v1247_v51  ;;  %v1251_v61 = vrot.slane %v1247_v51, 4 }
 0x1b3   : > { %1690 = vst [vmem:[%s2093_s14 + $0x38] sm:$0xf] %v1312_v58  ;;  %1692 = vst [vmem:[%s2093_s14 + $0x3c] sm:$0x1] %v1315_v59  ;;  %v1300_v0 = vsel %vm2117_vm2, %v1226_v53, %v1681_v49  ;;  %v1303_v1 = vsel %vm2124_vm3, %v1227_v29, %v1683_v50  ;;  %v1234_v2 = vor.u32 %v1232_v44, %v1231_v56  ;;  %v1235_v3 = vrot.slane %v1231_v56, 4 }
 0x1b4   : > { %1682 = vst [vmem:[%s2093_s14 + $0x28] sm:$0xf] %v1300_v0  ;;  %1684 = vst [vmem:[%s2093_s14 + $0x2c] sm:$0x1] %v1303_v1  ;;  %v1318_v4 = vsel %vm2117_vm2, %v1250_v60, %v1693_v54  ;;  %v1321_v5 = vsel %vm2124_vm3, %v1251_v61, %v1695_v55  ;;  %v1350_v6 = vadd.f32 %v1349_v20, %v1346_v57 }
 0x1b5   : > { %v1352_v7 = vadd.f32 %v1727_v24, %v1348_v52  ;;  %1694 = vst [vmem:[%s2093_s14 + $0x40] sm:$0xf] %v1318_v4  ;;  %1696 = vst [vmem:[%s2093_s14 + $0x44] sm:$0x1] %v1321_v5  ;;  %v1306_v8 = vsel %vm2117_vm2, %v1234_v2, %v1685_v62  ;;  %v1309_v9 = vsel %vm2124_vm3, %v1235_v3, %v1687_v63 }
 0x1b6   : > { %1686 = vst [vmem:[%s2093_s14 + $0x30] sm:$0xf] %v1306_v8  ;;  %1688 = vst [vmem:[%s2093_s14 + $0x34] sm:$0x1] %v1309_v9  ;;  %v1354_v10 = vadd.f32 %v1353_v28, %v1350_v6 }
 0x1b7   : > { %1355 = vst [vmem:[%s264_s22] sm:$0xff] %v1352_v7 }
 0x1b8   : > { %1356 = vst [vmem:[%s271_s25] sm:$0xff] %v1354_v10 }
 0x1b9 PF: > { %s15_s17 = sadd.s32 1, %s1820_s17   ;;  %s2222_s15 = smov %s1816_s16 }
 0x1ba   : > { %p12_p5 = scmp.ge.s32.totalorder %s15_s17, 4   ;;  %s2223_s16 = smov %s2225_s18 }
 0x1bc   :  { %14 = sbr.rel (!%p12_p5) target bundleno = 2 (0x2), region = 91 }

// kernel: residual_block_forward.5
= control target key start
LH: loop header
LB: loop body
LE: loop exit
PB: predicated region body
PF: predicated region fallthrough
CT: control target
= control target key end

     0   :  { %s3236_s21 = smov 0   ;;  %s3238_s22 = smov 0   ;;  %s3792_s0 = inlined_call_operand.vmem [shape: bf16[2,1,10,10,128], index: 0, kind: input, shape index: {}]   ;;  %s3793_s1 = inlined_call_operand.vmem [shape: bf16[1152,128], index: 1, kind: input, shape index: {}]   ;;  %s3794_s2 = inlined_call_operand.vmem [shape: f32[1,128], index: 2, kind: input, shape index: {}]   ;;  %s3795_s3 = inlined_call_operand.vmem [shape: f32[1,128], index: 3, kind: input, shape index: {}]   ;;  %s3796_s4 = inlined_call_operand.vmem [shape: bf16[2,64,128], index: 4, kind: output, shape index: {0}]   ;;  %s3797_s5 = inlined_call_operand.vmem [shape: f32[2,8,128], index: 5, kind: output, shape index: {1}]   ;;  %s3798_s6 = inlined_call_operand.vmem [shape: f32[2,8,128], index: 6, kind: output, shape index: {2}]  }
   0x1   :  { %s3240_s23 = smov 0  }
   0x2 LB: > { %s26_s24 = sadd.s32 1, %s3194_s22  ;;  %p2630_p0 = scmp.ge.s32.totalorder %s3198_s23, 1  ;;  %s3198_s23 = sphi %s3240_s23, %s17_s23   ;;  %s3194_s22 = sphi %s3238_s22, %s3808_s22   ;;  %s3190_s21 = sphi %s3236_s21, %s3807_s21  }
   0x3   : > { %p27_p1 = scmp.ge.s32.totalorder %s26_s24, 2  ;;  %p244_p2 = scmp.lt.s32.totalorder %s3198_s23, 3 }
   0x5   : > { %s3810_s24 = smov (%p27_p1, %s26_s24), 0  ;;  %p245_p3 = pnand %p2630_p0, %p244_p2 }
   0x6   : > { %v3090_v0 = vld [vmem:[%s3793_s1 + $0xc0] sm:$0xff] (!%p245_p3)   ;;  %v3092_v2 = vld [vmem:[%s3793_s1 + $0xc8] sm:$0xff] (!%p245_p3)   ;;  %v3096_v6 = vld [vmem:[%s3793_s1 + $0xd0] sm:$0xff] (!%p245_p3)   ;;  %p295_p4 = scmp.lt.s32.totalorder (!%p245_p3), %s3190_s21, 1  ;;  %vm546_vm0 = vcmask (!%p245_p3), 1040384   ;;  %vm830_vm5 = vcmask (!%p245_p3), 1042432  }
   0x7   : > { %248 = sbr.rel (%p245_p3) target bundleno = 401 (0x191), region = 36  ;;  %v3091_v1 = vld [vmem:[%s3793_s1 + $0x80] sm:$0xff] (!%p245_p3)   ;;  %2892 = vmatprep.subr.bf16.mxu1 (!%p245_p3), %v3090_v0  ;;  %v3093_v3 = vld [vmem:[%s3793_s1 + $0x88] sm:$0xff] (!%p245_p3)   ;;  %v3097_v7 = vld [vmem:[%s3793_s1 + $0x90] sm:$0xff] (!%p245_p3)   ;;  %vm547_vm1 = vsmask.f32 (!%p245_p3), 256 }
   0x8   : > { %2893 = vmatpush3.bf16.msra.mxu1 (!%p245_p3), %v3091_v1  ;;  %v3094_v4 = vld [vmem:[%s3793_s1 + $0x40] sm:$0xff] (!%p245_p3)   ;;  %v3098_v8 = vld [vmem:[%s3793_s1 + $0x48] sm:$0xff] (!%p245_p3)   ;;  %v3100_v10 = vld [vmem:[%s3793_s1 + $0xd8] sm:$0xff] (!%p245_p3)   ;;  %vm579_vm2 = vsmask.f32 (!%p245_p3), 7938  ;;  %vm831_vm6 = vcmask (!%p245_p3), 1046532  }
   0x9   : > { %2894 = vmatprep.subr.bf16.mxu1 (!%p245_p3), %v3092_v2  ;;  %v3095_v5 = vld [vmem:[%s3793_s1] sm:$0xff] (!%p245_p3)   ;;  %2852 = vmatprep.subr.bf16.mxu0 (!%p245_p3), %v3094_v4  ;;  %v3099_v9 = vld [vmem:[%s3793_s1 + $0x8] sm:$0xff] (!%p245_p3)   ;;  %v3101_v11 = vld [vmem:[%s3793_s1 + $0x98] sm:$0xff] (!%p245_p3)   ;;  %vm663_vm7 = vsmask.f32 (!%p245_p3), 3328 }
   0xa   : > { %2853 = vmatpush3.bf16.msra.mxu0 (!%p245_p3), %v3095_v5  ;;  %v3102_v12 = vld [vmem:[%s3793_s1 + $0x50] sm:$0xff] (!%p245_p3)   ;;  %v3104_v14 = vld [vmem:[%s3793_s1 + $0xe0] sm:$0xff] (!%p245_p3)   ;;  %v3106_v16 = vld [vmem:[%s3793_s1 + $0x58] sm:$0xff] (!%p245_p3)   ;;  %vm664_vm8 = vsmask.f32 (!%p245_p3), 7440 }
   0xb   : > { %2854 = vmatprep.subr.bf16.mxu0 (!%p245_p3), %v3098_v8  ;;  %v3103_v13 = vld [vmem:[%s3793_s1 + $0x10] sm:$0xff] (!%p245_p3)   ;;  %v3105_v15 = vld [vmem:[%s3793_s1 + $0xa0] sm:$0xff] (!%p245_p3)   ;;  %v3107_v17 = vld [vmem:[%s3793_s1 + $0x18] sm:$0xff] (!%p245_p3)  }
   0xc   : > { %2895 = vmatpush3.bf16.msra.mxu1 (!%p245_p3), %v3093_v3  ;;  %v3108_v18 = vld [vmem:[%s3793_s1 + $0xe8] sm:$0xff] (!%p245_p3)   ;;  %v3110_v20 = vld [vmem:[%s3793_s1 + $0x60] sm:$0xff] (!%p245_p3)   ;;  %v3112_v22 = vld [vmem:[%s3793_s1 + $0xf0] sm:$0xff] (!%p245_p3)  }
   0xd   : > { %2896 = vmatprep.subr.bf16.mxu1 (!%p245_p3), %v3096_v6  ;;  %v3109_v19 = vld [vmem:[%s3793_s1 + $0xa8] sm:$0xff] (!%p245_p3)   ;;  %v3111_v21 = vld [vmem:[%s3793_s1 + $0x20] sm:$0xff] (!%p245_p3)   ;;  %v3113_v23 = vld [vmem:[%s3793_s1 + $0xb0] sm:$0xff] (!%p245_p3)  }
   0xe   : > { %2855 = vmatpush3.bf16.msra.mxu0 %v3099_v9  ;;  %s3812_s21 = smov (!%p295_p4, %s3190_s21), 1  ;;  %v3114_v24 = vld [vmem:[%s3793_s1 + $0x68] sm:$0xff]   ;;  %v3116_v26 = vld [vmem:[%s3793_s1 + $0xf8] sm:$0xff]   ;;  %v3118_v28 = vld [vmem:[%s3793_s1 + $0x70] sm:$0xff]   ;;  %v3200_v9 = vmov 0  }
   0xf   : > { %2856 = vmatprep.subr.bf16.mxu0 %v3102_v12  ;;  %s3064_s9 = smul.u32 80, %s3812_s21  ;;  %v3115_v25 = vld [vmem:[%s3793_s1 + $0x28] sm:$0xff]   ;;  %v3117_v27 = vld [vmem:[%s3793_s1 + $0xb8] sm:$0xff]   ;;  %v3119_v29 = vld [vmem:[%s3793_s1 + $0x30] sm:$0xff]   ;;  %s2800_s25 = sshll.u32 %s3812_s21, 5 }
  0x10   : > { %2897 = vmatpush3.bf16.msra.mxu1 %v3097_v7  ;;  %v3359_v30 = vld [vmem:[%s3794_s2] ss:$0 sm:$0xff]  ;;  %v3123_v52 = vld [vmem:[%s3793_s1 + $0x78] sm:$0xff]   ;;  %vm3403_vm3 = vmand %vm546_vm0, %vm547_vm1  ;;  %s311_s28 = scalar_lea.vmem %s3796_s4, %s2800_s25  ;;  %s2634_s29 = sshll.u32 %s3812_s21, 3 }
  0x11   : > { %2898 = vmatprep.subr.bf16.mxu1 %v3100_v10  ;;  %s3348_s20 = scalar_lea.vmem %s3792_s0, %s3064_s9  ;;  %v3366_v35 = vld [vmem:[%s3795_s3] ss:$0 sm:$0xff]  ;;  %v3124_v58 = vld [vmem:[%s3793_s1 + $0x38] sm:$0xff]   ;;  %vm3411_vm4 = vmand %vm546_vm0, %vm579_vm2  ;;  %s318_s8 = scalar_lea.vmem %s3797_s5, %s2634_s29 }
  0x12   : > { %2857 = vmatpush3.bf16.msra.mxu0 %v3103_v13  ;;  %v331_v31 = vld [vmem:[%s3348_s20 + $0x8] ss:$8 sps:$4 sm:$0xff]   ;;  %v329_v34 = vld [vmem:[%s3348_s20] ss:$24 sps:$4 sm:$0xff]   ;;  %v330_v36 = vld [vmem:[%s3348_s20 + $0x4] sm:$0x1]  ;;  %s325_s11 = scalar_lea.vmem %s3798_s6, %s2634_s29 }
  0x13   : > { %2858 = vmatprep.subr.bf16.mxu0 %v3106_v16  ;;  %v351_v32 = vunpack.c.l.bf16 %v331_v31  ;;  %v353_v33 = vunpack.c.h.bf16 %v331_v31  ;;  %v332_v37 = vld [vmem:[%s3348_s20 + $0xc] sm:$0x1]  ;;  %v349_v38 = vunpack.c.l.bf16 %v329_v34  ;;  %v355_v39 = vunpack.c.h.bf16 %v329_v34  ;;  %v3121_v45 = vld [vmem:[%s3793_s1 + $0x1c0] sm:$0xff]   ;;  %v334_v8 = vld [vmem:[%s3348_s20 + $0x14] sm:$0x1] }
  0x14   : > { %2899 = vmatpush3.bf16.msra.mxu1 %v3101_v11  ;;  %v350_v42 = vunpack.c.l.bf16 %v330_v36  ;;  %v352_v43 = vunpack.c.l.bf16 %v332_v37  ;;  %v3127_v1 = vld [vmem:[%s3793_s1 + $0x140] sm:$0xff]   ;;  %v336_v10 = vld [vmem:[%s3348_s20 + $0x1c] sm:$0x1]  ;;  %v354_v11 = vunpack.c.l.bf16 %v334_v8  ;;  %vm3433_vm9 = vmor %vm830_vm5, %vm831_vm6 }
  0x15   : > { %2900 = vmatprep.subr.bf16.mxu1 %v3104_v14  ;;  %v377_v40 = vmul.f32 %v3359_v30, %v351_v32  ;;  %v379_v41 = vmul.f32 %v3359_v30, %v353_v33  ;;  %v375_v44 = vmul.f32 %v3359_v30, %v349_v38  ;;  %v381_v46 = vmul.f32 %v3359_v30, %v355_v39  ;;  %v337_v5 = vld [vmem:[%s3348_s20 + $0x20] ss:$8 sps:$4 sm:$0xff]   ;;  %vm3459_vm10 = vmor %vm663_vm7, %vm664_vm8 }
  0x16   : > { %2859 = vmatpush3.bf16.msra.mxu0 %v3107_v17  ;;  %v376_v49 = vmul.f32 %v3359_v30, %v350_v42  ;;  %v378_v50 = vmul.f32 %v3359_v30, %v352_v43  ;;  %v357_v6 = vunpack.c.l.bf16 %v337_v5  ;;  %v359_v12 = vunpack.c.h.bf16 %v337_v5 }
  0x17   : > { %2860 = vmatprep.subr.bf16.mxu0 %v3110_v20  ;;  %v403_v47 = vadd.f32 %v3366_v35, %v377_v40  ;;  %v405_v48 = vadd.f32 %v3366_v35, %v379_v41  ;;  %v401_v51 = vadd.f32 %v3366_v35, %v375_v44  ;;  %v407_v53 = vadd.f32 %v3366_v35, %v381_v46  ;;  %v341_v46 = vld [vmem:[%s3348_s20 + $0x30] ss:$8 sps:$4 sm:$0xff]  }
  0x18   : > { %2901 = vmatpush3.bf16.msra.mxu1 %v3105_v15  ;;  %v402_v56 = vadd.f32 %v3366_v35, %v376_v49  ;;  %v404_v57 = vadd.f32 %v3366_v35, %v378_v50  ;;  %v383_v13 = vmul.f32 %v3359_v30, %v357_v6  ;;  %v356_v14 = vunpack.c.l.bf16 %v336_v10  ;;  %v338_v49 = vld [vmem:[%s3348_s20 + $0x24] sm:$0x1] }
  0x19   : > { %2902 = vmatprep.subr.bf16.mxu1 %v3108_v18  ;;  %v423_v54 = vmax.f32 %v403_v47, 0.0  ;;  %v425_v55 = vmax.f32 %v405_v48, 0.0  ;;  %v421_v59 = vmax.f32 %v401_v51, 0.0  ;;  %v427_v2 = vmax.f32 %v407_v53, 0.0 }
  0x1a   : > { %2861 = vmatpush3.bf16.msra.mxu0 %v3111_v21  ;;  %v422_v62 = vmax.f32 %v402_v56, 0.0  ;;  %v424_v63 = vmax.f32 %v404_v57, 0.0  ;;  %v380_v15 = vmul.f32 %v3359_v30, %v354_v11  ;;  %v409_v17 = vadd.f32 %v3366_v35, %v383_v13 }
  0x1b   : > { %2862 = vmatprep.subr.bf16.mxu0 %v3114_v24  ;;  %v2803_v60 = vpack.c.bf16 %v423_v54, %v423_v54  ;;  %v2805_v61 = vpack.c.bf16 %v425_v55, %v425_v55  ;;  %v2801_v0 = vpack.c.bf16 %v421_v59, %v421_v59  ;;  %v2807_v7 = vpack.c.bf16 %v427_v2, %v427_v2 }
  0x1c   : > { %2903 = vmatpush3.bf16.msra.mxu1 %v3109_v19  ;;  %v2802_v3 = vpack.c.bf16 %v422_v62, %v422_v62  ;;  %v2804_v4 = vpack.c.bf16 %v424_v63, %v424_v63  ;;  %v382_v18 = vmul.f32 %v3359_v30, %v356_v14  ;;  %v385_v19 = vmul.f32 %v3359_v30, %v359_v12 }
  0x1d   : > { %2904 = vmatprep.subr.bf16.mxu1 %v3112_v22  ;;  %523 = vst [vmem:[#allocation4 + $0x8] sm:$0xf] %v2803_v60  ;;  %525 = vst [vmem:[#allocation4 + $0x10] sm:$0xf] %v2805_v61  ;;  %v361_v48 = vunpack.c.l.bf16 %v341_v46  ;;  %v363_v61 = vunpack.c.h.bf16 %v341_v46 }
  0x1e   : > { %2863 = vmatpush3.bf16.msra.mxu0 %v3115_v25  ;;  %521 = vst [vmem:[#allocation4] sm:$0xf] %v2801_v0  ;;  %522 = vst [vmem:[#allocation4 + $0x4] sm:$0x1] %v2802_v3  ;;  %v408_v24 = vadd.f32 %v3366_v35, %v382_v18  ;;  %v411_v36 = vadd.f32 %v3366_v35, %v385_v19 }
  0x1f   : > { %2864 = vmatprep.subr.bf16.mxu0 %v3118_v28  ;;  %524 = vst [vmem:[#allocation4 + $0xc] sm:$0x1] %v2804_v4  ;;  %541 = vst [vmem:[#allocation4] sm:$0xf] %v3200_v9  ;;  %v387_v57 = vmul.f32 %v3359_v30, %v361_v48 }
  0x20   : > { %2905 = vmatpush3.bf16.msra.mxu1 %v3113_v23  ;;  %542 = vst [vmem:[#allocation4 + $0x4] sm:$0x1] %v3200_v9  ;;  %527 = vst [vmem:[#allocation4 + $0x18] sm:$0xf] %v2807_v7  ;;  %v406_v23 = vadd.f32 %v3366_v35, %v380_v15  ;;  %v428_v40 = vmax.f32 %v408_v24, 0.0  ;;  %v431_v47 = vmax.f32 %v411_v36, 0.0 }
  0x21   : > { %2906 = vmatprep.subr.bf16.mxu1 %v3116_v26  ;;  %v413_v2 = vadd.f32 %v3366_v35, %v387_v57  ;;  %v3122_v15 = vld [vmem:[%s3793_s1 + $0x180] sm:$0xff]  }
  0x22   : > { %2865 = vmatpush3.bf16.msra.mxu0 %v3119_v29  ;;  %v426_v39 = vmax.f32 %v406_v23, 0.0  ;;  %v2811_v51 = vpack.c.bf16 %v431_v47, %v431_v47  ;;  %v3125_v23 = vld [vmem:[%s3793_s1 + $0x1c8] sm:$0xff]  }
  0x23   : > { %2866 = vmatprep.subr.bf16.mxu0 %v3123_v52  ;;  %v358_v52 = vunpack.c.l.bf16 %v338_v49 }
  0x24   : > { %2907 = vmatpush3.bf16.msra.mxu1 %v3117_v27  ;;  %v552_v20 = vld [vmem:[#allocation4 + $0x8] sm:$0x1]  ;;  %v555_v21 = vld [vmem:[#allocation4 + $0x10] sm:$0x1]  ;;  %v429_v27 = vmax.f32 %v409_v17, 0.0  ;;  %v2806_v44 = vpack.c.bf16 %v426_v39, %v426_v39 }
  0x25   : > { %2972 = vmatprep.subr.bf16.mxu1 %v3121_v45  ;;  %v553_v25 = vsel %vm3403_vm3, 0, %v552_v20  ;;  %v556_v26 = vsel %vm3403_vm3, 0, %v555_v21  ;;  %v800_v41 = vld [vmem:[#allocation4 + $0x8] sm:$0xe]  ;;  %v2808_v45 = vpack.c.bf16 %v428_v40, %v428_v40  ;;  %531 = vst [vmem:[#allocation4 + $0x28] sm:$0xf] %v2811_v51  ;;  %v384_v3 = vmul.f32 %v3359_v30, %v358_v52 }
  0x26   : > { %2867 = vmatpush3.bf16.msra.mxu0 %v3124_v58  ;;  %554 = vst [vmem:[#allocation4 + $0x8] sm:$0x1] %v553_v25  ;;  %557 = vst [vmem:[#allocation4 + $0x10] sm:$0x1] %v556_v26  ;;  %v584_v28 = vld [vmem:[#allocation4 + $0xc] sm:$0x1]  ;;  %v2809_v34 = vpack.c.bf16 %v429_v27, %v429_v27 }
  0x27   : > { %2932 = vmatprep.subr.bf16.mxu0 %v3127_v1  ;;  %v549_v29 = vld [vmem:[#allocation4] sm:$0x1]  ;;  %v581_v31 = vld [vmem:[#allocation4 + $0x4] sm:$0x1]  ;;  %v585_v32 = vsel %vm3411_vm4, 0, %v584_v28  ;;  %v2667_v55 = vrot.slane %v800_v41, 9 }
  0x28   : > { %v550_v33 = vsel %vm3403_vm3, 0, %v549_v29  ;;  %v582_v37 = vsel %vm3411_vm4, 0, %v581_v31  ;;  %586 = vst [vmem:[#allocation4 + $0xc] sm:$0x1] %v585_v32  ;;  %v558_v38 = vld [vmem:[#allocation4 + $0x18] sm:$0x1] }
  0x29   : > { %551 = vst [vmem:[#allocation4] sm:$0x1] %v550_v33  ;;  %583 = vst [vmem:[#allocation4 + $0x4] sm:$0x1] %v582_v37  ;;  %v559_v42 = vsel %vm3403_vm3, 0, %v558_v38  ;;  %v3126_v27 = vld [vmem:[%s3793_s1 + $0x188] sm:$0xff]   ;;  %v410_v33 = vadd.f32 %v3366_v35, %v384_v3 }
  0x2a   : > { %529 = vst [vmem:[#allocation4 + $0x20] sm:$0xf] %v2809_v34  ;;  %v798_v43 = vld [vmem:[#allocation4] sm:$0xe]  ;;  %560 = vst [vmem:[#allocation4 + $0x18] sm:$0x1] %v559_v42  ;;  %v389_v34 = vmul.f32 %v3359_v30, %v363_v61 }
  0x2b   : > { %526 = vst [vmem:[#allocation4 + $0x14] sm:$0x1] %v2806_v44  ;;  %528 = vst [vmem:[#allocation4 + $0x1c] sm:$0x1] %v2808_v45  ;;  %v2666_v54 = vrot.slane %v798_v43, 9  ;;  %v3131_v40 = vld [vmem:[%s3793_s1 + $0x1d0] sm:$0xff]  }
  0x2c   : > { %v3470_v43 = vld [vmem:[#allocation4 + $0x10] sm:$0xe]  ;;  %v804_v48 = vld [vmem:[#allocation4 + $0x18] sm:$0xe]  ;;  %v430_v51 = vmax.f32 %v410_v33, 0.0 }
  0x2d   : > { %v3120_v50 = vld [vmem:[#allocation4 + $0x8] ss:$8 sps:$4 sm:$0xff]  }
  0x2e   : > { %v649_v56 = vld [vmem:[#allocation4 + $0x8] sm:$0xf]  ;;  %2132 = vmatprep.mubr.bf16.mxu1 %v3120_v50  ;;  %v651_v13 = vld [vmem:[#allocation4 + $0x10] sm:$0xf]  ;;  %v433_v50 = vmax.f32 %v413_v2, 0.0  ;;  %v2810_v2 = vpack.c.bf16 %v430_v51, %v430_v51 }
  0x2f   : > { %v801_v58 = vld [vmem:[#allocation4 + $0xc] sm:$0x1]  ;;  %v681_v7 = vshrl.u32 %v649_v56, 16  ;;  %v684_v11 = vshll.u32 %v649_v56, 16  ;;  %v695_v41 = vshrl.u32 %v651_v13, 16  ;;  %v698_v44 = vshll.u32 %v651_v13, 16 }
  0x30   : > { %v647_v59 = vld [vmem:[#allocation4] sm:$0xf]  ;;  %v650_v60 = vld [vmem:[#allocation4 + $0xc] sm:$0x1]  ;;  %v799_v62 = vld [vmem:[#allocation4 + $0x4] sm:$0x1] }
  0x31   : > { %v839_v63 = vrot.slane %v801_v58, 5  ;;  %v648_v0 = vld [vmem:[#allocation4 + $0x4] sm:$0x1]  ;;  %v667_v1 = vshrl.u32 %v647_v59, 16  ;;  %v835_v4 = vrot.slane %v799_v62, 5  ;;  %v670_v5 = vshll.u32 %v647_v59, 16 }
  0x32   : > { %v676_v6 = vshll.u32 %v648_v0, 16  ;;  %v690_v12 = vshll.u32 %v650_v60, 16  ;;  %v683_v19 = vrot.slane %v681_v7, 4  ;;  %v561_v20 = vld [vmem:[#allocation4 + $0x20] sm:$0x1]  ;;  %v686_v24 = vrot.slane %v684_v11, 5 }
  0x33   : > { %v840_v8 = vsel %vm3433_vm9, %v2667_v55, %v839_v63  ;;  %v669_v10 = vrot.slane %v667_v1, 4  ;;  %v836_v14 = vsel %vm3433_vm9, %v2666_v54, %v835_v4  ;;  %v672_v17 = vrot.slane %v670_v5, 5  ;;  %v587_v29 = vld [vmem:[#allocation4 + $0x14] sm:$0x1]  ;;  %v590_v31 = vld [vmem:[#allocation4 + $0x1c] sm:$0x1] }
  0x34   : > { %v678_v18 = vrot.slane %v676_v6, 5  ;;  %v2674_v21 = vcombine.low %v836_v14, %v840_v8  ;;  %v692_v25 = vrot.slane %v690_v12, 5  ;;  %v562_v26 = vsel %vm3403_vm3, 0, %v561_v20  ;;  %v653_v32 = vld [vmem:[#allocation4 + $0x18] sm:$0xf]  ;;  %v3130_v54 = vld [vmem:[%s3793_s1 + $0x100] sm:$0xff]  }
  0x35   : > { %v673_v28 = vor.u32 %v672_v17, %v669_v10  ;;  %563 = vst [vmem:[#allocation4 + $0x20] sm:$0x1] %v562_v26  ;;  %v687_v37 = vor.u32 %v686_v24, %v683_v19  ;;  %v588_v38 = vsel %vm3411_vm4, 0, %v587_v29  ;;  %v591_v39 = vsel %vm3411_vm4, 0, %v590_v31  ;;  %v3132_v55 = vld [vmem:[%s3793_s1 + $0x190] sm:$0xff]   ;;  %v3133_v62 = vld [vmem:[%s3793_s1 + $0x148] sm:$0xff]  }
  0x36   : > { %2133 = vmatmul.mubr.bf16.vlgmr.msra.gmra.mrb[0].mxu1 %v2674_v21  ;;  %589 = vst [vmem:[#allocation4 + $0x14] sm:$0x1] %v588_v38  ;;  %592 = vst [vmem:[#allocation4 + $0x1c] sm:$0x1] %v591_v39  ;;  %v709_v45 = vshrl.u32 %v653_v32, 16  ;;  %v712_v46 = vshll.u32 %v653_v32, 16  ;;  %v2813_v63 = vpack.c.bf16 %v433_v50, %v433_v50  ;;  %v415_v12 = vadd.f32 %v3366_v35, %v389_v34 }
  0x37   : > { %2973 = vmatpush3.bf16.msra.mxu1 %v3122_v15  ;;  %v674_v42 = vrot.slane %v673_v28, 4  ;;  %v688_v47 = vrot.slane %v687_v37, 4  ;;  %v697_v49 = vrot.slane %v695_v41, 4  ;;  %v700_v56 = vrot.slane %v698_v44, 5  ;;  %v564_v59 = vld [vmem:[#allocation4 + $0x28] sm:$0x1] }
  0x38   : > { %2974 = vmatprep.subr.bf16.mxu1 %v3125_v23  ;;  %v711_v57 = vrot.slane %v709_v45, 4  ;;  %v714_v58 = vrot.slane %v712_v46, 5  ;;  %v3128_v61 = vld [vmem:[#allocation4] ss:$8 sps:$4 sm:$0xff]   ;;  %v565_v0 = vsel %vm3403_vm3, 0, %v564_v59  ;;  %v3135_v4 = vld [vmem:[%s3793_s1 + $0x1d8] sm:$0xff]  }
  0x39   : > { %v679_v52 = vsel %vm3459_vm10, %v674_v42, %v678_v18  ;;  %v693_v60 = vsel %vm3459_vm10, %v688_v47, %v692_v25  ;;  %v340_v1 = vld [vmem:[%s3348_s20 + $0x2c] sm:$0x1]  ;;  %v701_v5 = vor.u32 %v700_v56, %v697_v49  ;;  %566 = vst [vmem:[#allocation4 + $0x28] sm:$0x1] %v565_v0  ;;  %v2668_v10 = vrot.slane %v3470_v43, 9  ;;  %v3136_v14 = vld [vmem:[%s3793_s1 + $0x198] sm:$0xff]  }
  0x3a   : > { %v2662_v3 = vcombine.low %v679_v52, %v693_v60  ;;  %v715_v6 = vor.u32 %v714_v58, %v711_v57  ;;  %v360_v7 = vunpack.c.l.bf16 %v340_v1  ;;  %v2669_v11 = vrot.slane %v804_v48, 9  ;;  %533 = vst [vmem:[#allocation4 + $0x30] sm:$0xf] %v2813_v63  ;;  %530 = vst [vmem:[#allocation4 + $0x24] sm:$0x1] %v2810_v2  ;;  %v3134_v13 = vld [vmem:[%s3793_s1 + $0x108] sm:$0xff]  }
  0x3b   : > { %2975 = vmatpush3.bf16.msra.mxu1 %v3126_v27  ;;  %v702_v15 = vrot.slane %v701_v5, 4  ;;  %v3137_v23 = vld [vmem:[%s3793_s1 + $0x150] sm:$0xff]   ;;  %v3141_v29 = vld [vmem:[%s3793_s1 + $0x1e0] sm:$0xff]   ;;  %v435_v32 = vmax.f32 %v415_v12, 0.0  ;;  %v3143_v49 = vld [vmem:[%s3793_s1 + $0x158] sm:$0xff]  }
  0x3c   : > { %v3129_v8 = vld [vmem:[#allocation4 + $0x18] ss:$8 sps:$4 sm:$0xff]   ;;  %2976 = vmatprep.subr.bf16.mxu1 %v3131_v40  ;;  %2067 = vmatprep.mubr.bf16.mxu0 %v2662_v3  ;;  %v716_v17 = vrot.slane %v715_v6, 4  ;;  %v386_v18 = vmul.f32 %v3359_v30, %v360_v7  ;;  %v3140_v38 = vld [vmem:[%s3793_s1 + $0x110] sm:$0xff]   ;;  %v3145_v50 = vld [vmem:[%s3793_s1 + $0x1e8] sm:$0xff]  }
  0x3d   : > { %2068 = vmatmul.mubr.bf16.vlgmr.msra.gmra.mrb[0].mxu0 %v3128_v61  ;;  %2140 = vmatprep.mubr.bf16.mxu1 %v3129_v8  ;;  %v803_v19 = vld [vmem:[#allocation4 + $0x14] sm:$0x1]  ;;  %v805_v20 = vld [vmem:[#allocation4 + $0x1c] sm:$0x1]  ;;  %v3138_v42 = vld [vmem:[#allocation4 + $0x10] ss:$8 sps:$4 sm:$0xff]   ;;  %v2815_v44 = vpack.c.bf16 %v435_v32, %v435_v32 }
  0x3e   : > { %v652_v21 = vld [vmem:[#allocation4 + $0x14] sm:$0x1]  ;;  %2933 = vmatpush3.bf16.msra.mxu0 %v3130_v54  ;;  %v843_v24 = vrot.slane %v803_v19, 5  ;;  %v847_v25 = vrot.slane %v805_v20, 5  ;;  %v654_v26 = vld [vmem:[#allocation4 + $0x1c] sm:$0x1]  ;;  %v412_v28 = vadd.f32 %v3366_v35, %v386_v18 }
  0x3f   : > { %2977 = vmatpush3.bf16.msra.mxu1 %v3132_v55  ;;  %v704_v27 = vshll.u32 %v652_v21, 16  ;;  %2934 = vmatprep.subr.bf16.mxu0 %v3133_v62  ;;  %v718_v31 = vshll.u32 %v654_v26, 16  ;;  %v3142_v43 = vld [vmem:[%s3793_s1 + $0x1a0] sm:$0xff]   ;;  %535 = vst [vmem:[#allocation4 + $0x38] sm:$0xf] %v2815_v44  ;;  %v3144_v58 = vld [vmem:[%s3793_s1 + $0x118] sm:$0xff]  }
  0x40   : > { %2978 = vmatprep.subr.bf16.mxu1 %v3135_v4  ;;  %v844_v33 = vsel %vm3433_vm9, %v2668_v10, %v843_v24  ;;  %v848_v34 = vsel %vm3433_vm9, %v2669_v11, %v847_v25  ;;  %v432_v39 = vmax.f32 %v412_v28, 0.0  ;;  %v655_v56 = vld [vmem:[#allocation4 + $0x20] sm:$0xf]  ;;  %v657_v57 = vld [vmem:[#allocation4 + $0x28] sm:$0xf] }
  0x41   : > { %v706_v37 = vrot.slane %v704_v27, 5  ;;  %v2675_v40 = vcombine.low %v844_v33, %v848_v34  ;;  %v720_v41 = vrot.slane %v718_v31, 5  ;;  %v567_v46 = vld [vmem:[#allocation4 + $0x30] sm:$0x1]  ;;  %v593_v48 = vld [vmem:[#allocation4 + $0x24] sm:$0x1] }
  0x42   : > { %2935 = vmatpush3.bf16.msra.mxu0 %v3134_v13  ;;  %v2812_v47 = vpack.c.bf16 %v432_v39, %v432_v39  ;;  %v568_v52 = vsel %vm3403_vm3, 0, %v567_v46  ;;  %v594_v54 = vsel %vm3411_vm4, 0, %v593_v48  ;;  %v723_v59 = vshrl.u32 %v655_v56, 16  ;;  %v3534_v61 = vld [vmem:[#allocation4 + $0x20] sm:$0xe]  ;;  %v3146_v63 = vld [vmem:[%s3793_s1 + $0x1a8] sm:$0xff]  }
  0x43   : > { %2979 = vmatpush3.bf16.msra.mxu1 %v3136_v14  ;;  %v707_v45 = vsel %vm3459_vm10, %v702_v15, %v706_v37  ;;  %v721_v51 = vsel %vm3459_vm10, %v716_v17, %v720_v41  ;;  %2936 = vmatprep.subr.bf16.mxu0 %v3137_v23  ;;  %569 = vst [vmem:[#allocation4 + $0x30] sm:$0x1] %v568_v52  ;;  %595 = vst [vmem:[#allocation4 + $0x24] sm:$0x1] %v594_v54  ;;  %v726_v60 = vshll.u32 %v655_v56, 16  ;;  %v3147_v2 = vld [vmem:[%s3793_s1 + $0x160] sm:$0xff]  }
  0x44   : > { %2141 = vmatmul.mubr.bf16.gmra.mrb[4].mxu1 %v2675_v40  ;;  %v2663_v55 = vcombine.low %v707_v45, %v721_v51  ;;  %532 = vst [vmem:[#allocation4 + $0x2c] sm:$0x1] %v2812_v47  ;;  %2980 = vmatprep.subr.bf16.mxu1 %v3141_v29  ;;  %v3536_v62 = vld [vmem:[#allocation4 + $0x28] sm:$0xe]  ;;  %v737_v0 = vshrl.u32 %v657_v57, 16  ;;  %v740_v1 = vshll.u32 %v657_v57, 16 }
  0x45   : > { %v345_v3 = vld [vmem:[%s3348_s20 + $0x40] sm:$0xf]  ;;  %v342_v5 = vld [vmem:[%s3348_s20 + $0x34] sm:$0x1]  ;;  %v725_v6 = vrot.slane %v723_v59, 4  ;;  %v728_v7 = vrot.slane %v726_v60, 5 }
  0x46   : > { %2075 = vmatprep.mubr.bf16.mxu0 %v2663_v55  ;;  %2937 = vmatpush3.bf16.msra.mxu0 %v3140_v38  ;;  %v365_v4 = vunpack.c.l.bf16 %v345_v3  ;;  %v344_v8 = vld [vmem:[%s3348_s20 + $0x3c] sm:$0x1]  ;;  %v362_v10 = vunpack.c.l.bf16 %v342_v5  ;;  %v2670_v11 = vrot.slane %v3534_v61, 9  ;;  %v570_v13 = vld [vmem:[#allocation4 + $0x38] sm:$0x1]  ;;  %v3150_v14 = vld [vmem:[%s3793_s1 + $0x120] sm:$0xff]  }
  0x47   : > { %2076 = vmatmul.mubr.bf16.gmra.mrb[4].mxu0 %v3138_v42  ;;  %2981 = vmatpush3.bf16.msra.mxu1 %v3142_v43  ;;  %v364_v15 = vunpack.c.l.bf16 %v344_v8  ;;  %v3151_v17 = vld [vmem:[%s3793_s1 + $0x1f0] sm:$0xff]   ;;  %v2671_v24 = vrot.slane %v3536_v62, 9  ;;  %v729_v28 = vor.u32 %v728_v7, %v725_v6  ;;  %v739_v29 = vrot.slane %v737_v0, 4  ;;  %v3153_v43 = vld [vmem:[%s3793_s1 + $0x168] sm:$0xff]   ;;  %v3155_v48 = vld [vmem:[%s3793_s1 + $0x1f8] sm:$0xff]  }
  0x48   : > { %2938 = vmatprep.subr.bf16.mxu0 %v3143_v49  ;;  %2982 = vmatprep.subr.bf16.mxu1 %v3145_v50  ;;  %v391_v12 = vmul.f32 %v3359_v30, %v365_v4  ;;  %v388_v20 = vmul.f32 %v3359_v30, %v362_v10  ;;  %v742_v31 = vrot.slane %v740_v1, 5  ;;  %v571_v32 = vsel %vm3403_vm3, 0, %v570_v13  ;;  %v3154_v44 = vld [vmem:[%s3793_s1 + $0x128] sm:$0xff]   ;;  %v3577_v50 = vld [vmem:[#allocation4 + $0x30] sm:$0xe]  ;;  %v3156_v51 = vld [vmem:[%s3793_s1 + $0x1b8] sm:$0xff]  }
  0x49   : > { %v390_v27 = vmul.f32 %v3359_v30, %v364_v15  ;;  %572 = vst [vmem:[#allocation4 + $0x38] sm:$0x1] %v571_v32  ;;  %v3152_v30 = vld [vmem:[%s3793_s1 + $0x1b0] sm:$0xff]   ;;  %v730_v46 = vrot.slane %v729_v28, 4  ;;  %v3588_v3 = vld [vmem:[#allocation4 + $0x38] sm:$0xe] }
  0x4a   : > { %2939 = vmatpush3.bf16.msra.mxu0 %v3144_v58  ;;  %v3139_v18 = vld [vmem:[#allocation4 + $0x28] ss:$8 sps:$4 sm:$0xff]   ;;  %v807_v23 = vld [vmem:[#allocation4 + $0x24] sm:$0x1]  ;;  %v417_v26 = vadd.f32 %v3366_v35, %v391_v12  ;;  %v414_v37 = vadd.f32 %v3366_v35, %v388_v20  ;;  %v743_v45 = vor.u32 %v742_v31, %v739_v29  ;;  %v2672_v6 = vrot.slane %v3577_v50, 9 }
  0x4b   : > { %v596_v19 = vld [vmem:[#allocation4 + $0x2c] sm:$0x1]  ;;  %2983 = vmatpush3.bf16.msra.mxu1 %v3146_v63  ;;  %2940 = vmatprep.subr.bf16.mxu0 %v3147_v2  ;;  %v656_v25 = vld [vmem:[#allocation4 + $0x24] sm:$0x1]  ;;  %v851_v33 = vrot.slane %v807_v23, 5  ;;  %v416_v38 = vadd.f32 %v3366_v35, %v390_v27  ;;  %v3157_v4 = vld [vmem:[%s3793_s1 + $0x170] sm:$0xff]  }
  0x4c   : > { %v597_v21 = vsel %vm3411_vm4, 0, %v596_v19  ;;  %2984 = vmatprep.subr.bf16.mxu1 %v3151_v17  ;;  %2148 = vmatprep.mubr.bf16.mxu1 %v3139_v18  ;;  %v437_v34 = vmax.f32 %v417_v26, 0.0  ;;  %v732_v39 = vshll.u32 %v656_v25, 16  ;;  %v434_v41 = vmax.f32 %v414_v37, 0.0  ;;  %v659_v52 = vld [vmem:[#allocation4 + $0x30] sm:$0xf] }
  0x4d   : > { %598 = vst [vmem:[#allocation4 + $0x2c] sm:$0x1] %v597_v21  ;;  %v436_v42 = vmax.f32 %v416_v38, 0.0  ;;  %v751_v56 = vshrl.u32 %v659_v52, 16  ;;  %v754_v57 = vshll.u32 %v659_v52, 16  ;;  %v852_v58 = vsel %vm3433_vm9, %v2670_v11, %v851_v33  ;;  %v3159_v13 = vld [vmem:[%s3793_s1 + $0x130] sm:$0xff]  }
  0x4e   : > { %2941 = vmatpush3.bf16.msra.mxu0 %v3150_v14  ;;  %v2817_v40 = vpack.c.bf16 %v437_v34, %v437_v34  ;;  %v2814_v35 = vpack.c.bf16 %v434_v41, %v434_v41  ;;  %v734_v49 = vrot.slane %v732_v39, 5  ;;  %v744_v60 = vrot.slane %v743_v45, 4  ;;  %v3148_v2 = vld [vmem:[#allocation4 + $0x20] ss:$8 sps:$4 sm:$0xff]   ;;  %v1191_v18 = vld [vmem:[#allocation4 + $0x10] sm:$0xf] }
  0x4f   : > { %2985 = vmatpush3.bf16.msra.mxu1 %v3152_v30  ;;  %v2816_v47 = vpack.c.bf16 %v436_v42, %v436_v42  ;;  %2942 = vmatprep.subr.bf16.mxu0 %v3153_v43  ;;  %v753_v7 = vrot.slane %v751_v56, 4  ;;  %v756_v8 = vrot.slane %v754_v57, 5  ;;  %v1192_v19 = vld [vmem:[#allocation4 + $0x14] sm:$0x1]  ;;  %v1193_v23 = vld [vmem:[#allocation4 + $0x18] sm:$0xf] }
  0x50   : > { %537 = vst [vmem:[#allocation4 + $0x40] sm:$0xf] %v2817_v40  ;;  %534 = vst [vmem:[#allocation4 + $0x34] sm:$0x1] %v2814_v35  ;;  %2986 = vmatprep.subr.bf16.mxu1 %v3155_v48  ;;  %v661_v62 = vld [vmem:[#allocation4 + $0x38] sm:$0xf]  ;;  %v735_v0 = vsel %vm3459_vm10, %v730_v46, %v734_v49 }
  0x51   : > { %536 = vst [vmem:[#allocation4 + $0x3c] sm:$0x1] %v2816_v47  ;;  %v765_v12 = vshrl.u32 %v661_v62, 16  ;;  %v768_v17 = vshll.u32 %v661_v62, 16  ;;  %v2673_v26 = vrot.slane %v3588_v3, 9  ;;  %v1208_v28 = vshrl.u32 %v1191_v18, 16 }
  0x52   : > { %2943 = vmatpush3.bf16.msra.mxu0 %v3154_v44  ;;  %v1194_v27 = vld [vmem:[#allocation4 + $0x1c] sm:$0x1]  ;;  %v1211_v29 = vshll.u32 %v1191_v18, 16  ;;  %v1217_v31 = vshll.u32 %v1192_v19, 16  ;;  %v1222_v32 = vshrl.u32 %v1193_v23, 16  ;;  %v1225_v33 = vshll.u32 %v1193_v23, 16 }
  0x53   : > { %2987 = vmatpush3.bf16.msra.mxu1 %v3156_v51  ;;  %2944 = vmatprep.subr.bf16.mxu0 %v3157_v4  ;;  %v767_v34 = vrot.slane %v765_v12, 4  ;;  %v770_v37 = vrot.slane %v768_v17, 5  ;;  %v1210_v38 = vrot.slane %v1208_v28, 4  ;;  %v1231_v39 = vshll.u32 %v1194_v27, 16  ;;  %v3609_v44 = vld [vmem:[%s3793_s1 + $0x200] sm:$0xff]   ;;  %v3162_v47 = vld [vmem:[%s3793_s1 + $0x178] sm:$0xff]  }
  0x54   : > { %v809_v54 = vld [vmem:[#allocation4 + $0x2c] sm:$0x1]  ;;  %v757_v30 = vor.u32 %v756_v8, %v753_v7  ;;  %v1213_v40 = vrot.slane %v1211_v29, 5  ;;  %v1224_v41 = vrot.slane %v1222_v32, 4  ;;  %v1227_v42 = vrot.slane %v1225_v33, 5  ;;  %3048 = vmatprep.subr.bf16.mxu1 %v3609_v44 }
  0x55   : > { %v658_v55 = vld [vmem:[#allocation4 + $0x2c] sm:$0x1]  ;;  %v855_v59 = vrot.slane %v809_v54, 5  ;;  %v1219_v43 = vrot.slane %v1217_v31, 5  ;;  %v1233_v35 = vrot.slane %v1231_v39, 5  ;;  %v771_v49 = vor.u32 %v770_v37, %v767_v34 }
  0x56   : > { %v746_v61 = vshll.u32 %v658_v55, 16  ;;  %2945 = vmatpush3.bf16.msra.mxu0 %v3159_v13  ;;  %v1214_v45 = vor.u32 %v1213_v40, %v1210_v38  ;;  %v1228_v46 = vor.u32 %v1227_v42, %v1224_v41  ;;  %v758_v51 = vrot.slane %v757_v30, 4  ;;  %v3163_v55 = vld [vmem:[%s3793_s1 + $0x138] sm:$0xff]   ;;  %v1070_v3 = vld [vmem:[#allocation4 + $0x8] sm:$0xe] }
  0x57   : > { %v856_v63 = vsel %vm3433_vm9, %v2671_v24, %v855_v59  ;;  %v573_v11 = vld [vmem:[#allocation4 + $0x40] sm:$0x1]  ;;  %v599_v20 = vld [vmem:[#allocation4 + $0x34] sm:$0x1]  ;;  %2946 = vmatprep.subr.bf16.mxu0 %v3162_v47  ;;  %v2686_v17 = vrot.slane %v1070_v3, 9 }
  0x58   : > { %v748_v1 = vrot.slane %v746_v61, 5  ;;  %v2676_v5 = vcombine.low %v852_v58, %v856_v63  ;;  %v574_v15 = vsel %vm3403_vm3, 0, %v573_v11  ;;  %v602_v21 = vld [vmem:[#allocation4 + $0x3c] sm:$0x1]  ;;  %v600_v24 = vsel %vm3411_vm4, 0, %v599_v20 }
  0x59   : > { %575 = vst [vmem:[#allocation4 + $0x40] sm:$0x1] %v574_v15  ;;  %v603_v25 = vsel %vm3411_vm4, 0, %v602_v21  ;;  %601 = vst [vmem:[#allocation4 + $0x34] sm:$0x1] %v600_v24  ;;  %v1215_v52 = vrot.slane %v1214_v45, 4 }
  0x5a   : > { %v749_v10 = vsel %vm3459_vm10, %v744_v60, %v748_v1  ;;  %2149 = vmatmul.mubr.bf16.gmra.mrb[8].mxu1 %v2676_v5  ;;  %604 = vst [vmem:[#allocation4 + $0x3c] sm:$0x1] %v603_v25  ;;  %v1229_v54 = vrot.slane %v1228_v46, 4  ;;  %2947 = vmatpush3.bf16.msra.mxu0 %v3163_v55  ;;  %v1072_v11 = vld [vmem:[#allocation4 + $0x10] sm:$0xe] }
  0x5b   : > { %v2664_v14 = vcombine.low %v735_v0, %v749_v10  ;;  %v1220_v63 = vsel %vm3459_vm10, %v1215_v52, %v1219_v43  ;;  %v772_v0 = vrot.slane %v771_v49, 4  ;;  %3024 = vmatprep.subr.bf16.mxu0 %v3609_v44  ;;  %v1071_v10 = vld [vmem:[#allocation4 + $0xc] sm:$0x1]  ;;  %v1073_v15 = vld [vmem:[#allocation4 + $0x14] sm:$0x1]  ;;  %v2687_v50 = vrot.slane %v1072_v11, 9 }
  0x5c   : > { %v1104_v18 = vrot.slane %v1071_v10, 5  ;;  %v1108_v20 = vrot.slane %v1073_v15, 5  ;;  %v922_v21 = vld [vmem:[#allocation4 + $0x8] sm:$0xf]  ;;  %v924_v25 = vld [vmem:[#allocation4 + $0x10] sm:$0xf] }
  0x5d   : > { %2083 = vmatprep.mubr.bf16.mxu0 %v2664_v14  ;;  %v3158_v14 = vld [vmem:[#allocation4 + $0x30] ss:$8 sps:$4 sm:$0xff]   ;;  %v939_v27 = vshrl.u32 %v922_v21, 16  ;;  %v942_v28 = vshll.u32 %v922_v21, 16  ;;  %v953_v33 = vshrl.u32 %v924_v25, 16  ;;  %v956_v41 = vshll.u32 %v924_v25, 16 }
  0x5e   : > { %2084 = vmatmul.mubr.bf16.gmra.mrb[8].mxu0 %v3148_v2  ;;  %v1234_v2 = vsel %vm3459_vm10, %v1229_v54, %v1233_v35  ;;  %v1105_v24 = vsel %vm3433_vm9, %v2686_v17, %v1104_v18  ;;  %v1109_v31 = vsel %vm3433_vm9, %v2687_v50, %v1108_v20  ;;  %v1195_v34 = vld [vmem:[#allocation4 + $0x20] sm:$0xf]  ;;  %v1196_v37 = vld [vmem:[#allocation4 + $0x24] sm:$0x1]  ;;  %v3160_v38 = vld [vmem:[#allocation4 + $0x10] ss:$8 sps:$4 sm:$0xff]  }
  0x5f   : > { %v2702_v8 = vcombine.low %v1220_v63, %v1234_v2  ;;  %v2694_v39 = vcombine.low %v1105_v24, %v1109_v31  ;;  %v941_v30 = vrot.slane %v939_v27, 4  ;;  %v944_v40 = vrot.slane %v942_v28, 5  ;;  %v1197_v42 = vld [vmem:[#allocation4 + $0x28] sm:$0xf]  ;;  %v1198_v35 = vld [vmem:[#allocation4 + $0x2c] sm:$0x1] }
  0x60   : > { %v3149_v48 = vld [vmem:[#allocation4 + $0x38] ss:$8 sps:$4 sm:$0xff]   ;;  %v811_v56 = vld [vmem:[#allocation4 + $0x34] sm:$0x1]  ;;  %v955_v45 = vrot.slane %v953_v33, 4  ;;  %v1236_v47 = vshrl.u32 %v1195_v34, 16 }
  0x61   : > { %2156 = vmatprep.mubr.bf16.mxu1 %v3149_v48  ;;  %v813_v57 = vld [vmem:[#allocation4 + $0x3c] sm:$0x1]  ;;  %v660_v58 = vld [vmem:[#allocation4 + $0x34] sm:$0x1]  ;;  %v859_v59 = vrot.slane %v811_v56, 5  ;;  %v945_v48 = vor.u32 %v944_v40, %v941_v30  ;;  %v958_v49 = vrot.slane %v956_v41, 5 }
  0x62   : > { %v863_v60 = vrot.slane %v813_v57, 5  ;;  %v662_v61 = vld [vmem:[#allocation4 + $0x3c] sm:$0x1]  ;;  %v760_v62 = vshll.u32 %v660_v58, 16  ;;  %v1245_v52 = vshll.u32 %v1196_v37, 16  ;;  %v1238_v54 = vrot.slane %v1236_v47, 4 }
  0x63   : > { %v774_v1 = vshll.u32 %v662_v61, 16  ;;  %v860_v4 = vsel %vm3433_vm9, %v2672_v6, %v859_v59  ;;  %v923_v6 = vld [vmem:[#allocation4 + $0xc] sm:$0x1]  ;;  %v1250_v55 = vshrl.u32 %v1197_v42, 16  ;;  %v1253_v56 = vshll.u32 %v1197_v42, 16  ;;  %v3668_v40 = vld [vmem:[%s3793_s1 + $0x218] sm:$0xff]  }
  0x64   : > { %v864_v5 = vsel %vm3433_vm9, %v2673_v26, %v863_v60  ;;  %v762_v7 = vrot.slane %v760_v62, 5  ;;  %v925_v26 = vld [vmem:[#allocation4 + $0x14] sm:$0x1]  ;;  %v948_v32 = vshll.u32 %v923_v6, 16  ;;  %v3640_v57 = vld [vmem:[%s3793_s1 + $0x208] sm:$0xff]   ;;  %v946_v58 = vrot.slane %v945_v48, 4 }
  0x65   : > { %v2677_v12 = vcombine.low %v860_v4, %v864_v5  ;;  %v776_v13 = vrot.slane %v774_v1, 5  ;;  %v962_v46 = vshll.u32 %v925_v26, 16  ;;  %v959_v59 = vor.u32 %v958_v49, %v955_v45  ;;  %v1074_v10 = vld [vmem:[#allocation4 + $0x18] sm:$0xe]  ;;  %v1077_v50 = vld [vmem:[#allocation4 + $0x24] sm:$0x1] }
  0x66   : > { %v763_v19 = vsel %vm3459_vm10, %v758_v51, %v762_v7  ;;  %v950_v43 = vrot.slane %v948_v32, 5  ;;  %v1239_v51 = vshll.u32 %v1195_v34, 16  ;;  %v1252_v62 = vrot.slane %v1250_v55, 4  ;;  %v926_v24 = vld [vmem:[#allocation4 + $0x18] sm:$0xf] }
  0x67   : > { %2157 = vmatmul.mubr.bf16.gmra.mrb[12].mxu1 %v2677_v12  ;;  %v777_v23 = vsel %vm3459_vm10, %v772_v0, %v776_v13  ;;  %v964_v60 = vrot.slane %v962_v46, 5  ;;  %v1255_v63 = vrot.slane %v1253_v56, 5  ;;  %v1259_v0 = vshll.u32 %v1198_v35, 16  ;;  %v1075_v13 = vld [vmem:[#allocation4 + $0x1c] sm:$0x1] }
  0x68   : > { %v2665_v29 = vcombine.low %v763_v19, %v777_v23  ;;  %2262 = vmatprep.mubr.bf16.mxu1 %v2702_v8  ;;  %v1241_v61 = vrot.slane %v1239_v51, 5  ;;  %v951_v1 = vsel %vm3459_vm10, %v946_v58, %v950_v43  ;;  %v960_v2 = vrot.slane %v959_v59, 4  ;;  %v3648_v8 = vld [vmem:[%s3793_s1 + $0x210] sm:$0xff]   ;;  %v3165_v19 = vld [vmem:[#allocation4 + $0x20] ss:$8 sps:$4 sm:$0xff]  }
  0x69   : > { %v1247_v4 = vrot.slane %v1245_v52, 5  ;;  %v1256_v5 = vor.u32 %v1255_v63, %v1252_v62  ;;  %v1261_v7 = vrot.slane %v1259_v0, 5  ;;  %v2688_v15 = vrot.slane %v1074_v10, 9  ;;  %v927_v25 = vld [vmem:[#allocation4 + $0x1c] sm:$0x1]  ;;  %v3677_v0 = vld [vmem:[%s3793_s1 + $0x220] sm:$0xff]  }
  0x6a   : > { %2091 = vmatprep.mubr.bf16.mxu0 %v2665_v29  ;;  %v1242_v3 = vor.u32 %v1241_v61, %v1238_v54  ;;  %v965_v11 = vsel %vm3459_vm10, %v960_v2, %v964_v60  ;;  %v1112_v20 = vrot.slane %v1075_v13, 5  ;;  %v1116_v23 = vrot.slane %v1077_v50, 5  ;;  %v928_v28 = vld [vmem:[#allocation4 + $0x20] sm:$0xf]  ;;  %v929_v29 = vld [vmem:[#allocation4 + $0x24] sm:$0x1] }
  0x6b   : > { %2092 = vmatmul.mubr.bf16.gmra.mrb[12].mxu0 %v3158_v14  ;;  %v1076_v14 = vld [vmem:[#allocation4 + $0x20] sm:$0xe]  ;;  %v2682_v17 = vcombine.low %v951_v1, %v965_v11  ;;  %v1257_v18 = vrot.slane %v1256_v5, 4  ;;  %v967_v31 = vshrl.u32 %v926_v24, 16  ;;  %v970_v32 = vshll.u32 %v926_v24, 16 }
  0x6c   : > { %2197 = vmatprep.mubr.bf16.mxu0 %v2694_v39  ;;  %v1243_v12 = vrot.slane %v1242_v3, 4  ;;  %v2689_v21 = vrot.slane %v1076_v14, 9  ;;  %v1113_v27 = vsel %vm3433_vm9, %v2688_v15, %v1112_v20  ;;  %v976_v37 = vshll.u32 %v927_v25, 16  ;;  %v1199_v39 = vld [vmem:[#allocation4 + $0x30] sm:$0xf] }
  0x6d   : > { %v1262_v26 = vsel %vm3459_vm10, %v1257_v18, %v1261_v7  ;;  %v1200_v30 = vld [vmem:[#allocation4 + $0x34] sm:$0x1]  ;;  %v969_v42 = vrot.slane %v967_v31, 4  ;;  %v972_v43 = vrot.slane %v970_v32, 5  ;;  %v1201_v45 = vld [vmem:[#allocation4 + $0x38] sm:$0xf] }
  0x6e   : > { %v1248_v6 = vsel %vm3459_vm10, %v1243_v12, %v1247_v4  ;;  %v1117_v34 = vsel %vm3433_vm9, %v2689_v21, %v1116_v23  ;;  %v978_v46 = vrot.slane %v976_v37, 5  ;;  %v990_v47 = vshll.u32 %v929_v29, 16  ;;  %v1202_v48 = vld [vmem:[#allocation4 + $0x3c] sm:$0x1]  ;;  %v3686_v12 = vld [vmem:[%s3793_s1 + $0x228] sm:$0xff]  }
  0x6f   : > { %2263 = vmatmul.mubr.bf16.vlgmr.msra.gmra.mrb[16].mxu1 %v3160_v38  ;;  %v2703_v33 = vcombine.low %v1248_v6, %v1262_v26  ;;  %v981_v38 = vshrl.u32 %v928_v28, 16  ;;  %v2695_v41 = vcombine.low %v1113_v27, %v1117_v34  ;;  %v1264_v49 = vshrl.u32 %v1199_v39, 16  ;;  %v1078_v13 = vld [vmem:[#allocation4 + $0x28] sm:$0xe]  ;;  %v1080_v18 = vld [vmem:[#allocation4 + $0x30] sm:$0xe] }
  0x70   : > { %3056 = vmatpush3.bf16.msra.mxu1 %v3609_v44  ;;  %v973_v51 = vor.u32 %v972_v43, %v969_v42  ;;  %v1267_v54 = vshll.u32 %v1199_v39, 16  ;;  %v1273_v55 = vshll.u32 %v1200_v30, 16  ;;  %v1278_v58 = vshrl.u32 %v1201_v45, 16  ;;  %v1081_v21 = vld [vmem:[#allocation4 + $0x34] sm:$0x1] }
  0x71   : > { %3049 = vmatprep.subr.bf16.mxu1 %v3640_v57  ;;  %2270 = vmatprep.mubr.bf16.mxu1 %v2703_v33  ;;  %v983_v35 = vrot.slane %v981_v38, 4  ;;  %v1266_v56 = vrot.slane %v1264_v49, 4  ;;  %v1281_v59 = vshll.u32 %v1201_v45, 16  ;;  %v992_v62 = vrot.slane %v990_v47, 5  ;;  %v930_v26 = vld [vmem:[#allocation4 + $0x28] sm:$0xf] }
  0x72   : > { %v974_v60 = vrot.slane %v973_v51, 4  ;;  %v1269_v63 = vrot.slane %v1267_v54, 5  ;;  %v1280_v1 = vrot.slane %v1278_v58, 4  ;;  %v1287_v3 = vshll.u32 %v1202_v48, 16  ;;  %v931_v27 = vld [vmem:[#allocation4 + $0x2c] sm:$0x1] }
  0x73   : > { %2198 = vmatmul.mubr.bf16.vlgmr.msra.gmra.mrb[16].mxu0 %v2682_v17  ;;  %v1283_v2 = vrot.slane %v1281_v59, 5  ;;  %v1275_v7 = vrot.slane %v1273_v55, 5  ;;  %v1079_v17 = vld [vmem:[#allocation4 + $0x2c] sm:$0x1]  ;;  %v2691_v23 = vrot.slane %v1080_v18, 9  ;;  %v1124_v25 = vrot.slane %v1081_v21, 5 }
  0x74   : > { %3057 = vmatpush3.bf16.msra.mxu1 %v3640_v57  ;;  %3025 = vmatpush3.bf16.msra.mxu0 %v3609_v44  ;;  %v984_v44 = vshll.u32 %v928_v28, 16  ;;  %v1270_v5 = vor.u32 %v1269_v63, %v1266_v56  ;;  %v1289_v11 = vrot.slane %v1287_v3, 5  ;;  %v1120_v6 = vrot.slane %v1079_v17, 5  ;;  %v932_v31 = vld [vmem:[#allocation4 + $0x30] sm:$0xf] }
  0x75   : > { %3050 = vmatprep.subr.bf16.mxu1 %v3648_v8  ;;  %3026 = vmatprep.subr.bf16.mxu0 %v3640_v57  ;;  %v1284_v10 = vor.u32 %v1283_v2, %v1280_v1  ;;  %v933_v32 = vld [vmem:[#allocation4 + $0x34] sm:$0x1]  ;;  %v995_v33 = vshrl.u32 %v930_v26, 16  ;;  %v998_v34 = vshll.u32 %v930_v26, 16  ;;  %v1125_v38 = vsel %vm3433_vm9, %v2691_v23, %v1124_v25  ;;  %v347_v42 = vld [vmem:[%s3348_s20 + $0x48] sm:$0xf] }
  0x76   : > { %2205 = vmatprep.mubr.bf16.mxu0 %v2695_v41  ;;  %v986_v52 = vrot.slane %v984_v44, 5  ;;  %v1271_v15 = vrot.slane %v1270_v5, 4  ;;  %v1004_v39 = vshll.u32 %v931_v27, 16  ;;  %v1009_v30 = vshrl.u32 %v932_v31, 16  ;;  %v346_v41 = vld [vmem:[%s3348_s20 + $0x44] sm:$0x1] }
  0x77   : > { %2271 = vmatmul.mubr.bf16.gmra.mrb[20].mxu1 %v3165_v19  ;;  %v2690_v19 = vrot.slane %v1078_v13, 9  ;;  %v1285_v20 = vrot.slane %v1284_v10, 4  ;;  %v997_v44 = vrot.slane %v995_v33, 4  ;;  %v1000_v45 = vrot.slane %v998_v34, 5  ;;  %v3174_v59 = vld [vmem:[%s3794_s2] ss:$0 sm:$0xff] }
  0x78   : > { %3058 = vmatpush3.bf16.msra.mxu1 %v3648_v8  ;;  %3027 = vmatpush3.bf16.msra.mxu0 %v3640_v57  ;;  %v987_v61 = vor.u32 %v986_v52, %v983_v35  ;;  %v979_v57 = vsel %vm3459_vm10, %v974_v60, %v978_v46  ;;  %v1276_v24 = vsel %vm3459_vm10, %v1271_v15, %v1275_v7  ;;  %v1012_v46 = vshll.u32 %v932_v31, 16  ;;  %v348_v35 = vld [vmem:[%s3348_s20 + $0x4c] sm:$0x1]  ;;  %v3173_v2 = vld [vmem:[%s3793_s1 + $0x238] sm:$0xff]   ;;  %v3175_v3 = vld [vmem:[%s3795_s3] ss:$0 sm:$0xff] }
  0x79   : > { %3051 = vmatprep.subr.bf16.mxu1 %v3668_v40  ;;  %3028 = vmatprep.subr.bf16.mxu0 %v3648_v8  ;;  %v1290_v28 = vsel %vm3459_vm10, %v1285_v20, %v1289_v11  ;;  %v1121_v29 = vsel %vm3433_vm9, %v2690_v19, %v1120_v6  ;;  %v1006_v47 = vrot.slane %v1004_v39, 5  ;;  %v1011_v48 = vrot.slane %v1009_v30, 4  ;;  %v1203_v18 = vld [vmem:[#allocation4 + $0x40] sm:$0xf]  ;;  %v934_v20 = vld [vmem:[#allocation4 + $0x38] sm:$0xf] }
  0x7a   : > { %v988_v4 = vrot.slane %v987_v61, 4  ;;  %v2704_v37 = vcombine.low %v1276_v24, %v1290_v28  ;;  %v2696_v43 = vcombine.low %v1121_v29, %v1125_v38  ;;  %v1018_v49 = vshll.u32 %v933_v32, 16  ;;  %v1082_v28 = vld [vmem:[#allocation4 + $0x38] sm:$0xe]  ;;  %v935_v29 = vld [vmem:[#allocation4 + $0x3c] sm:$0x1] }
  0x7b   : > { %v366_v51 = vunpack.c.l.bf16 %v346_v41  ;;  %v1001_v52 = vor.u32 %v1000_v45, %v997_v44  ;;  %v1014_v54 = vrot.slane %v1012_v46, 5  ;;  %v367_v55 = vunpack.c.l.bf16 %v347_v42  ;;  %v1083_v32 = vld [vmem:[#allocation4 + $0x3c] sm:$0x1]  ;;  %v3731_v30 = vld [vmem:[#allocation4 + $0x30] sm:$0xe] }
  0x7c   : > { %3059 = vmatpush3.bf16.msra.mxu1 %v3668_v40  ;;  %3029 = vmatpush3.bf16.msra.mxu0 %v3648_v8  ;;  %v993_v14 = vsel %vm3459_vm10, %v988_v4, %v992_v62  ;;  %v3168_v8 = vld [vmem:[#allocation4 + $0x30] ss:$8 sps:$4 sm:$0xff]   ;;  %v368_v56 = vunpack.c.l.bf16 %v348_v35  ;;  %v1020_v58 = vrot.slane %v1018_v49, 5  ;;  %v1295_v21 = vshll.u32 %v1203_v18, 16  ;;  %v3733_v44 = vld [vmem:[#allocation4 + $0x34] sm:$0x1] }
  0x7d   : > { %3052 = vmatprep.subr.bf16.mxu1 %v3677_v0  ;;  %3030 = vmatprep.subr.bf16.mxu0 %v3668_v40  ;;  %v2683_v50 = vcombine.low %v979_v57, %v993_v14  ;;  %v392_v60 = vmul.f32 %v3174_v59, %v366_v51  ;;  %v1002_v61 = vrot.slane %v1001_v52, 4  ;;  %v1015_v62 = vor.u32 %v1014_v54, %v1011_v48  ;;  %v1350_v51 = vld [vmem:[#allocation4 + $0x3c] sm:$0x1]  ;;  %v1339_v52 = vld [vmem:[#allocation4 + $0x10] sm:$0xe] }
  0x7e   : > { %2278 = vmatprep.mubr.bf16.mxu1 %v2704_v37  ;;  %v393_v63 = vmul.f32 %v3174_v59, %v367_v55  ;;  %v394_v1 = vmul.f32 %v3174_v59, %v368_v56  ;;  %v1023_v6 = vshrl.u32 %v934_v20, 16  ;;  %v1026_v23 = vshll.u32 %v934_v20, 16  ;;  %v1340_v54 = vld [vmem:[#allocation4 + $0x14] sm:$0x1]  ;;  %v1342_v59 = vld [vmem:[#allocation4 + $0x1c] sm:$0x1] }
  0x7f   : > { %2206 = vmatmul.mubr.bf16.gmra.mrb[20].mxu0 %v2683_v50  ;;  %2279 = vmatmul.mubr.bf16.gmra.mrb[24].mxu1 %v3168_v8  ;;  %v418_v57 = vadd.f32 %v3175_v3, %v392_v60  ;;  %v1007_v4 = vsel %vm3459_vm10, %v1002_v61, %v1006_v47  ;;  %v936_v8 = vld [vmem:[#allocation4 + $0x40] sm:$0xf]  ;;  %v1297_v27 = vrot.slane %v1295_v21, 5  ;;  %v2692_v35 = vrot.slane %v1082_v28, 9  ;;  %v1349_v47 = vld [vmem:[#allocation4 + $0x38] sm:$0xe] }
  0x80   : > { %3060 = vmatpush3.bf16.msra.mxu1 %v3677_v0  ;;  %3031 = vmatpush3.bf16.msra.mxu0 %v3668_v40  ;;  %v3172_v40 = vld [vmem:[%s3793_s1 + $0x230] sm:$0xff]   ;;  %v419_v5 = vadd.f32 %v3175_v3, %v393_v63  ;;  %v420_v7 = vadd.f32 %v3175_v3, %v394_v1  ;;  %v1037_v24 = vshrl.u32 %v936_v8, 16  ;;  %v1040_v25 = vshll.u32 %v936_v8, 16  ;;  %v1343_v3 = vld [vmem:[#allocation4 + $0x20] sm:$0xe] }
  0x81   : > { %3053 = vmatprep.subr.bf16.mxu1 %v3686_v12  ;;  %3032 = vmatprep.subr.bf16.mxu0 %v3677_v0  ;;  %v438_v10 = vmax.f32 %v418_v57, 0.0  ;;  %v1025_v33 = vrot.slane %v1023_v6, 4  ;;  %v1028_v34 = vrot.slane %v1026_v23, 5  ;;  %v1128_v55 = vrot.slane %v1083_v32, 5 }
  0x82   : > { %2213 = vmatprep.mubr.bf16.mxu0 %v2696_v43  ;;  %v439_v13 = vmax.f32 %v419_v5, 0.0  ;;  %v440_v14 = vmax.f32 %v420_v7, 0.0  ;;  %v1039_v37 = vrot.slane %v1037_v24, 4  ;;  %v1042_v38 = vrot.slane %v1040_v25, 5  ;;  %v1344_v7 = vld [vmem:[#allocation4 + $0x24] sm:$0x1] }
  0x83   : > { %v2818_v17 = vpack.c.bf16 %v438_v10, %v438_v10  ;;  %v1029_v48 = vor.u32 %v1028_v34, %v1025_v33  ;;  %v2710_v16 = vrot.slane %v3731_v30, 9  ;;  %v1389_v22 = vrot.slane %v3733_v44, 5  ;;  %v1346_v25 = vld [vmem:[#allocation4 + $0x2c] sm:$0x1] }
  0x84   : > { %3061 = vmatpush3.bf16.msra.mxu1 %v3686_v12  ;;  %3033 = vmatpush3.bf16.msra.mxu0 %v3677_v0  ;;  %v1016_v0 = vrot.slane %v1015_v62, 4  ;;  %v2819_v19 = vpack.c.bf16 %v439_v13, %v439_v13  ;;  %v2820_v50 = vpack.c.bf16 %v440_v14, %v440_v14  ;;  %v1043_v49 = vor.u32 %v1042_v38, %v1039_v37 }
  0x85   : > { %3054 = vmatprep.subr.bf16.mxu1 %v3172_v40  ;;  %3034 = vmatprep.subr.bf16.mxu0 %v3686_v12  ;;  %538 = vst [vmem:[#allocation4 + $0x44] sm:$0x1] %v2818_v17  ;;  %v2711_v61 = vrot.slane %v1349_v47, 9  ;;  %v1393_v63 = vrot.slane %v1350_v51, 5  ;;  %v2706_v1 = vrot.slane %v1339_v52, 9  ;;  %v1030_v57 = vrot.slane %v1029_v48, 4 }
  0x86   : > { %v1021_v11 = vsel %vm3459_vm10, %v1016_v0, %v1020_v58  ;;  %539 = vst [vmem:[#allocation4 + $0x48] sm:$0xf] %v2819_v19  ;;  %540 = vst [vmem:[#allocation4 + $0x4c] sm:$0x1] %v2820_v50  ;;  %v1341_v58 = vld [vmem:[#allocation4 + $0x18] sm:$0xe]  ;;  %v1129_v8 = vsel %vm3433_vm9, %v2692_v35, %v1128_v55 }
  0x87   : > { %v2684_v15 = vcombine.low %v1007_v4, %v1021_v11  ;;  %544 = vst [vmem:[#allocation4 + $0x48] sm:$0xf] %v3200_v9  ;;  %545 = vst [vmem:[#allocation4 + $0x4c] sm:$0x1] %v3200_v9  ;;  %v1084_v9 = vld [vmem:[#allocation4 + $0x40] sm:$0xe]  ;;  %v1394_v44 = vsel %vm3433_vm9, %v2711_v61, %v1393_v63 }
  0x88   : > { %3062 = vmatpush3.bf16.msra.mxu1 %v3172_v40  ;;  %3035 = vmatpush3.bf16.msra.mxu0 %v3686_v12  ;;  %v1292_v12 = vshrl.u32 %v1203_v18, 16  ;;  %v2693_v56 = vrot.slane %v1084_v9, 9  ;;  %v1044_v4 = vrot.slane %v1043_v49, 4  ;;  %v2707_v0 = vrot.slane %v1341_v58, 9  ;;  %v1345_v18 = vld [vmem:[#allocation4 + $0x28] sm:$0xe] }
  0x89   : > { %3055 = vmatprep.subr.bf16.mxu1 %v3173_v2  ;;  %3036 = vmatprep.subr.bf16.mxu0 %v3172_v40  ;;  %v1377_v5 = vrot.slane %v1342_v59, 5  ;;  %v2708_v19 = vrot.slane %v1343_v3, 9  ;;  %v2709_v34 = vrot.slane %v1345_v18, 9  ;;  %v1385_v9 = vrot.slane %v1346_v25, 5 }
  0x8a   : > { %2214 = vmatmul.mubr.bf16.gmra.mrb[24].mxu0 %v2684_v15  ;;  %v1294_v26 = vrot.slane %v1292_v12, 4 }
  0x8b   : > { %v1378_v24 = vsel %vm3433_vm9, %v2707_v0, %v1377_v5  ;;  %v1386_v51 = vsel %vm3433_vm9, %v2709_v34, %v1385_v9 }
  0x8c   : > { %3063 = vmatpush3.bf16.msra.mxu1 %v3173_v2  ;;  %3037 = vmatpush3.bf16.msra.mxu0 %v3172_v40  ;;  %v605_v31 = vld [vmem:[#allocation4 + $0x44] sm:$0x1]  ;;  %v1298_v43 = vor.u32 %v1297_v27, %v1294_v26  ;;  %v1032_v40 = vshll.u32 %v935_v29, 16  ;;  %v1381_v29 = vrot.slane %v1344_v7, 5 }
  0x8d   : > { %3038 = vmatprep.subr.bf16.mxu0 %v3173_v2  ;;  %v606_v39 = vsel %vm3411_vm4, 0, %v605_v31 }
  0x8e   : > { %v576_v41 = vld [vmem:[#allocation4 + $0x48] sm:$0x1]  ;;  %607 = vst [vmem:[#allocation4 + $0x44] sm:$0x1] %v606_v39  ;;  %v608_v42 = vld [vmem:[#allocation4 + $0x4c] sm:$0x1]  ;;  %v1382_v49 = vsel %vm3433_vm9, %v2708_v19, %v1381_v29 }
  0x8f   : > { %v577_v45 = vsel %vm3403_vm3, 0, %v576_v41  ;;  %v609_v46 = vsel %vm3411_vm4, 0, %v608_v42  ;;  %v3739_v60 = vrot.slane %v1298_v43, 4  ;;  %v1034_v62 = vrot.slane %v1032_v40, 5 }
  0x90   : > { %3039 = vmatpush3.bf16.msra.mxu0 %v3173_v2  ;;  %578 = vst [vmem:[#allocation4 + $0x48] sm:$0x1] %v577_v45  ;;  %610 = vst [vmem:[#allocation4 + $0x4c] sm:$0x1] %v609_v46  ;;  %v1373_v2 = vrot.slane %v1340_v54, 5  ;;  %v1390_v43 = vsel %vm3433_vm9, %v2710_v16, %v1389_v22  ;;  %v2715_v22 = vcombine.low %v1382_v49, %v1386_v51 }
  0x91   : > { %v1035_v27 = vsel %vm3459_vm10, %v1030_v57, %v1034_v62  ;;  %v1351_v45 = vld [vmem:[#allocation4 + $0x40] sm:$0xe]  ;;  %v1353_v46 = vld [vmem:[#allocation4 + $0x48] sm:$0xe]  ;;  %v2716_v55 = vcombine.low %v1390_v43, %v1394_v44 }
  0x92   : > { %v1374_v12 = vsel %vm3433_vm9, %v2706_v1, %v1373_v2 }
  0x93   : > { %v2714_v39 = vcombine.low %v1374_v12, %v1378_v24 }
  0x95   : > { %v1204_v10 = vld [vmem:[#allocation4 + $0x44] sm:$0x1] }
  0x96   : > { %v1085_v11 = vld [vmem:[#allocation4 + $0x44] sm:$0x1]  ;;  %v1301_v14 = vshll.u32 %v1204_v10, 16 }
  0x97   : > { %v937_v13 = vld [vmem:[#allocation4 + $0x44] sm:$0x1]  ;;  %v1132_v15 = vrot.slane %v1085_v11, 5  ;;  %v1205_v50 = vld [vmem:[#allocation4 + $0x48] sm:$0xf] }
  0x98   : > { %v1046_v17 = vshll.u32 %v937_v13, 16  ;;  %v1206_v20 = vld [vmem:[#allocation4 + $0x4c] sm:$0x1]  ;;  %v1306_v21 = vshrl.u32 %v1205_v50, 16  ;;  %v1309_v6 = vshll.u32 %v1205_v50, 16  ;;  %v1303_v31 = vrot.slane %v1301_v14, 5 }
  0x99   : > { %v1315_v23 = vshll.u32 %v1206_v20, 16  ;;  %v1133_v26 = vsel %vm3433_vm9, %v2693_v56, %v1132_v15  ;;  %v1352_v47 = vld [vmem:[#allocation4 + $0x44] sm:$0x1]  ;;  %v1354_v48 = vld [vmem:[#allocation4 + $0x4c] sm:$0x1]  ;;  %v2712_v56 = vrot.slane %v1351_v45, 9 }
  0x9a   : > { %v1048_v28 = vrot.slane %v1046_v17, 5  ;;  %v1308_v32 = vrot.slane %v1306_v21, 4  ;;  %v1311_v33 = vrot.slane %v1309_v6, 5  ;;  %v2697_v37 = vcombine.low %v1129_v8, %v1133_v26  ;;  %v3171_v54 = vld [vmem:[#allocation4 + $0x40] ss:$8 sps:$4 sm:$0xff]  }
  0x9b   : > { %v1317_v41 = vrot.slane %v1315_v23, 5  ;;  %v1304_v35 = vsel %vm3459_vm10, %v3739_v60, %v1303_v31  ;;  %v1397_v59 = vrot.slane %v1352_v47, 5  ;;  %v2713_v60 = vrot.slane %v1353_v46, 9 }
  0x9c   : > { %v1049_v38 = vsel %vm3459_vm10, %v1044_v4, %v1048_v28  ;;  %v1312_v30 = vor.u32 %v1311_v33, %v1308_v32  ;;  %2221 = vmatprep.mubr.bf16.mxu0 %v2697_v37  ;;  %v1401_v16 = vrot.slane %v1354_v48, 5 }
  0x9d   : > { %v2685_v42 = vcombine.low %v1035_v27, %v1049_v38  ;;  %v1398_v61 = vsel %vm3433_vm9, %v2712_v56, %v1397_v59 }
  0x9e   : > { %v1313_v40 = vrot.slane %v1312_v30, 4  ;;  %v1402_v62 = vsel %vm3433_vm9, %v2713_v60, %v1401_v16 }
  0x9f   : > { %2222 = vmatmul.mubr.bf16.gmra.mrb[28].mxu0 %v2685_v42  ;;  %v2717_v36 = vcombine.low %v1398_v61, %v1402_v62 }
  0xa0   : > { %3040 = vmatprep.mubr.bf16.mxu0 %v2714_v39  ;;  %v1318_v52 = vsel %vm3459_vm10, %v1313_v40, %v1317_v41 }
  0xa1   : > { %v2705_v58 = vcombine.low %v1304_v35, %v1318_v52 }
  0xa3   : > { %2286 = vmatprep.mubr.bf16.mxu1 %v2705_v58 }
  0xa4   : > { %2287 = vmatmul.mubr.bf16.gmra.mrb[28].mxu1 %v3171_v54 }
  0xa5   : > { %3044 = vmatprep.mubr.bf16.mxu1 %v2716_v55 }
  0xa7   : > { %3041 = vmatmul.mubr.bf16.vlgmr.msra.gmra.mrb[32].mxu0 %v2715_v22 }
  0xac   : > { %3045 = vmatmul.mubr.bf16.vlgmr.msra.gmra.mrb[32].mxu1 %v2717_v36 }
 0x109   : > { %v2908_v63 = vpop.f32.mrb[0].mxu1 }
 0x10a   : > { %v2909_v1 = vpop.f32.mrb[1].mxu1 }
 0x10b   : > { %v2910_v2 = vadd.f32 %v2909_v1, %v2908_v63  ;;  %v2911_v3 = vpop.f32.mrb[2].mxu1 }
 0x10c   : > { %v2912_v57 = vpop.f32.mrb[3].mxu1 }
 0x10d   : > { %v2913_v4 = vadd.f32 %v2912_v57, %v2911_v3 }
 0x110   : > { %v2868_v0 = vpop.f32.mrb[0].mxu0 }
 0x111   : > { %v2869_v5 = vpop.f32.mrb[1].mxu0 }
 0x112   : > { %v2870_v7 = vadd.f32 %v2869_v5, %v2868_v0  ;;  %v2871_v10 = vpop.f32.mrb[2].mxu0 }
 0x113   : > { %v2872_v11 = vpop.f32.mrb[3].mxu0 }
 0x114   : > { %v2135_v13 = vadd.f32 %v2910_v2, %v2870_v7  ;;  %v2873_v14 = vadd.f32 %v2872_v11, %v2871_v10 }
 0x116   : > { %v2138_v15 = vadd.f32 %v2913_v4, %v2873_v14 }
 0x117   : > { %v2914_v17 = vpop.f32.mrb[4].mxu1 }
 0x118   : > { %v2915_v53 = vpop.f32.mrb[5].mxu1 }
 0x119   : > { %v2916_v18 = vadd.f32 %v2915_v53, %v2914_v17  ;;  %v2917_v19 = vpop.f32.mrb[6].mxu1 }
 0x11a   : > { %v2918_v50 = vpop.f32.mrb[7].mxu1  ;;  %v2874_v20 = vpop.f32.mrb[4].mxu0 }
 0x11b   : > { %v2919_v8 = vadd.f32 %v2918_v50, %v2917_v19  ;;  %v2875_v12 = vpop.f32.mrb[5].mxu0 }
 0x11c   : > { %v2876_v21 = vadd.f32 %v2875_v12, %v2874_v20  ;;  %v2877_v6 = vpop.f32.mrb[6].mxu0 }
 0x11d   : > { %v2878_v23 = vpop.f32.mrb[7].mxu0 }
 0x11e   : > { %v2143_v24 = vadd.f32 %v2916_v18, %v2876_v21  ;;  %v2879_v25 = vadd.f32 %v2878_v23, %v2877_v6 }
 0x120   : > { %v2146_v26 = vadd.f32 %v2919_v8, %v2879_v25 }
 0x12d   : > { %v2920_v27 = vpop.f32.mrb[8].mxu1 }
 0x12e   : > { %v2921_v28 = vpop.f32.mrb[9].mxu1 }
 0x12f   : > { %v2922_v29 = vadd.f32 %v2921_v28, %v2920_v27  ;;  %v2923_v31 = vpop.f32.mrb[10].mxu1 }
 0x130   : > { %v2924_v33 = vpop.f32.mrb[11].mxu1 }
 0x131   : > { %v2880_v32 = vpop.f32.mrb[8].mxu0  ;;  %v2925_v37 = vadd.f32 %v2924_v33, %v2923_v31 }
 0x132   : > { %v2881_v34 = vpop.f32.mrb[9].mxu0 }
 0x133   : > { %v2882_v38 = vadd.f32 %v2881_v34, %v2880_v32  ;;  %v2883_v39 = vpop.f32.mrb[10].mxu0 }
 0x134   : > { %v2884_v9 = vpop.f32.mrb[11].mxu0 }
 0x135   : > { %v2151_v30 = vadd.f32 %v2922_v29, %v2882_v38  ;;  %v2885_v41 = vadd.f32 %v2884_v9, %v2883_v39 }
 0x137   : > { %v2154_v42 = vadd.f32 %v2925_v37, %v2885_v41 }
 0x13a   : > { %v2926_v43 = vpop.f32.mrb[12].mxu1 }
 0x13b   : > { %v2927_v44 = vpop.f32.mrb[13].mxu1 }
 0x13c   : > { %v2928_v45 = vadd.f32 %v2927_v44, %v2926_v43  ;;  %v2929_v46 = vpop.f32.mrb[14].mxu1 }
 0x13d   : > { %v2930_v35 = vpop.f32.mrb[15].mxu1 }
 0x13e   : > { %v2886_v40 = vpop.f32.mrb[12].mxu0  ;;  %v2931_v47 = vadd.f32 %v2930_v35, %v2929_v46 }
 0x13f   : > { %v2887_v48 = vpop.f32.mrb[13].mxu0 }
 0x140   : > { %v2888_v49 = vadd.f32 %v2887_v48, %v2886_v40  ;;  %v2889_v51 = vpop.f32.mrb[14].mxu0 }
 0x141   : > { %v2890_v52 = vpop.f32.mrb[15].mxu0 }
 0x142   : > { %v2159_v54 = vadd.f32 %v2928_v45, %v2888_v49  ;;  %v2891_v55 = vadd.f32 %v2890_v52, %v2889_v51  ;;  %v2988_v56 = vpop.f32.mrb[16].mxu1 }
 0x143   : > { %v2989_v58 = vpop.f32.mrb[17].mxu1 }
 0x144   : > { %v2162_v59 = vadd.f32 %v2931_v47, %v2891_v55  ;;  %v2990_v60 = vadd.f32 %v2989_v58, %v2988_v56  ;;  %v2991_v16 = vpop.f32.mrb[18].mxu1 }
 0x145   : > { %v2992_v22 = vpop.f32.mrb[19].mxu1 }
 0x146   : > { %v2993_v61 = vadd.f32 %v2992_v22, %v2991_v16  ;;  %v2948_v62 = vpop.f32.mrb[16].mxu0 }
 0x147   : > { %v2949_v36 = vpop.f32.mrb[17].mxu0 }
 0x148   : > { %v2950_v63 = vadd.f32 %v2949_v36, %v2948_v62  ;;  %v2951_v1 = vpop.f32.mrb[18].mxu0 }
 0x149   : > { %v2952_v2 = vpop.f32.mrb[19].mxu0 }
 0x14a   : > { %v2200_v3 = vadd.f32 %v2950_v63, %v2135_v13  ;;  %v2953_v57 = vadd.f32 %v2952_v2, %v2951_v1  ;;  %v2994_v4 = vpop.f32.mrb[20].mxu1 }
 0x14b   : > { %v2995_v0 = vpop.f32.mrb[21].mxu1 }
 0x14c   : > { %v2203_v5 = vadd.f32 %v2953_v57, %v2138_v15  ;;  %v2996_v7 = vadd.f32 %v2995_v0, %v2994_v4  ;;  %v2997_v10 = vpop.f32.mrb[22].mxu1  ;;  %v2265_v11 = vadd.f32 %v2990_v60, %v2200_v3 }
 0x14d   : > { %v2998_v14 = vpop.f32.mrb[23].mxu1 }
 0x14e   : > { %v2999_v17 = vadd.f32 %v2998_v14, %v2997_v10  ;;  %v2268_v53 = vadd.f32 %v2993_v61, %v2203_v5 }
 0x152   : > { %v2954_v18 = vpop.f32.mrb[20].mxu0  ;;  %v3000_v6 = vpop.f32.mrb[24].mxu1 }
 0x153   : > { %v2955_v19 = vpop.f32.mrb[21].mxu0  ;;  %v3001_v23 = vpop.f32.mrb[25].mxu1 }
 0x154   : > { %v2956_v50 = vadd.f32 %v2955_v19, %v2954_v18  ;;  %v2957_v20 = vpop.f32.mrb[22].mxu0  ;;  %v3002_v25 = vadd.f32 %v3001_v23, %v3000_v6  ;;  %v3003_v27 = vpop.f32.mrb[26].mxu1 }
 0x155   : > { %v2958_v8 = vpop.f32.mrb[23].mxu0  ;;  %v3004_v15 = vpop.f32.mrb[27].mxu1 }
 0x156   : > { %v2208_v12 = vadd.f32 %v2956_v50, %v2143_v24  ;;  %v2959_v21 = vadd.f32 %v2958_v8, %v2957_v20  ;;  %v3005_v29 = vadd.f32 %v3004_v15, %v3003_v27 }
 0x158   : > { %v2211_v13 = vadd.f32 %v2959_v21, %v2146_v26  ;;  %v2273_v28 = vadd.f32 %v2996_v7, %v2208_v12 }
 0x15a   : > { %v2276_v31 = vadd.f32 %v2999_v17, %v2211_v13 }
 0x15d   : > { %v2960_v32 = vpop.f32.mrb[24].mxu0 }
 0x15e   : > { %v2961_v33 = vpop.f32.mrb[25].mxu0 }
 0x15f   : > { %v2962_v34 = vadd.f32 %v2961_v33, %v2960_v32  ;;  %v2963_v37 = vpop.f32.mrb[26].mxu0 }
 0x160   : > { %v2964_v38 = vpop.f32.mrb[27].mxu0 }
 0x161   : > { %v2216_v39 = vadd.f32 %v2962_v34, %v2151_v30  ;;  %v2965_v9 = vadd.f32 %v2964_v38, %v2963_v37 }
 0x163   : > { %v2219_v41 = vadd.f32 %v2965_v9, %v2154_v42  ;;  %v2281_v43 = vadd.f32 %v3002_v25, %v2216_v39 }
 0x165   : > { %v2284_v24 = vadd.f32 %v3005_v29, %v2219_v41 }
 0x172   : > { %v2966_v44 = vpop.f32.mrb[28].mxu0 }
 0x173   : > { %v2967_v45 = vpop.f32.mrb[29].mxu0 }
 0x174   : > { %v2968_v46 = vadd.f32 %v2967_v45, %v2966_v44  ;;  %v2969_v26 = vpop.f32.mrb[30].mxu0 }
 0x175   : > { %v2970_v35 = vpop.f32.mrb[31].mxu0 }
 0x176   : > { %v2224_v40 = vadd.f32 %v2968_v46, %v2159_v54  ;;  %v2971_v47 = vadd.f32 %v2970_v35, %v2969_v26 }
 0x177   : > { %v3006_v48 = vpop.f32.mrb[28].mxu1 }
 0x178   : > { %v2227_v49 = vadd.f32 %v2971_v47, %v2162_v59  ;;  %v3007_v51 = vpop.f32.mrb[29].mxu1 }
 0x179   : > { %v3008_v52 = vadd.f32 %v3007_v51, %v3006_v48  ;;  %v3009_v55 = vpop.f32.mrb[30].mxu1 }
 0x17a   : > { %v3042_v56 = vpop.f32.mrb[32].mxu0  ;;  %v3010_v58 = vpop.f32.mrb[31].mxu1 }
 0x17b   : > { %v2338_v30 = vadd.f32 %v3042_v56, %v2273_v28  ;;  %v2329_v60 = vpop.f32.mrb[33].mxu0  ;;  %v3011_v42 = vadd.f32 %v3010_v58, %v3009_v55  ;;  %v2289_v16 = vadd.f32 %v3008_v52, %v2224_v40 }
 0x17c   : > { %v2330_v22 = vadd.f32 %v2329_v60, %v2265_v11  ;;  %v3043_v61 = vpop.f32.mrb[34].mxu0 }
 0x17d   : > { %v2341_v62 = vadd.f32 %v3043_v61, %v2276_v31  ;;  %v2332_v36 = vpop.f32.mrb[35].mxu0  ;;  %v2292_v63 = vadd.f32 %v3011_v42, %v2227_v49  ;;  %v2426_v11 = vmul.f32 %v2338_v30, %v2338_v30 }
 0x17e   : > { %v2333_v1 = vadd.f32 %v2332_v36, %v2268_v53  ;;  %v2418_v59 = vmul.f32 %v2330_v22, %v2330_v22 }
 0x17f   : > { %v2837_v54 = vpack.c.bf16 %v2341_v62, %v2338_v30  ;;  %v3046_v2 = vpop.f32.mrb[32].mxu1  ;;  %v2430_v50 = vmul.f32 %v2341_v62, %v2341_v62 }
 0x180   : > { %v2832_v3 = vpack.c.bf16 %v2333_v1, %v2330_v22  ;;  %v2421_v57 = vadd.f32 %v2333_v1, %v2330_v22  ;;  %v2422_v4 = vmul.f32 %v2333_v1, %v2333_v1  ;;  %v2354_v0 = vadd.f32 %v3046_v2, %v2289_v16  ;;  %v2345_v5 = vpop.f32.mrb[33].mxu1 }
 0x181   : > { %2849 = vst [vmem:[%s311_s28 + $0x8] sm:$0xff] %v2837_v54   ;;  %v2346_v7 = vadd.f32 %v2345_v5, %v2281_v43  ;;  %v3047_v10 = vpop.f32.mrb[34].mxu1 }
 0x182   : > { %2833 = vst [vmem:[%s311_s28] sm:$0xff] %v2832_v3   ;;  %v2423_v14 = vadd.f32 %v2422_v4, %v2418_v59  ;;  %v2425_v17 = vadd.f32 %v2421_v57, %v2338_v30  ;;  %v2357_v53 = vadd.f32 %v3047_v10, %v2292_v63  ;;  %v2348_v18 = vpop.f32.mrb[35].mxu1  ;;  %v2442_v15 = vmul.f32 %v2354_v0, %v2354_v0 }
 0x183   : > { %v2349_v19 = vadd.f32 %v2348_v18, %v2284_v24  ;;  %v2434_v21 = vmul.f32 %v2346_v7, %v2346_v7 }
 0x184   : > { %v2427_v20 = vadd.f32 %v2426_v11, %v2423_v14  ;;  %v2429_v8 = vadd.f32 %v2425_v17, %v2341_v62  ;;  %v2847_v12 = vpack.c.bf16 %v2357_v53, %v2354_v0  ;;  %v2446_v32 = vmul.f32 %v2357_v53, %v2357_v53 }
 0x185   : > { %v2842_v6 = vpack.c.bf16 %v2349_v19, %v2346_v7  ;;  %v2438_v25 = vmul.f32 %v2349_v19, %v2349_v19 }
 0x186   : > { %v2431_v23 = vadd.f32 %v2430_v50, %v2427_v20  ;;  %v2433_v13 = vadd.f32 %v2429_v8, %v2346_v7  ;;  %2851 = vst [vmem:[%s311_s28 + $0x18] sm:$0xff] %v2847_v12  }
 0x187   : > { %2850 = vst [vmem:[%s311_s28 + $0x10] sm:$0xff] %v2842_v6  }
 0x188   : > { %v2435_v27 = vadd.f32 %v2434_v21, %v2431_v23  ;;  %v2437_v28 = vadd.f32 %v2433_v13, %v2349_v19 }
 0x18a   : > { %v2439_v29 = vadd.f32 %v2438_v25, %v2435_v27  ;;  %v2441_v31 = vadd.f32 %v2437_v28, %v2354_v0 }
 0x18c   : > { %v2443_v33 = vadd.f32 %v2442_v15, %v2439_v29  ;;  %v2445_v34 = vadd.f32 %v2441_v31, %v2357_v53 }
 0x18e   : > { %v2447_v37 = vadd.f32 %v2446_v32, %v2443_v33  ;;  %2448 = vst [vmem:[%s318_s8] sm:$0xff] %v2445_v34 }
 0x190   : > { %2449 = vst [vmem:[%s325_s11] sm:$0xff] %v2447_v37 }
 0x191 PF: > { %s17_s23 = sadd.s32 1, %s3198_s23   ;;  %s3807_s21 = smov %s3194_s22 }
 0x192   : > { %p14_p5 = scmp.ge.s32.totalorder %s17_s23, 4   ;;  %s3808_s22 = smov %s3810_s24 }
 0x194   :  { %16 = sbr.rel (!%p14_p5) target bundleno = 2 (0x2), region = 96 }

</bundles_post_ra>
